<compile_context>
chip_gen: v6e
topology: v6e:2x2x1
jax: 0.10.0
libtpu: 0.0.40
codegen_flags: <defaults>
</compile_context>

<pallas_src>
import functools

import jax
import jax.numpy as jnp
from jax.experimental import pallas as pl
from jax.experimental.pallas import tpu as pltpu


# --------------------------------------------------------------------------
# Kernel
# --------------------------------------------------------------------------
def _bottleneck_kernel(x_ref, w1_ref, b1_ref, w2_ref, b2_ref, w3_ref, b3_ref,
                       out_ref, pad_ref):
    NB, H, W, Cin = x_ref.shape
    P = w1_ref.shape[1]
    Cout = w3_ref.shape[1]
    M = NB * H * W

    # ---- conv1 (1x1) + folded BN1 + ReLU (x is already bf16) ------------
    x_bf = x_ref[...].reshape(M, Cin)
    h1 = jnp.dot(x_bf, w1_ref[...], preferred_element_type=jnp.float32)
    h1 = jnp.maximum(h1 + b1_ref[...], 0.0)                  # (M, P) f32

    # ---- conv2 (3x3, stride=1, pad=1) + folded BN2 + ReLU ----------------
    # Zero only the 1-pixel border of the padded scratch (the interior is
    # fully overwritten).  Done every step so it stays correct when the
    # "parallel" grid axis is sharded across TensorCores (per-core scratch).
    zrow = jnp.zeros((NB, 1, W + 2, P), dtype=pad_ref.dtype)
    zcol = jnp.zeros((NB, H + 2, 1, P), dtype=pad_ref.dtype)
    pad_ref[:, 0:1, :, :] = zrow
    pad_ref[:, H + 1:H + 2, :, :] = zrow
    pad_ref[:, :, 0:1, :] = zcol
    pad_ref[:, :, W + 1:W + 2, :] = zcol
    pad_ref[:, 1:H + 1, 1:W + 1, :] = (
        h1.astype(pad_ref.dtype).reshape(NB, H, W, P))

    # Tap-accumulate: 9 small MXU matmuls straight off the padded scratch,
    # f32 accumulator held in vregs (no materialized im2col slab).
    acc = jnp.zeros((M, P), jnp.float32)
    for t in range(9):
        ky, kx = t // 3, t % 3
        patch = pad_ref[:, ky:ky + H, kx:kx + W, :].reshape(M, P)
        acc = acc + jnp.dot(patch, w2_ref[t],
                            preferred_element_type=jnp.float32)
    h2 = jnp.maximum(acc + b2_ref[...], 0.0)                  # (M, P) f32

    # ---- conv3 (1x1) + folded BN3 + residual + ReLU ----------------------
    h3 = jnp.dot(h2.astype(jnp.bfloat16), w3_ref[...],
                 preferred_element_type=jnp.float32)          # (M, Cout)
    res = x_ref[...].astype(jnp.float32).reshape(M, Cin)      # bf16 residual
    out = jnp.maximum(h3 + b3_ref[...] + res, 0.0)
    out_ref[...] = out.reshape(NB, H, W, Cout).astype(out_ref.dtype)


# --------------------------------------------------------------------------
# Block-size selection (VMEM-budget & generation aware)
# --------------------------------------------------------------------------
def _vmem_budget_bytes():
    # Physical VMEM: v5e/v6e 128 MiB, v7x 64 MiB per TensorCore.
    try:
        info = pltpu.get_tpu_info()
        phys = int(getattr(info, "vmem_capacity_bytes", 64 * 1024 * 1024))
    except Exception:
        phys = 64 * 1024 * 1024
    return int(phys * 0.8)


def _pick_batch_block(n, h, w, cin, p, cout, budget_bytes):
    """Largest divisor NB of n whose per-step working set fits the budget.

    Prefers M = NB*H*W that is a multiple of 8 (full sublanes) and keeps at
    least 2 grid steps when possible (so "parallel" spans both v7x cores).
    """
    def step_bytes(nb):
        m = nb * h * w
        x_blk = 2 * m * cin * 2                 # bf16 input, double-buffered
        o_blk = 2 * m * cout * 2                # bf16 output, double-buffered
        pad = nb * (h + 2) * (w + 2) * p * 2    # bf16 padded scratch
        wts = (cin * p + 9 * p * p + p * cout) * 2
        live = m * (2 * p + cin + cout) * 4     # f32 temporaries headroom
        return x_blk + o_blk + pad + wts + live

    feasible = [nb for nb in range(1, n + 1)
                if n % nb == 0 and step_bytes(nb) <= budget_bytes]
    if not feasible:
        feasible = [1]
    multi = [nb for nb in feasible if n // nb >= 2]
    cands = multi if multi else feasible
    aligned = [nb for nb in cands if (nb * h * w) % 8 == 0]
    pool = aligned if aligned else cands
    return max(pool)


# --------------------------------------------------------------------------
# pallas_call builder + wrappers
# --------------------------------------------------------------------------
@functools.lru_cache(maxsize=None)
def _make_forward(N, H, W, Cin, P, Cout, single_buffer_weights):
    budget = _vmem_budget_bytes()
    NB = _pick_batch_block(N, H, W, Cin, P, Cout, budget)
    wkw = dict(pipeline_mode=pl.Buffered(1)) if single_buffer_weights else {}

    grid_spec = pltpu.PrefetchScalarGridSpec(
        num_scalar_prefetch=0,
        grid=(N // NB,),
        in_specs=[
            pl.BlockSpec((NB, H, W, Cin), lambda n: (n, 0, 0, 0)),
            pl.BlockSpec((Cin, P), lambda n: (0, 0), **wkw),
            pl.BlockSpec((1, P), lambda n: (0, 0), **wkw),
            pl.BlockSpec((9, P, P), lambda n: (0, 0, 0), **wkw),
            pl.BlockSpec((1, P), lambda n: (0, 0), **wkw),
            pl.BlockSpec((P, Cout), lambda n: (0, 0), **wkw),
            pl.BlockSpec((1, Cout), lambda n: (0, 0), **wkw),
        ],
        out_specs=pl.BlockSpec((NB, H, W, Cout), lambda n: (n, 0, 0, 0)),
        scratch_shapes=[
            pltpu.VMEM((NB, H + 2, W + 2, P), jnp.bfloat16),   # padded h1
        ],
    )

    fwd = pl.pallas_call(
        _bottleneck_kernel,
        out_shape=jax.ShapeDtypeStruct((N, H, W, Cout), jnp.bfloat16),
        grid_spec=grid_spec,
        compiler_params=pltpu.CompilerParams(
            dimension_semantics=("parallel",),
            vmem_limit_bytes=budget),
    )
    return jax.jit(fwd)


_WORKING_FWD = {}


def bottleneck_forward_nhwc(x, w1f, b1, w2f, b2, w3f, b3):
    """Fused Bottleneck forward.  NHWC in -> NHWC out (bf16 activations)."""
    x = x.astype(jnp.bfloat16)
    N, H, W, Cin = x.shape
    P = w1f.shape[1]
    Cout = w3f.shape[1]
    assert Cout == Cin, "downsample=None requires inplanes == 4*planes"
    key = (N, H, W, Cin, P, Cout)
    fn = _WORKING_FWD.get(key)
    if fn is None:
        try:
            fn = _make_forward(*key, True)
            jax.block_until_ready(fn(x, w1f, b1, w2f, b2, w3f, b3))
        except Exception:
            # Fallback: single-buffered weight BlockSpecs not supported by
            # this jax version -> use default double-buffered specs.
            fn = _make_forward(*key, False)
        _WORKING_FWD[key] = fn
    return fn(x, w1f, b1, w2f, b2, w3f, b3)


def bottleneck_forward_nchw(x_nchw, *params):
    """Thin PyTorch-layout adapter.  An end-to-end NHWC pipeline should call
    bottleneck_forward_nhwc directly and skip these two full-HBM transposes."""
    x = jnp.transpose(x_nchw, (0, 2, 3, 1))
    out = bottleneck_forward_nhwc(x, *params)
    return jnp.transpose(out, (0, 3, 1, 2))


# --------------------------------------------------------------------------
# Host-side parameter construction (BN folded into convs)
# --------------------------------------------------------------------------
def init_params(key, inplanes, planes):
    """Deterministic synthetic weights (PyTorch shapes), BN folded, bf16."""
    expansion = 4
    ks = jax.random.split(key, 6)
    w1 = jax.random.normal(ks[0], (planes, inplanes, 1, 1), jnp.float32) * 0.1
    w2 = jax.random.normal(ks[1], (planes, planes, 3, 3), jnp.float32) * 0.1
    w3 = jax.random.normal(ks[2], (planes * expansion, planes, 1, 1),
                           jnp.float32) * 0.1

    def bn_params(k, c):
        k1, k2, k3, k4 = jax.random.split(k, 4)
        gamma = 1.0 + 0.1 * jax.random.normal(k1, (c,), jnp.float32)
        beta = 0.1 * jax.random.normal(k2, (c,), jnp.float32)
        mean = 0.1 * jax.random.normal(k3, (c,), jnp.float32)
        var = jnp.abs(jax.random.normal(k4, (c,), jnp.float32)) + 0.5
        return gamma, beta, mean, var

    bn1 = bn_params(ks[3], planes)
    bn2 = bn_params(ks[4], planes)
    bn3 = bn_params(ks[5], planes * expansion)
    eps = 1e-5

    def fold(w_oihw, bnp):
        gamma, beta, mean, var = bnp
        scale = gamma / jnp.sqrt(var + eps)
        shift = beta - mean * scale
        w_hwio = jnp.transpose(w_oihw, (2, 3, 1, 0)) * scale   # per-O scale
        return w_hwio, shift.reshape(1, -1)

    w1f, b1 = fold(w1, bn1)    # (1,1,Cin,P)
    w2f, b2 = fold(w2, bn2)    # (3,3,P,P)  (ky, kx, cin, cout)
    w3f, b3 = fold(w3, bn3)    # (1,1,P,4P)

    # bf16 MXU operands; biases stay f32.
    return (w1f.reshape(inplanes, planes).astype(jnp.bfloat16), b1,
            w2f.reshape(9, planes, planes).astype(jnp.bfloat16), b2,
            w3f.reshape(planes, planes * expansion).astype(jnp.bfloat16), b3)


# --------------------------------------------------------------------------
# Plain-JAX reference (NHWC, same bf16 operand casts as the kernel)
# --------------------------------------------------------------------------
@jax.jit
def reference_forward_nhwc(x, w1f, b1, w2f, b2, w3f, b3):
    dn = ("NHWC", "HWIO", "NHWC")
    Cin, P = w1f.shape
    Cout = w3f.shape[1]
    xb = x.astype(jnp.bfloat16)
    h = jax.lax.conv_general_dilated(
        xb, w1f.reshape(1, 1, Cin, P), (1, 1), "SAME",
        dimension_numbers=dn, preferred_element_type=jnp.float32) + b1
    h = jax.nn.relu(h)
    h = jax.lax.conv_general_dilated(
        h.astype(jnp.bfloat16), w2f.reshape(3, 3, P, P), (1, 1), "SAME",
        dimension_numbers=dn, preferred_element_type=jnp.float32) + b2
    h = jax.nn.relu(h)
    h = jax.lax.conv_general_dilated(
        h.astype(jnp.bfloat16), w3f.reshape(1, 1, P, Cout), (1, 1), "SAME",
        dimension_numbers=dn, preferred_element_type=jnp.float32) + b3
    return jax.nn.relu(h + xb.astype(jnp.float32))


# --------------------------------------------------------------------------
if __name__ == "__main__":
    key = jax.random.PRNGKey(0)
    k_x, k_p = jax.random.split(key)

    planes = 8
    inplanes = planes * 4            # 32: residual works with no downsample
    N, H, W = 2, 8, 8

    x = jax.random.normal(k_x, (N, H, W, inplanes), jnp.float32).astype(
        jnp.bfloat16)
    params = init_params(k_p, inplanes, planes)

    out = jax.block_until_ready(bottleneck_forward_nhwc(x, *params))
    ref = jax.block_until_ready(reference_forward_nhwc(x, *params))

    assert out.shape == (N, H, W, planes * 4)
    assert out.dtype == jnp.bfloat16
    err = float(jnp.max(jnp.abs(out.astype(jnp.float32)
                                - ref.astype(jnp.float32))))
    assert err < 5e-2, err

    print("KERNEL_OK")
</pallas_src>

<mosaic_0001>
module attributes {stable_mosaic.version = 11 : i64} {
  func.func @_bottleneck_kernel(%arg0: i32, %arg1: memref<1x8x8x32xbf16, #tpu.memory_space<vmem>>, %arg2: memref<32x8xbf16, #tpu.memory_space<vmem>>, %arg3: memref<1x8xf32, #tpu.memory_space<vmem>>, %arg4: memref<9x8x8xbf16, #tpu.memory_space<vmem>>, %arg5: memref<1x8xf32, #tpu.memory_space<vmem>>, %arg6: memref<8x32xbf16, #tpu.memory_space<vmem>>, %arg7: memref<1x32xf32, #tpu.memory_space<vmem>>, %arg8: memref<1x8x8x32xbf16, #tpu.memory_space<vmem>>, %arg9: memref<1x10x10x8xbf16, #tpu.memory_space<vmem>>) attributes {dimension_semantics = [#tpu.dimension_semantics<parallel>], iteration_bounds = array<i64: 2>, scalar_prefetch = 0 : i64, scratch_operands = 1 : i64, tpu.core_type = #tpu.core_type<tc>, window_params = [{transform_indices = @transform_0, window_bounds = array<i64: 1, 8, 8, 32>}, {pipeline_mode = #tpu.pipeline_mode<synchronous>, transform_indices = @transform_1, window_bounds = array<i64: 32, 8>}, {pipeline_mode = #tpu.pipeline_mode<synchronous>, transform_indices = @transform_2, window_bounds = array<i64: 1, 8>}, {pipeline_mode = #tpu.pipeline_mode<synchronous>, transform_indices = @transform_3, window_bounds = array<i64: 9, 8, 8>}, {pipeline_mode = #tpu.pipeline_mode<synchronous>, transform_indices = @transform_4, window_bounds = array<i64: 1, 8>}, {pipeline_mode = #tpu.pipeline_mode<synchronous>, transform_indices = @transform_5, window_bounds = array<i64: 8, 32>}, {pipeline_mode = #tpu.pipeline_mode<synchronous>, transform_indices = @transform_6, window_bounds = array<i64: 1, 32>}, {transform_indices = @transform_7, window_bounds = array<i64: 1, 8, 8, 32>}]} {
    %c0 = arith.constant 0 : index
    %c0_0 = arith.constant 0 : index
    %c0_1 = arith.constant 0 : index
    %c0_2 = arith.constant 0 : index
    %0 = vector.load %arg1[%c0, %c0_0, %c0_1, %c0_2] : memref<1x8x8x32xbf16, #tpu.memory_space<vmem>>, vector<1x8x8x32xbf16>
    %1 = vector.shape_cast %0 : vector<1x8x8x32xbf16> to vector<64x32xbf16>
    %c0_3 = arith.constant 0 : index
    %c0_4 = arith.constant 0 : index
    %2 = vector.load %arg2[%c0_3, %c0_4] : memref<32x8xbf16, #tpu.memory_space<vmem>>, vector<32x8xbf16>
    %cst = arith.constant dense<0.000000e+00> : vector<64x8xf32>
    %3 = tpu.matmul %1, %2, %cst {dimension_numbers = #tpu.dot_dimension_numbers<[1], [0], [0], [1], [0, 0, 1, 1], [], []>} : vector<64x32xbf16>, vector<32x8xbf16>, vector<64x8xf32> -> vector<64x8xf32>
    %c0_5 = arith.constant 0 : index
    %c0_6 = arith.constant 0 : index
    %4 = vector.load %arg3[%c0_5, %c0_6] : memref<1x8xf32, #tpu.memory_space<vmem>>, vector<1x8xf32>
    %5 = vector.broadcast %4 : vector<1x8xf32> to vector<64x8xf32>
    %6 = arith.addf %3, %5 : vector<64x8xf32>
    %cst_7 = arith.constant 0.000000e+00 : f32
    %7 = vector.broadcast %cst_7 : f32 to vector<64x8xf32>
    %8 = arith.maximumf %6, %7 : vector<64x8xf32>
    %cst_8 = arith.constant 0.000000e+00 : bf16
    %9 = vector.broadcast %cst_8 : bf16 to vector<1x1x10x8xbf16>
    %cst_9 = arith.constant 0.000000e+00 : bf16
    %10 = vector.broadcast %cst_9 : bf16 to vector<1x10x1x8xbf16>
    %c0_10 = arith.constant 0 : index
    %c0_11 = arith.constant 0 : index
    %c0_12 = arith.constant 0 : index
    %c0_13 = arith.constant 0 : index
    %11 = vector.load %arg9[%c0_10, %c0_11, %c0_12, %c0_13] : memref<1x10x10x8xbf16, #tpu.memory_space<vmem>>, vector<1x1x10x8xbf16>
    tpu.vector_store %arg9[%c0_10, %c0_11, %c0_12, %c0_13], %9 {strides = array<i32>} : memref<1x10x10x8xbf16, #tpu.memory_space<vmem>>, vector<1x1x10x8xbf16>,
    %c0_14 = arith.constant 0 : index
    %c9 = arith.constant 9 : index
    %c0_15 = arith.constant 0 : index
    %c0_16 = arith.constant 0 : index
    %12 = vector.load %arg9[%c0_14, %c9, %c0_15, %c0_16] : memref<1x10x10x8xbf16, #tpu.memory_space<vmem>>, vector<1x1x10x8xbf16>
    tpu.vector_store %arg9[%c0_14, %c9, %c0_15, %c0_16], %9 {strides = array<i32>} : memref<1x10x10x8xbf16, #tpu.memory_space<vmem>>, vector<1x1x10x8xbf16>,
    %c0_17 = arith.constant 0 : index
    %c0_18 = arith.constant 0 : index
    %c0_19 = arith.constant 0 : index
    %c0_20 = arith.constant 0 : index
    %13 = vector.load %arg9[%c0_17, %c0_18, %c0_19, %c0_20] : memref<1x10x10x8xbf16, #tpu.memory_space<vmem>>, vector<1x10x1x8xbf16>
    tpu.vector_store %arg9[%c0_17, %c0_18, %c0_19, %c0_20], %10 {strides = array<i32>} : memref<1x10x10x8xbf16, #tpu.memory_space<vmem>>, vector<1x10x1x8xbf16>,
    %c0_21 = arith.constant 0 : index
    %c0_22 = arith.constant 0 : index
    %c9_23 = arith.constant 9 : index
    %c0_24 = arith.constant 0 : index
    %14 = vector.load %arg9[%c0_21, %c0_22, %c9_23, %c0_24] : memref<1x10x10x8xbf16, #tpu.memory_space<vmem>>, vector<1x10x1x8xbf16>
    tpu.vector_store %arg9[%c0_21, %c0_22, %c9_23, %c0_24], %10 {strides = array<i32>} : memref<1x10x10x8xbf16, #tpu.memory_space<vmem>>, vector<1x10x1x8xbf16>,
    %15 = arith.truncf %8 : vector<64x8xf32> to vector<64x8xbf16>
    %16 = vector.shape_cast %15 : vector<64x8xbf16> to vector<1x8x8x8xbf16>
    %c0_25 = arith.constant 0 : index
    %c1 = arith.constant 1 : index
    %c1_26 = arith.constant 1 : index
    %c0_27 = arith.constant 0 : index
    %17 = vector.load %arg9[%c0_25, %c1, %c1_26, %c0_27] : memref<1x10x10x8xbf16, #tpu.memory_space<vmem>>, vector<1x8x8x8xbf16>
    tpu.vector_store %arg9[%c0_25, %c1, %c1_26, %c0_27], %16 {strides = array<i32>} : memref<1x10x10x8xbf16, #tpu.memory_space<vmem>>, vector<1x8x8x8xbf16>,
    %cst_28 = arith.constant 0.000000e+00 : f32
    %18 = vector.broadcast %cst_28 : f32 to vector<64x8xf32>
    %c0_29 = arith.constant 0 : index
    %c0_30 = arith.constant 0 : index
    %c0_31 = arith.constant 0 : index
    %c0_32 = arith.constant 0 : index
    %19 = vector.load %arg9[%c0_29, %c0_30, %c0_31, %c0_32] : memref<1x10x10x8xbf16, #tpu.memory_space<vmem>>, vector<1x8x8x8xbf16>
    %20 = vector.shape_cast %19 : vector<1x8x8x8xbf16> to vector<64x8xbf16>
    %c0_33 = arith.constant 0 : index
    %c0_34 = arith.constant 0 : index
    %c0_35 = arith.constant 0 : index
    %21 = vector.load %arg4[%c0_33, %c0_34, %c0_35] : memref<9x8x8xbf16, #tpu.memory_space<vmem>>, vector<1x8x8xbf16>
    %22 = vector.shape_cast %21 : vector<1x8x8xbf16> to vector<8x8xbf16>
    %cst_36 = arith.constant dense<0.000000e+00> : vector<64x8xf32>
    %23 = tpu.matmul %20, %22, %cst_36 {dimension_numbers = #tpu.dot_dimension_numbers<[1], [0], [0], [1], [0, 0, 1, 1], [], []>} : vector<64x8xbf16>, vector<8x8xbf16>, vector<64x8xf32> -> vector<64x8xf32>
    %24 = arith.addf %18, %23 : vector<64x8xf32>
    %c0_37 = arith.constant 0 : index
    %c0_38 = arith.constant 0 : index
    %c1_39 = arith.constant 1 : index
    %c0_40 = arith.constant 0 : index
    %25 = vector.load %arg9[%c0_37, %c0_38, %c1_39, %c0_40] : memref<1x10x10x8xbf16, #tpu.memory_space<vmem>>, vector<1x8x8x8xbf16>
    %26 = vector.shape_cast %25 : vector<1x8x8x8xbf16> to vector<64x8xbf16>
    %c1_41 = arith.constant 1 : index
    %c0_42 = arith.constant 0 : index
    %c0_43 = arith.constant 0 : index
    %27 = vector.load %arg4[%c1_41, %c0_42, %c0_43] : memref<9x8x8xbf16, #tpu.memory_space<vmem>>, vector<1x8x8xbf16>
    %28 = vector.shape_cast %27 : vector<1x8x8xbf16> to vector<8x8xbf16>
    %cst_44 = arith.constant dense<0.000000e+00> : vector<64x8xf32>
    %29 = tpu.matmul %26, %28, %cst_44 {dimension_numbers = #tpu.dot_dimension_numbers<[1], [0], [0], [1], [0, 0, 1, 1], [], []>} : vector<64x8xbf16>, vector<8x8xbf16>, vector<64x8xf32> -> vector<64x8xf32>
    %30 = arith.addf %24, %29 : vector<64x8xf32>
    %c0_45 = arith.constant 0 : index
    %c0_46 = arith.constant 0 : index
    %c2 = arith.constant 2 : index
    %c0_47 = arith.constant 0 : index
    %31 = vector.load %arg9[%c0_45, %c0_46, %c2, %c0_47] : memref<1x10x10x8xbf16, #tpu.memory_space<vmem>>, vector<1x8x8x8xbf16>
    %32 = vector.shape_cast %31 : vector<1x8x8x8xbf16> to vector<64x8xbf16>
    %c2_48 = arith.constant 2 : index
    %c0_49 = arith.constant 0 : index
    %c0_50 = arith.constant 0 : index
    %33 = vector.load %arg4[%c2_48, %c0_49, %c0_50] : memref<9x8x8xbf16, #tpu.memory_space<vmem>>, vector<1x8x8xbf16>
    %34 = vector.shape_cast %33 : vector<1x8x8xbf16> to vector<8x8xbf16>
    %cst_51 = arith.constant dense<0.000000e+00> : vector<64x8xf32>
    %35 = tpu.matmul %32, %34, %cst_51 {dimension_numbers = #tpu.dot_dimension_numbers<[1], [0], [0], [1], [0, 0, 1, 1], [], []>} : vector<64x8xbf16>, vector<8x8xbf16>, vector<64x8xf32> -> vector<64x8xf32>
    %36 = arith.addf %30, %35 : vector<64x8xf32>
    %c0_52 = arith.constant 0 : index
    %c1_53 = arith.constant 1 : index
    %c0_54 = arith.constant 0 : index
    %c0_55 = arith.constant 0 : index
    %37 = vector.load %arg9[%c0_52, %c1_53, %c0_54, %c0_55] : memref<1x10x10x8xbf16, #tpu.memory_space<vmem>>, vector<1x8x8x8xbf16>
    %38 = vector.shape_cast %37 : vector<1x8x8x8xbf16> to vector<64x8xbf16>
    %c3 = arith.constant 3 : index
    %c0_56 = arith.constant 0 : index
    %c0_57 = arith.constant 0 : index
    %39 = vector.load %arg4[%c3, %c0_56, %c0_57] : memref<9x8x8xbf16, #tpu.memory_space<vmem>>, vector<1x8x8xbf16>
    %40 = vector.shape_cast %39 : vector<1x8x8xbf16> to vector<8x8xbf16>
    %cst_58 = arith.constant dense<0.000000e+00> : vector<64x8xf32>
    %41 = tpu.matmul %38, %40, %cst_58 {dimension_numbers = #tpu.dot_dimension_numbers<[1], [0], [0], [1], [0, 0, 1, 1], [], []>} : vector<64x8xbf16>, vector<8x8xbf16>, vector<64x8xf32> -> vector<64x8xf32>
    %42 = arith.addf %36, %41 : vector<64x8xf32>
    %c0_59 = arith.constant 0 : index
    %c1_60 = arith.constant 1 : index
    %c1_61 = arith.constant 1 : index
    %c0_62 = arith.constant 0 : index
    %43 = vector.load %arg9[%c0_59, %c1_60, %c1_61, %c0_62] : memref<1x10x10x8xbf16, #tpu.memory_space<vmem>>, vector<1x8x8x8xbf16>
    %44 = vector.shape_cast %43 : vector<1x8x8x8xbf16> to vector<64x8xbf16>
    %c4 = arith.constant 4 : index
    %c0_63 = arith.constant 0 : index
    %c0_64 = arith.constant 0 : index
    %45 = vector.load %arg4[%c4, %c0_63, %c0_64] : memref<9x8x8xbf16, #tpu.memory_space<vmem>>, vector<1x8x8xbf16>
    %46 = vector.shape_cast %45 : vector<1x8x8xbf16> to vector<8x8xbf16>
    %cst_65 = arith.constant dense<0.000000e+00> : vector<64x8xf32>
    %47 = tpu.matmul %44, %46, %cst_65 {dimension_numbers = #tpu.dot_dimension_numbers<[1], [0], [0], [1], [0, 0, 1, 1], [], []>} : vector<64x8xbf16>, vector<8x8xbf16>, vector<64x8xf32> -> vector<64x8xf32>
    %48 = arith.addf %42, %47 : vector<64x8xf32>
    %c0_66 = arith.constant 0 : index
    %c1_67 = arith.constant 1 : index
    %c2_68 = arith.constant 2 : index
    %c0_69 = arith.constant 0 : index
    %49 = vector.load %arg9[%c0_66, %c1_67, %c2_68, %c0_69] : memref<1x10x10x8xbf16, #tpu.memory_space<vmem>>, vector<1x8x8x8xbf16>
    %50 = vector.shape_cast %49 : vector<1x8x8x8xbf16> to vector<64x8xbf16>
    %c5 = arith.constant 5 : index
    %c0_70 = arith.constant 0 : index
    %c0_71 = arith.constant 0 : index
    %51 = vector.load %arg4[%c5, %c0_70, %c0_71] : memref<9x8x8xbf16, #tpu.memory_space<vmem>>, vector<1x8x8xbf16>
    %52 = vector.shape_cast %51 : vector<1x8x8xbf16> to vector<8x8xbf16>
    %cst_72 = arith.constant dense<0.000000e+00> : vector<64x8xf32>
    %53 = tpu.matmul %50, %52, %cst_72 {dimension_numbers = #tpu.dot_dimension_numbers<[1], [0], [0], [1], [0, 0, 1, 1], [], []>} : vector<64x8xbf16>, vector<8x8xbf16>, vector<64x8xf32> -> vector<64x8xf32>
    %54 = arith.addf %48, %53 : vector<64x8xf32>
    %c0_73 = arith.constant 0 : index
    %c2_74 = arith.constant 2 : index
    %c0_75 = arith.constant 0 : index
    %c0_76 = arith.constant 0 : index
    %55 = vector.load %arg9[%c0_73, %c2_74, %c0_75, %c0_76] : memref<1x10x10x8xbf16, #tpu.memory_space<vmem>>, vector<1x8x8x8xbf16>
    %56 = vector.shape_cast %55 : vector<1x8x8x8xbf16> to vector<64x8xbf16>
    %c6 = arith.constant 6 : index
    %c0_77 = arith.constant 0 : index
    %c0_78 = arith.constant 0 : index
    %57 = vector.load %arg4[%c6, %c0_77, %c0_78] : memref<9x8x8xbf16, #tpu.memory_space<vmem>>, vector<1x8x8xbf16>
    %58 = vector.shape_cast %57 : vector<1x8x8xbf16> to vector<8x8xbf16>
    %cst_79 = arith.constant dense<0.000000e+00> : vector<64x8xf32>
    %59 = tpu.matmul %56, %58, %cst_79 {dimension_numbers = #tpu.dot_dimension_numbers<[1], [0], [0], [1], [0, 0, 1, 1], [], []>} : vector<64x8xbf16>, vector<8x8xbf16>, vector<64x8xf32> -> vector<64x8xf32>
    %60 = arith.addf %54, %59 : vector<64x8xf32>
    %c0_80 = arith.constant 0 : index
    %c2_81 = arith.constant 2 : index
    %c1_82 = arith.constant 1 : index
    %c0_83 = arith.constant 0 : index
    %61 = vector.load %arg9[%c0_80, %c2_81, %c1_82, %c0_83] : memref<1x10x10x8xbf16, #tpu.memory_space<vmem>>, vector<1x8x8x8xbf16>
    %62 = vector.shape_cast %61 : vector<1x8x8x8xbf16> to vector<64x8xbf16>
    %c7 = arith.constant 7 : index
    %c0_84 = arith.constant 0 : index
    %c0_85 = arith.constant 0 : index
    %63 = vector.load %arg4[%c7, %c0_84, %c0_85] : memref<9x8x8xbf16, #tpu.memory_space<vmem>>, vector<1x8x8xbf16>
    %64 = vector.shape_cast %63 : vector<1x8x8xbf16> to vector<8x8xbf16>
    %cst_86 = arith.constant dense<0.000000e+00> : vector<64x8xf32>
    %65 = tpu.matmul %62, %64, %cst_86 {dimension_numbers = #tpu.dot_dimension_numbers<[1], [0], [0], [1], [0, 0, 1, 1], [], []>} : vector<64x8xbf16>, vector<8x8xbf16>, vector<64x8xf32> -> vector<64x8xf32>
    %66 = arith.addf %60, %65 : vector<64x8xf32>
    %c0_87 = arith.constant 0 : index
    %c2_88 = arith.constant 2 : index
    %c2_89 = arith.constant 2 : index
    %c0_90 = arith.constant 0 : index
    %67 = vector.load %arg9[%c0_87, %c2_88, %c2_89, %c0_90] : memref<1x10x10x8xbf16, #tpu.memory_space<vmem>>, vector<1x8x8x8xbf16>
    %68 = vector.shape_cast %67 : vector<1x8x8x8xbf16> to vector<64x8xbf16>
    %c8 = arith.constant 8 : index
    %c0_91 = arith.constant 0 : index
    %c0_92 = arith.constant 0 : index
    %69 = vector.load %arg4[%c8, %c0_91, %c0_92] : memref<9x8x8xbf16, #tpu.memory_space<vmem>>, vector<1x8x8xbf16>
    %70 = vector.shape_cast %69 : vector<1x8x8xbf16> to vector<8x8xbf16>
    %cst_93 = arith.constant dense<0.000000e+00> : vector<64x8xf32>
    %71 = tpu.matmul %68, %70, %cst_93 {dimension_numbers = #tpu.dot_dimension_numbers<[1], [0], [0], [1], [0, 0, 1, 1], [], []>} : vector<64x8xbf16>, vector<8x8xbf16>, vector<64x8xf32> -> vector<64x8xf32>
    %72 = arith.addf %66, %71 : vector<64x8xf32>
    %c0_94 = arith.constant 0 : index
    %c0_95 = arith.constant 0 : index
    %73 = vector.load %arg5[%c0_94, %c0_95] : memref<1x8xf32, #tpu.memory_space<vmem>>, vector<1x8xf32>
    %74 = vector.broadcast %73 : vector<1x8xf32> to vector<64x8xf32>
    %75 = arith.addf %72, %74 : vector<64x8xf32>
    %cst_96 = arith.constant 0.000000e+00 : f32
    %76 = vector.broadcast %cst_96 : f32 to vector<64x8xf32>
    %77 = arith.maximumf %75, %76 : vector<64x8xf32>
    %78 = arith.truncf %77 : vector<64x8xf32> to vector<64x8xbf16>
    %c0_97 = arith.constant 0 : index
    %c0_98 = arith.constant 0 : index
    %79 = vector.load %arg6[%c0_97, %c0_98] : memref<8x32xbf16, #tpu.memory_space<vmem>>, vector<8x32xbf16>
    %cst_99 = arith.constant dense<0.000000e+00> : vector<64x32xf32>
    %80 = tpu.matmul %78, %79, %cst_99 {dimension_numbers = #tpu.dot_dimension_numbers<[1], [0], [0], [1], [0, 0, 1, 1], [], []>} : vector<64x8xbf16>, vector<8x32xbf16>, vector<64x32xf32> -> vector<64x32xf32>
    %c0_100 = arith.constant 0 : index
    %c0_101 = arith.constant 0 : index
    %c0_102 = arith.constant 0 : index
    %c0_103 = arith.constant 0 : index
    %81 = vector.load %arg1[%c0_100, %c0_101, %c0_102, %c0_103] : memref<1x8x8x32xbf16, #tpu.memory_space<vmem>>, vector<1x8x8x32xbf16>
    %82 = arith.extf %81 : vector<1x8x8x32xbf16> to vector<1x8x8x32xf32>
    %83 = vector.shape_cast %82 : vector<1x8x8x32xf32> to vector<64x32xf32>
    %c0_104 = arith.constant 0 : index
    %c0_105 = arith.constant 0 : index
    %84 = vector.load %arg7[%c0_104, %c0_105] : memref<1x32xf32, #tpu.memory_space<vmem>>, vector<1x32xf32>
    %85 = vector.broadcast %84 : vector<1x32xf32> to vector<64x32xf32>
    %86 = arith.addf %80, %85 : vector<64x32xf32>
    %87 = arith.addf %86, %83 : vector<64x32xf32>
    %cst_106 = arith.constant 0.000000e+00 : f32
    %88 = vector.broadcast %cst_106 : f32 to vector<64x32xf32>
    %89 = arith.maximumf %87, %88 : vector<64x32xf32>
    %90 = vector.shape_cast %89 : vector<64x32xf32> to vector<1x8x8x32xf32>
    %91 = arith.truncf %90 : vector<1x8x8x32xf32> to vector<1x8x8x32xbf16>
    %c0_107 = arith.constant 0 : index
    %c0_108 = arith.constant 0 : index
    %c0_109 = arith.constant 0 : index
    %c0_110 = arith.constant 0 : index
    %92 = vector.load %arg8[%c0_107, %c0_108, %c0_109, %c0_110] : memref<1x8x8x32xbf16, #tpu.memory_space<vmem>>, vector<1x8x8x32xbf16>
    tpu.vector_store %arg8[%c0_107, %c0_108, %c0_109, %c0_110], %91 {strides = array<i32>} : memref<1x8x8x32xbf16, #tpu.memory_space<vmem>>, vector<1x8x8x32xbf16>,
    return
  }
  func.func @transform_0(%arg0: i32) -> (i32, i32, i32, i32) {
    %c0_i32 = arith.constant 0 : i32
    %c0_i32_0 = arith.constant 0 : i32
    %c0_i32_1 = arith.constant 0 : i32
    %c0_i32_2 = arith.constant 0 : i32
    return %arg0, %c0_i32, %c0_i32_0, %c0_i32_1 : i32, i32, i32, i32
  }
  func.func @transform_1(%arg0: i32) -> (i32, i32) {
    %c0_i32 = arith.constant 0 : i32
    %c0_i32_0 = arith.constant 0 : i32
    %c0_i32_1 = arith.constant 0 : i32
    return %c0_i32, %c0_i32_0 : i32, i32
  }
  func.func @transform_2(%arg0: i32) -> (i32, i32) {
    %c0_i32 = arith.constant 0 : i32
    %c0_i32_0 = arith.constant 0 : i32
    %c0_i32_1 = arith.constant 0 : i32
    return %c0_i32, %c0_i32_0 : i32, i32
  }
  func.func @transform_3(%arg0: i32) -> (i32, i32, i32) {
    %c0_i32 = arith.constant 0 : i32
    %c0_i32_0 = arith.constant 0 : i32
    %c0_i32_1 = arith.constant 0 : i32
    %c0_i32_2 = arith.constant 0 : i32
    return %c0_i32, %c0_i32_0, %c0_i32_1 : i32, i32, i32
  }
  func.func @transform_4(%arg0: i32) -> (i32, i32) {
    %c0_i32 = arith.constant 0 : i32
    %c0_i32_0 = arith.constant 0 : i32
    %c0_i32_1 = arith.constant 0 : i32
    return %c0_i32, %c0_i32_0 : i32, i32
  }
  func.func @transform_5(%arg0: i32) -> (i32, i32) {
    %c0_i32 = arith.constant 0 : i32
    %c0_i32_0 = arith.constant 0 : i32
    %c0_i32_1 = arith.constant 0 : i32
    return %c0_i32, %c0_i32_0 : i32, i32
  }
  func.func @transform_6(%arg0: i32) -> (i32, i32) {
    %c0_i32 = arith.constant 0 : i32
    %c0_i32_0 = arith.constant 0 : i32
    %c0_i32_1 = arith.constant 0 : i32
    return %c0_i32, %c0_i32_0 : i32, i32
  }
  func.func @transform_7(%arg0: i32) -> (i32, i32, i32, i32) {
    %c0_i32 = arith.constant 0 : i32
    %c0_i32_0 = arith.constant 0 : i32
    %c0_i32_1 = arith.constant 0 : i32
    %c0_i32_2 = arith.constant 0 : i32
    return %arg0, %c0_i32, %c0_i32_0, %c0_i32_1 : i32, i32, i32, i32
  }
}

module attributes {stable_mosaic.version = 11 : i64} {
  func.func @_bottleneck_kernel(%arg0: i32, %arg1: memref<1x8x8x32xbf16, #tpu.memory_space<vmem>>, %arg2: memref<32x8xbf16, #tpu.memory_space<vmem>>, %arg3: memref<1x8xf32, #tpu.memory_space<vmem>>, %arg4: memref<9x8x8xbf16, #tpu.memory_space<vmem>>, %arg5: memref<1x8xf32, #tpu.memory_space<vmem>>, %arg6: memref<8x32xbf16, #tpu.memory_space<vmem>>, %arg7: memref<1x32xf32, #tpu.memory_space<vmem>>, %arg8: memref<1x8x8x32xbf16, #tpu.memory_space<vmem>>, %arg9: memref<1x10x10x8xbf16, #tpu.memory_space<vmem>>) attributes {dimension_semantics = [#tpu.dimension_semantics<parallel>], iteration_bounds = array<i64: 2>, scalar_prefetch = 0 : i64, scratch_operands = 1 : i64, tpu.core_type = #tpu.core_type<tc>, window_params = [{transform_indices = @transform_0, window_bounds = array<i64: 1, 8, 8, 32>}, {pipeline_mode = #tpu.pipeline_mode<synchronous>, transform_indices = @transform_1, window_bounds = array<i64: 32, 8>}, {pipeline_mode = #tpu.pipeline_mode<synchronous>, transform_indices = @transform_2, window_bounds = array<i64: 1, 8>}, {pipeline_mode = #tpu.pipeline_mode<synchronous>, transform_indices = @transform_3, window_bounds = array<i64: 9, 8, 8>}, {pipeline_mode = #tpu.pipeline_mode<synchronous>, transform_indices = @transform_4, window_bounds = array<i64: 1, 8>}, {pipeline_mode = #tpu.pipeline_mode<synchronous>, transform_indices = @transform_5, window_bounds = array<i64: 8, 32>}, {pipeline_mode = #tpu.pipeline_mode<synchronous>, transform_indices = @transform_6, window_bounds = array<i64: 1, 32>}, {transform_indices = @transform_7, window_bounds = array<i64: 1, 8, 8, 32>}]} {
    %c0 = arith.constant 0 : index
    %c0_0 = arith.constant 0 : index
    %c0_1 = arith.constant 0 : index
    %c0_2 = arith.constant 0 : index
    %0 = vector.load %arg1[%c0, %c0_0, %c0_1, %c0_2] : memref<1x8x8x32xbf16, #tpu.memory_space<vmem>>, vector<1x8x8x32xbf16>
    %1 = vector.shape_cast %0 : vector<1x8x8x32xbf16> to vector<64x32xbf16>
    %c0_3 = arith.constant 0 : index
    %c0_4 = arith.constant 0 : index
    %2 = vector.load %arg2[%c0_3, %c0_4] : memref<32x8xbf16, #tpu.memory_space<vmem>>, vector<32x8xbf16>
    %cst = arith.constant dense<0.000000e+00> : vector<64x8xf32>
    %3 = tpu.matmul %1, %2, %cst {dimension_numbers = #tpu.dot_dimension_numbers<[1], [0], [0], [1], [0, 0, 1, 1], [], []>} : vector<64x32xbf16>, vector<32x8xbf16>, vector<64x8xf32> -> vector<64x8xf32>
    %c0_5 = arith.constant 0 : index
    %c0_6 = arith.constant 0 : index
    %4 = vector.load %arg3[%c0_5, %c0_6] : memref<1x8xf32, #tpu.memory_space<vmem>>, vector<1x8xf32>
    %5 = vector.broadcast %4 : vector<1x8xf32> to vector<64x8xf32>
    %6 = arith.addf %3, %5 : vector<64x8xf32>
    %cst_7 = arith.constant 0.000000e+00 : f32
    %7 = vector.broadcast %cst_7 : f32 to vector<64x8xf32>
    %8 = arith.maximumf %6, %7 : vector<64x8xf32>
    %cst_8 = arith.constant 0.000000e+00 : bf16
    %9 = vector.broadcast %cst_8 : bf16 to vector<1x1x10x8xbf16>
    %cst_9 = arith.constant 0.000000e+00 : bf16
    %10 = vector.broadcast %cst_9 : bf16 to vector<1x10x1x8xbf16>
    %c0_10 = arith.constant 0 : index
    %c0_11 = arith.constant 0 : index
    %c0_12 = arith.constant 0 : index
    %c0_13 = arith.constant 0 : index
    %11 = vector.load %arg9[%c0_10, %c0_11, %c0_12, %c0_13] : memref<1x10x10x8xbf16, #tpu.memory_space<vmem>>, vector<1x1x10x8xbf16>
    tpu.vector_store %arg9[%c0_10, %c0_11, %c0_12, %c0_13], %9 {strides = array<i32>} : memref<1x10x10x8xbf16, #tpu.memory_space<vmem>>, vector<1x1x10x8xbf16>,
    %c0_14 = arith.constant 0 : index
    %c9 = arith.constant 9 : index
    %c0_15 = arith.constant 0 : index
    %c0_16 = arith.constant 0 : index
    %12 = vector.load %arg9[%c0_14, %c9, %c0_15, %c0_16] : memref<1x10x10x8xbf16, #tpu.memory_space<vmem>>, vector<1x1x10x8xbf16>
    tpu.vector_store %arg9[%c0_14, %c9, %c0_15, %c0_16], %9 {strides = array<i32>} : memref<1x10x10x8xbf16, #tpu.memory_space<vmem>>, vector<1x1x10x8xbf16>,
    %c0_17 = arith.constant 0 : index
    %c0_18 = arith.constant 0 : index
    %c0_19 = arith.constant 0 : index
    %c0_20 = arith.constant 0 : index
    %13 = vector.load %arg9[%c0_17, %c0_18, %c0_19, %c0_20] : memref<1x10x10x8xbf16, #tpu.memory_space<vmem>>, vector<1x10x1x8xbf16>
    tpu.vector_store %arg9[%c0_17, %c0_18, %c0_19, %c0_20], %10 {strides = array<i32>} : memref<1x10x10x8xbf16, #tpu.memory_space<vmem>>, vector<1x10x1x8xbf16>,
    %c0_21 = arith.constant 0 : index
    %c0_22 = arith.constant 0 : index
    %c9_23 = arith.constant 9 : index
    %c0_24 = arith.constant 0 : index
    %14 = vector.load %arg9[%c0_21, %c0_22, %c9_23, %c0_24] : memref<1x10x10x8xbf16, #tpu.memory_space<vmem>>, vector<1x10x1x8xbf16>
    tpu.vector_store %arg9[%c0_21, %c0_22, %c9_23, %c0_24], %10 {strides = array<i32>} : memref<1x10x10x8xbf16, #tpu.memory_space<vmem>>, vector<1x10x1x8xbf16>,
    %15 = arith.truncf %8 : vector<64x8xf32> to vector<64x8xbf16>
    %16 = vector.shape_cast %15 : vector<64x8xbf16> to vector<1x8x8x8xbf16>
    %c0_25 = arith.constant 0 : index
    %c1 = arith.constant 1 : index
    %c1_26 = arith.constant 1 : index
    %c0_27 = arith.constant 0 : index
    %17 = vector.load %arg9[%c0_25, %c1, %c1_26, %c0_27] : memref<1x10x10x8xbf16, #tpu.memory_space<vmem>>, vector<1x8x8x8xbf16>
    tpu.vector_store %arg9[%c0_25, %c1, %c1_26, %c0_27], %16 {strides = array<i32>} : memref<1x10x10x8xbf16, #tpu.memory_space<vmem>>, vector<1x8x8x8xbf16>,
    %cst_28 = arith.constant 0.000000e+00 : f32
    %18 = vector.broadcast %cst_28 : f32 to vector<64x8xf32>
    %c0_29 = arith.constant 0 : index
    %c0_30 = arith.constant 0 : index
    %c0_31 = arith.constant 0 : index
    %c0_32 = arith.constant 0 : index
    %19 = vector.load %arg9[%c0_29, %c0_30, %c0_31, %c0_32] : memref<1x10x10x8xbf16, #tpu.memory_space<vmem>>, vector<1x8x8x8xbf16>
    %20 = vector.shape_cast %19 : vector<1x8x8x8xbf16> to vector<64x8xbf16>
    %c0_33 = arith.constant 0 : index
    %c0_34 = arith.constant 0 : index
    %c0_35 = arith.constant 0 : index
    %21 = vector.load %arg4[%c0_33, %c0_34, %c0_35] : memref<9x8x8xbf16, #tpu.memory_space<vmem>>, vector<1x8x8xbf16>
    %22 = vector.shape_cast %21 : vector<1x8x8xbf16> to vector<8x8xbf16>
    %cst_36 = arith.constant dense<0.000000e+00> : vector<64x8xf32>
    %23 = tpu.matmul %20, %22, %cst_36 {dimension_numbers = #tpu.dot_dimension_numbers<[1], [0], [0], [1], [0, 0, 1, 1], [], []>} : vector<64x8xbf16>, vector<8x8xbf16>, vector<64x8xf32> -> vector<64x8xf32>
    %24 = arith.addf %18, %23 : vector<64x8xf32>
    %c0_37 = arith.constant 0 : index
    %c0_38 = arith.constant 0 : index
    %c1_39 = arith.constant 1 : index
    %c0_40 = arith.constant 0 : index
    %25 = vector.load %arg9[%c0_37, %c0_38, %c1_39, %c0_40] : memref<1x10x10x8xbf16, #tpu.memory_space<vmem>>, vector<1x8x8x8xbf16>
    %26 = vector.shape_cast %25 : vector<1x8x8x8xbf16> to vector<64x8xbf16>
    %c1_41 = arith.constant 1 : index
    %c0_42 = arith.constant 0 : index
    %c0_43 = arith.constant 0 : index
    %27 = vector.load %arg4[%c1_41, %c0_42, %c0_43] : memref<9x8x8xbf16, #tpu.memory_space<vmem>>, vector<1x8x8xbf16>
    %28 = vector.shape_cast %27 : vector<1x8x8xbf16> to vector<8x8xbf16>
    %cst_44 = arith.constant dense<0.000000e+00> : vector<64x8xf32>
    %29 = tpu.matmul %26, %28, %cst_44 {dimension_numbers = #tpu.dot_dimension_numbers<[1], [0], [0], [1], [0, 0, 1, 1], [], []>} : vector<64x8xbf16>, vector<8x8xbf16>, vector<64x8xf32> -> vector<64x8xf32>
    %30 = arith.addf %24, %29 : vector<64x8xf32>
    %c0_45 = arith.constant 0 : index
    %c0_46 = arith.constant 0 : index
    %c2 = arith.constant 2 : index
    %c0_47 = arith.constant 0 : index
    %31 = vector.load %arg9[%c0_45, %c0_46, %c2, %c0_47] : memref<1x10x10x8xbf16, #tpu.memory_space<vmem>>, vector<1x8x8x8xbf16>
    %32 = vector.shape_cast %31 : vector<1x8x8x8xbf16> to vector<64x8xbf16>
    %c2_48 = arith.constant 2 : index
    %c0_49 = arith.constant 0 : index
    %c0_50 = arith.constant 0 : index
    %33 = vector.load %arg4[%c2_48, %c0_49, %c0_50] : memref<9x8x8xbf16, #tpu.memory_space<vmem>>, vector<1x8x8xbf16>
    %34 = vector.shape_cast %33 : vector<1x8x8xbf16> to vector<8x8xbf16>
    %cst_51 = arith.constant dense<0.000000e+00> : vector<64x8xf32>
    %35 = tpu.matmul %32, %34, %cst_51 {dimension_numbers = #tpu.dot_dimension_numbers<[1], [0], [0], [1], [0, 0, 1, 1], [], []>} : vector<64x8xbf16>, vector<8x8xbf16>, vector<64x8xf32> -> vector<64x8xf32>
    %36 = arith.addf %30, %35 : vector<64x8xf32>
    %c0_52 = arith.constant 0 : index
    %c1_53 = arith.constant 1 : index
    %c0_54 = arith.constant 0 : index
    %c0_55 = arith.constant 0 : index
    %37 = vector.load %arg9[%c0_52, %c1_53, %c0_54, %c0_55] : memref<1x10x10x8xbf16, #tpu.memory_space<vmem>>, vector<1x8x8x8xbf16>
    %38 = vector.shape_cast %37 : vector<1x8x8x8xbf16> to vector<64x8xbf16>
    %c3 = arith.constant 3 : index
    %c0_56 = arith.constant 0 : index
    %c0_57 = arith.constant 0 : index
    %39 = vector.load %arg4[%c3, %c0_56, %c0_57] : memref<9x8x8xbf16, #tpu.memory_space<vmem>>, vector<1x8x8xbf16>
    %40 = vector.shape_cast %39 : vector<1x8x8xbf16> to vector<8x8xbf16>
    %cst_58 = arith.constant dense<0.000000e+00> : vector<64x8xf32>
    %41 = tpu.matmul %38, %40, %cst_58 {dimension_numbers = #tpu.dot_dimension_numbers<[1], [0], [0], [1], [0, 0, 1, 1], [], []>} : vector<64x8xbf16>, vector<8x8xbf16>, vector<64x8xf32> -> vector<64x8xf32>
    %42 = arith.addf %36, %41 : vector<64x8xf32>
    %c0_59 = arith.constant 0 : index
    %c1_60 = arith.constant 1 : index
    %c1_61 = arith.constant 1 : index
    %c0_62 = arith.constant 0 : index
    %43 = vector.load %arg9[%c0_59, %c1_60, %c1_61, %c0_62] : memref<1x10x10x8xbf16, #tpu.memory_space<vmem>>, vector<1x8x8x8xbf16>
    %44 = vector.shape_cast %43 : vector<1x8x8x8xbf16> to vector<64x8xbf16>
    %c4 = arith.constant 4 : index
    %c0_63 = arith.constant 0 : index
    %c0_64 = arith.constant 0 : index
    %45 = vector.load %arg4[%c4, %c0_63, %c0_64] : memref<9x8x8xbf16, #tpu.memory_space<vmem>>, vector<1x8x8xbf16>
    %46 = vector.shape_cast %45 : vector<1x8x8xbf16> to vector<8x8xbf16>
    %cst_65 = arith.constant dense<0.000000e+00> : vector<64x8xf32>
    %47 = tpu.matmul %44, %46, %cst_65 {dimension_numbers = #tpu.dot_dimension_numbers<[1], [0], [0], [1], [0, 0, 1, 1], [], []>} : vector<64x8xbf16>, vector<8x8xbf16>, vector<64x8xf32> -> vector<64x8xf32>
    %48 = arith.addf %42, %47 : vector<64x8xf32>
    %c0_66 = arith.constant 0 : index
    %c1_67 = arith.constant 1 : index
    %c2_68 = arith.constant 2 : index
    %c0_69 = arith.constant 0 : index
    %49 = vector.load %arg9[%c0_66, %c1_67, %c2_68, %c0_69] : memref<1x10x10x8xbf16, #tpu.memory_space<vmem>>, vector<1x8x8x8xbf16>
    %50 = vector.shape_cast %49 : vector<1x8x8x8xbf16> to vector<64x8xbf16>
    %c5 = arith.constant 5 : index
    %c0_70 = arith.constant 0 : index
    %c0_71 = arith.constant 0 : index
    %51 = vector.load %arg4[%c5, %c0_70, %c0_71] : memref<9x8x8xbf16, #tpu.memory_space<vmem>>, vector<1x8x8xbf16>
    %52 = vector.shape_cast %51 : vector<1x8x8xbf16> to vector<8x8xbf16>
    %cst_72 = arith.constant dense<0.000000e+00> : vector<64x8xf32>
    %53 = tpu.matmul %50, %52, %cst_72 {dimension_numbers = #tpu.dot_dimension_numbers<[1], [0], [0], [1], [0, 0, 1, 1], [], []>} : vector<64x8xbf16>, vector<8x8xbf16>, vector<64x8xf32> -> vector<64x8xf32>
    %54 = arith.addf %48, %53 : vector<64x8xf32>
    %c0_73 = arith.constant 0 : index
    %c2_74 = arith.constant 2 : index
    %c0_75 = arith.constant 0 : index
    %c0_76 = arith.constant 0 : index
    %55 = vector.load %arg9[%c0_73, %c2_74, %c0_75, %c0_76] : memref<1x10x10x8xbf16, #tpu.memory_space<vmem>>, vector<1x8x8x8xbf16>
    %56 = vector.shape_cast %55 : vector<1x8x8x8xbf16> to vector<64x8xbf16>
    %c6 = arith.constant 6 : index
    %c0_77 = arith.constant 0 : index
    %c0_78 = arith.constant 0 : index
    %57 = vector.load %arg4[%c6, %c0_77, %c0_78] : memref<9x8x8xbf16, #tpu.memory_space<vmem>>, vector<1x8x8xbf16>
    %58 = vector.shape_cast %57 : vector<1x8x8xbf16> to vector<8x8xbf16>
    %cst_79 = arith.constant dense<0.000000e+00> : vector<64x8xf32>
    %59 = tpu.matmul %56, %58, %cst_79 {dimension_numbers = #tpu.dot_dimension_numbers<[1], [0], [0], [1], [0, 0, 1, 1], [], []>} : vector<64x8xbf16>, vector<8x8xbf16>, vector<64x8xf32> -> vector<64x8xf32>
    %60 = arith.addf %54, %59 : vector<64x8xf32>
    %c0_80 = arith.constant 0 : index
    %c2_81 = arith.constant 2 : index
    %c1_82 = arith.constant 1 : index
    %c0_83 = arith.constant 0 : index
    %61 = vector.load %arg9[%c0_80, %c2_81, %c1_82, %c0_83] : memref<1x10x10x8xbf16, #tpu.memory_space<vmem>>, vector<1x8x8x8xbf16>
    %62 = vector.shape_cast %61 : vector<1x8x8x8xbf16> to vector<64x8xbf16>
    %c7 = arith.constant 7 : index
    %c0_84 = arith.constant 0 : index
    %c0_85 = arith.constant 0 : index
    %63 = vector.load %arg4[%c7, %c0_84, %c0_85] : memref<9x8x8xbf16, #tpu.memory_space<vmem>>, vector<1x8x8xbf16>
    %64 = vector.shape_cast %63 : vector<1x8x8xbf16> to vector<8x8xbf16>
    %cst_86 = arith.constant dense<0.000000e+00> : vector<64x8xf32>
    %65 = tpu.matmul %62, %64, %cst_86 {dimension_numbers = #tpu.dot_dimension_numbers<[1], [0], [0], [1], [0, 0, 1, 1], [], []>} : vector<64x8xbf16>, vector<8x8xbf16>, vector<64x8xf32> -> vector<64x8xf32>
    %66 = arith.addf %60, %65 : vector<64x8xf32>
    %c0_87 = arith.constant 0 : index
    %c2_88 = arith.constant 2 : index
    %c2_89 = arith.constant 2 : index
    %c0_90 = arith.constant 0 : index
    %67 = vector.load %arg9[%c0_87, %c2_88, %c2_89, %c0_90] : memref<1x10x10x8xbf16, #tpu.memory_space<vmem>>, vector<1x8x8x8xbf16>
    %68 = vector.shape_cast %67 : vector<1x8x8x8xbf16> to vector<64x8xbf16>
    %c8 = arith.constant 8 : index
    %c0_91 = arith.constant 0 : index
    %c0_92 = arith.constant 0 : index
    %69 = vector.load %arg4[%c8, %c0_91, %c0_92] : memref<9x8x8xbf16, #tpu.memory_space<vmem>>, vector<1x8x8xbf16>
    %70 = vector.shape_cast %69 : vector<1x8x8xbf16> to vector<8x8xbf16>
    %cst_93 = arith.constant dense<0.000000e+00> : vector<64x8xf32>
    %71 = tpu.matmul %68, %70, %cst_93 {dimension_numbers = #tpu.dot_dimension_numbers<[1], [0], [0], [1], [0, 0, 1, 1], [], []>} : vector<64x8xbf16>, vector<8x8xbf16>, vector<64x8xf32> -> vector<64x8xf32>
    %72 = arith.addf %66, %71 : vector<64x8xf32>
    %c0_94 = arith.constant 0 : index
    %c0_95 = arith.constant 0 : index
    %73 = vector.load %arg5[%c0_94, %c0_95] : memref<1x8xf32, #tpu.memory_space<vmem>>, vector<1x8xf32>
    %74 = vector.broadcast %73 : vector<1x8xf32> to vector<64x8xf32>
    %75 = arith.addf %72, %74 : vector<64x8xf32>
    %cst_96 = arith.constant 0.000000e+00 : f32
    %76 = vector.broadcast %cst_96 : f32 to vector<64x8xf32>
    %77 = arith.maximumf %75, %76 : vector<64x8xf32>
    %78 = arith.truncf %77 : vector<64x8xf32> to vector<64x8xbf16>
    %c0_97 = arith.constant 0 : index
    %c0_98 = arith.constant 0 : index
    %79 = vector.load %arg6[%c0_97, %c0_98] : memref<8x32xbf16, #tpu.memory_space<vmem>>, vector<8x32xbf16>
    %cst_99 = arith.constant dense<0.000000e+00> : vector<64x32xf32>
    %80 = tpu.matmul %78, %79, %cst_99 {dimension_numbers = #tpu.dot_dimension_numbers<[1], [0], [0], [1], [0, 0, 1, 1], [], []>} : vector<64x8xbf16>, vector<8x32xbf16>, vector<64x32xf32> -> vector<64x32xf32>
    %c0_100 = arith.constant 0 : index
    %c0_101 = arith.constant 0 : index
    %c0_102 = arith.constant 0 : index
    %c0_103 = arith.constant 0 : index
    %81 = vector.load %arg1[%c0_100, %c0_101, %c0_102, %c0_103] : memref<1x8x8x32xbf16, #tpu.memory_space<vmem>>, vector<1x8x8x32xbf16>
    %82 = arith.extf %81 : vector<1x8x8x32xbf16> to vector<1x8x8x32xf32>
    %83 = vector.shape_cast %82 : vector<1x8x8x32xf32> to vector<64x32xf32>
    %c0_104 = arith.constant 0 : index
    %c0_105 = arith.constant 0 : index
    %84 = vector.load %arg7[%c0_104, %c0_105] : memref<1x32xf32, #tpu.memory_space<vmem>>, vector<1x32xf32>
    %85 = vector.broadcast %84 : vector<1x32xf32> to vector<64x32xf32>
    %86 = arith.addf %80, %85 : vector<64x32xf32>
    %87 = arith.addf %86, %83 : vector<64x32xf32>
    %cst_106 = arith.constant 0.000000e+00 : f32
    %88 = vector.broadcast %cst_106 : f32 to vector<64x32xf32>
    %89 = arith.maximumf %87, %88 : vector<64x32xf32>
    %90 = vector.shape_cast %89 : vector<64x32xf32> to vector<1x8x8x32xf32>
    %91 = arith.truncf %90 : vector<1x8x8x32xf32> to vector<1x8x8x32xbf16>
    %c0_107 = arith.constant 0 : index
    %c0_108 = arith.constant 0 : index
    %c0_109 = arith.constant 0 : index
    %c0_110 = arith.constant 0 : index
    %92 = vector.load %arg8[%c0_107, %c0_108, %c0_109, %c0_110] : memref<1x8x8x32xbf16, #tpu.memory_space<vmem>>, vector<1x8x8x32xbf16>
    tpu.vector_store %arg8[%c0_107, %c0_108, %c0_109, %c0_110], %91 {strides = array<i32>} : memref<1x8x8x32xbf16, #tpu.memory_space<vmem>>, vector<1x8x8x32xbf16>,
    return
  }
  func.func @transform_0(%arg0: i32) -> (i32, i32, i32, i32) {
    %c0_i32 = arith.constant 0 : i32
    %c0_i32_0 = arith.constant 0 : i32
    %c0_i32_1 = arith.constant 0 : i32
    %c0_i32_2 = arith.constant 0 : i32
    return %arg0, %c0_i32, %c0_i32_0, %c0_i32_1 : i32, i32, i32, i32
  }
  func.func @transform_1(%arg0: i32) -> (i32, i32) {
    %c0_i32 = arith.constant 0 : i32
    %c0_i32_0 = arith.constant 0 : i32
    %c0_i32_1 = arith.constant 0 : i32
    return %c0_i32, %c0_i32_0 : i32, i32
  }
  func.func @transform_2(%arg0: i32) -> (i32, i32) {
    %c0_i32 = arith.constant 0 : i32
    %c0_i32_0 = arith.constant 0 : i32
    %c0_i32_1 = arith.constant 0 : i32
    return %c0_i32, %c0_i32_0 : i32, i32
  }
  func.func @transform_3(%arg0: i32) -> (i32, i32, i32) {
    %c0_i32 = arith.constant 0 : i32
    %c0_i32_0 = arith.constant 0 : i32
    %c0_i32_1 = arith.constant 0 : i32
    %c0_i32_2 = arith.constant 0 : i32
    return %c0_i32, %c0_i32_0, %c0_i32_1 : i32, i32, i32
  }
  func.func @transform_4(%arg0: i32) -> (i32, i32) {
    %c0_i32 = arith.constant 0 : i32
    %c0_i32_0 = arith.constant 0 : i32
    %c0_i32_1 = arith.constant 0 : i32
    return %c0_i32, %c0_i32_0 : i32, i32
  }
  func.func @transform_5(%arg0: i32) -> (i32, i32) {
    %c0_i32 = arith.constant 0 : i32
    %c0_i32_0 = arith.constant 0 : i32
    %c0_i32_1 = arith.constant 0 : i32
    return %c0_i32, %c0_i32_0 : i32, i32
  }
  func.func @transform_6(%arg0: i32) -> (i32, i32) {
    %c0_i32 = arith.constant 0 : i32
    %c0_i32_0 = arith.constant 0 : i32
    %c0_i32_1 = arith.constant 0 : i32
    return %c0_i32, %c0_i32_0 : i32, i32
  }
  func.func @transform_7(%arg0: i32) -> (i32, i32, i32, i32) {
    %c0_i32 = arith.constant 0 : i32
    %c0_i32_0 = arith.constant 0 : i32
    %c0_i32_1 = arith.constant 0 : i32
    %c0_i32_2 = arith.constant 0 : i32
    return %arg0, %c0_i32, %c0_i32_0, %c0_i32_1 : i32, i32, i32, i32
  }
}

</mosaic_0001>

<bundles_post_ra>
// kernel: tpu_custom_call.1
= control target key start
LH: loop header
LB: loop body
LE: loop exit
PB: predicated region body
PF: predicated region fallthrough
CT: control target
= control target key end

     0   :  { %12 = vsyncpa [#allocation4], 0  ;;  %s3584_s0 = inlined_call_operand.vmem [shape: bf16[2,8,8,32], index: 0, kind: input, shape index: {}]   ;;  %s3585_s1 = inlined_call_operand.vmem [shape: bf16[32,8], index: 1, kind: input, shape index: {}]   ;;  %s3586_s2 = inlined_call_operand.vmem [shape: f32[1,8], index: 2, kind: input, shape index: {}]   ;;  %s3587_s3 = inlined_call_operand.vmem [shape: bf16[9,8,8], index: 3, kind: input, shape index: {}]   ;;  %s3588_s4 = inlined_call_operand.vmem [shape: f32[1,8], index: 4, kind: input, shape index: {}]   ;;  %s3589_s5 = inlined_call_operand.vmem [shape: bf16[8,32], index: 5, kind: input, shape index: {}]   ;;  %s3590_s6 = inlined_call_operand.vmem [shape: f32[1,32], index: 6, kind: input, shape index: {}]   ;;  %s3591_s7 = inlined_call_operand.hbm [shape: bf16[2,8,8,32], index: 7, kind: output, shape index: {}]  }
   0x1   :  { %14 = vsyncpa [#allocation4 + $0x1], 0  ;;  %s2901_s24 = smov 0   ;;  %s2903_s25 = smov 0  }
   0x2   :  { %s2905_s26 = smov 0   ;;  %s2907_s27 = smov 0  }
   0x3 LB: > { %s2922_s28 = sadd.s32 4294967295, %s2855_s27   ;;  %s2384_s29 = sadd.s32 4294967294, %s2855_s27   ;;  %s2855_s27 = sphi %s2907_s27, %s3607_s27   ;;  %s2851_s26 = sphi %s2905_s26, %s3606_s26   ;;  %s2847_s25 = sphi %s2903_s25, %s3605_s25   ;;  %s2843_s24 = sphi %s2901_s24, %s3604_s24  }
   0x4   : > { %s2926_s30 = sadd.s32 1, %s2855_s27   ;;  %s179_s8 = sadd.s32 1, %s2851_s26 }
   0x5   : > { %s176_s9 = ssub.s32 %s2855_s27, %s2926_s30  ;;  %p189_p0 = scmp.ne.s32.totalorder %s2851_s26, %s2847_s25 }
   0x6   : > { %p177_p1 = scmp.eq.s32.totalorder %s176_s9, 0  ;;  %p190_p2 = scmp.eq.s32.totalorder %s2922_s28, 1 }
   0x7   : > { %p195_p3 = scmp.ne.s32.totalorder %s2847_s25, %s2843_s24  ;;  %p196_p4 = scmp.eq.s32.totalorder %s2384_s29, 1 }
   0x8   : > { %s2937_s10 = scalar_select %p177_p1, %s2851_s26, %s179_s8  }
   0x9   : > { %p2939_p5 = por %p190_p2, %p189_p0  ;;  %p2943_p6 = por %p196_p4, %p195_p3 }
   0xa   : > { %p2387_p7 = scmp.ge.s32.totalorder %s2855_s27, 1  ;;  %p240_p8 = scmp.lt.s32.totalorder %s2855_s27, 3 }
   0xc   : > { %p241_p9 = pnand %p2387_p7, %p240_p8 }
   0xd   : > { %p272_p10 = scmp.lt.s32.totalorder (!%p241_p9), %s2922_s28, 1  ;;  %s269_s22 = sand.u32 (!%p241_p9), 1, %s2847_s25  }
   0xe   : > { %244 = sbr.rel (%p241_p9) target bundleno = 767 (0x2ff), region = 48  ;;  %s2388_s23 = sshll.u32 (!%p241_p9), %s269_s22, 5 }
   0xf   : > { %s3515_s29 = scalar_lea.vmem (!%p241_p9), [#allocation3], %s2388_s23  ;;  %s2858_s16 = smov (!%p241_p9), [#allocation3]  }
  0x10   : > { %s2322_s8 = sshll.u32 (!%p241_p9), %s3515_s29, 4  ;;  %s3536_s8 = int_to_ptr.vmem [resolvable:$true] %s2322_s8 }
  0x11   : > { %s2795_s15 = scalar_lea.vmem (!%p241_p9), %s3536_s8, 512 }
  0x12   : > { %p2796_p11 = scmp.ne.s32.totalorder (!%p241_p9), %s3536_s8, %s2795_s15 }
  0x13   : > { %v2777_v0 = vld [vmem:[%s3585_s1 + $0x8] sm:$0xff]   ;;  %v2778_v1 = vld [vmem:[%s3585_s1] sm:$0xff]   ;;  %s273_s17 = scalar_select %p272_p10, %s2922_s28, 1  ;;  %vm329_vm0 = vcmask 261120   ;;  %vm417_vm1 = vcmask 57344   ;;  %vm415_vm4 = vcmask 60416  }
  0x14   : > { %2610 = vmatprep.subr.bf16.mxu0 %v2777_v0  ;;  %vm423_vm2 = vsmask.f32 256  ;;  %vm455_vm3 = vsmask.f32 7938  ;;  %v434_v7 = vld [vmem:[#allocation2 + $0x18] sm:$0x1]  ;;  %p2797_p12 = pnand %p2796_p11, %p2939_p5 }
  0x15   : > { %2611 = vmatpush3.bf16.msra.mxu0 %v2777_v0  ;;  %s2525_s18 = sshll.u32 %s273_s17, 5  ;;  %vm2966_vm5 = vmand %vm417_vm1, %vm423_vm2  ;;  %v466_v8 = vld [vmem:[#allocation2 + $0x1c] sm:$0x1]  ;;  %v2857_v9 = vmov 0   ;;  %v428_v13 = vld [vmem:[#allocation2 + $0x8] sm:$0x1] }
  0x16   : > { %2612 = vmatprep.subr.bf16.mxu0 %v2778_v1  ;;  %s2960_s21 = scalar_lea.vmem %s3584_s0, %s2525_s18  ;;  %416 = vst.msk [vmem:[#allocation2] sm:$0xf] %vm415_vm4, %v2857_v9  ;;  %420 = vst.msk [vmem:[#allocation2 + $0x48] sm:$0xf] %vm415_vm4, %v2857_v9  ;;  %v435_v10 = vsel %vm2966_vm5, 0, %v434_v7  ;;  %v429_v15 = vsel %vm2966_vm5, 0, %v428_v13  ;;  %p2798_p13 = pneg %p2797_p12 }
  0x17   : > { %v2779_v2 = vld [vmem:[%s2960_s21] sm:$0xff]   ;;  %v2780_v3 = vld [vmem:[%s2960_s21 + $0x8] sm:$0xff]   ;;  %v2781_v4 = vld [vmem:[%s2960_s21 + $0x10] sm:$0xff]   ;;  %418 = vst.msk [vmem:[#allocation2 + $0x4] sm:$0x1] %vm417_vm1, %v2857_v9  ;;  %vm801_vm8 = vcmask 1043456  }
  0x18   : > { %2614 = vmatprep.mubr.msk.bf16.mxu0 %vm329_vm0, %v2779_v2  ;;  %v2782_v5 = vld [vmem:[%s2960_s21 + $0x18] sm:$0xff]   ;;  %421 = vst.msk [vmem:[#allocation2 + $0x4c] sm:$0x1] %vm417_vm1, %v2857_v9  ;;  %vm2975_vm6 = vmand %vm417_vm1, %vm455_vm3  ;;  %v460_v14 = vld [vmem:[#allocation2 + $0xc] sm:$0x1]  ;;  %vm994_vm11 = vcmask 1042432  }
  0x19   : > { %2613 = vmatpush3.bf16.msra.mxu0 %v2778_v1  ;;  %436 = vst [vmem:[#allocation2 + $0x18] sm:$0x1] %v435_v10  ;;  %v467_v12 = vsel %vm2975_vm6, 0, %v466_v8  ;;  %v461_v16 = vsel %vm2975_vm6, 0, %v460_v14  ;;  %430 = vst [vmem:[#allocation2 + $0x8] sm:$0x1] %v429_v15 }
  0x1a   : > { %468 = vst [vmem:[#allocation2 + $0x1c] sm:$0x1] %v467_v12  ;;  %462 = vst [vmem:[#allocation2 + $0xc] sm:$0x1] %v461_v16  ;;  %v437_v17 = vld [vmem:[#allocation2 + $0x20] sm:$0x1] }
  0x1b   : > { %v469_v18 = vld [vmem:[#allocation2 + $0x24] sm:$0x1]  ;;  %v438_v19 = vsel %vm2966_vm5, 0, %v437_v17  ;;  %v431_v21 = vld [vmem:[#allocation2 + $0x10] sm:$0x1]  ;;  %vm2997_vm7 = vmand %vm415_vm4, %vm455_vm3  ;;  %vm995_vm12 = vcmask 1046532  }
  0x1c   : > { %2615 = vmatmul.mubr.msk.bf16.vlgmr.msra.gmra.mxu0 %vm329_vm0, %v2780_v3  ;;  %v470_v20 = vsel %vm2975_vm6, 0, %v469_v18  ;;  %439 = vst [vmem:[#allocation2 + $0x20] sm:$0x1] %v438_v19  ;;  %v463_v22 = vld [vmem:[#allocation2 + $0x14] sm:$0x1]  ;;  %v432_v31 = vsel %vm2966_vm5, 0, %v431_v21  ;;  %vm3070_vm14 = vmor %vm994_vm11, %vm995_vm12 }
  0x1d   : > { %2618 = vmatprep.mubr.msk.bf16.mxu0 %vm329_vm0, %v2781_v4  ;;  %471 = vst [vmem:[#allocation2 + $0x24] sm:$0x1] %v470_v20  ;;  %v425_v23 = vld [vmem:[#allocation2] sm:$0x1]  ;;  %v452_v24 = vld [vmem:[#allocation2 + $0x48] sm:$0x1] }
  0x1e   : > { %v457_v25 = vld [vmem:[#allocation2 + $0x4] sm:$0x1]  ;;  %v426_v26 = vsel %vm2966_vm5, 0, %v425_v23  ;;  %v453_v27 = vsel %vm2966_vm5, 0, %v452_v24  ;;  %433 = vst [vmem:[#allocation2 + $0x10] sm:$0x1] %v432_v31 }
  0x1f   : > { %v458_v28 = vsel %vm2975_vm6, 0, %v457_v25  ;;  %v484_v29 = vld [vmem:[#allocation2 + $0x4c] sm:$0x1]  ;;  %427 = vst [vmem:[#allocation2] sm:$0x1] %v426_v26  ;;  %v464_v33 = vsel %vm2975_vm6, 0, %v463_v22 }
  0x20   : > { %454 = vst [vmem:[#allocation2 + $0x48] sm:$0x1] %v453_v27  ;;  %459 = vst [vmem:[#allocation2 + $0x4] sm:$0x1] %v458_v28  ;;  %v485_v32 = vsel %vm2975_vm6, 0, %v484_v29  ;;  %vm788_vm15 = vcmask 64512  }
  0x21   : > { %486 = vst [vmem:[#allocation2 + $0x4c] sm:$0x1] %v485_v32  ;;  %465 = vst [vmem:[#allocation2 + $0x14] sm:$0x1] %v464_v33  ;;  %v446_v34 = vld [vmem:[#allocation2 + $0x38] sm:$0x1] }
  0x22   : > { %v447_v35 = vsel %vm2966_vm5, 0, %v446_v34  ;;  %v478_v36 = vld [vmem:[#allocation2 + $0x3c] sm:$0x1]  ;;  %v440_v37 = vld [vmem:[#allocation2 + $0x28] sm:$0x1]  ;;  %s2799_s17 = sshll.u32 %s2858_s16, 4  ;;  %s2800_s17 = int_to_ptr.vmem [resolvable:$false] %s2799_s17 }
  0x23   : > { %448 = vst [vmem:[#allocation2 + $0x38] sm:$0x1] %v447_v35  ;;  %v479_v38 = vsel %vm2975_vm6, 0, %v478_v36  ;;  %v441_v39 = vsel %vm2966_vm5, 0, %v440_v37  ;;  %v472_v40 = vld [vmem:[#allocation2 + $0x2c] sm:$0x1]  ;;  %p2802_p0 = scmp.lt.s32.totalorder %s3536_s8, %s2800_s17 }
  0x24   : > { %2619 = vmatmul.mubr.msk.bf16.gmra.mxu0 %vm329_vm0, %v2782_v5  ;;  %480 = vst [vmem:[#allocation2 + $0x3c] sm:$0x1] %v479_v38  ;;  %442 = vst [vmem:[#allocation2 + $0x28] sm:$0x1] %v441_v39  ;;  %v473_v41 = vsel %vm2975_vm6, 0, %v472_v40  ;;  %vm2299_vm0 = vcmask 257024  }
  0x25   : > { %v449_v42 = vld [vmem:[#allocation2 + $0x40] sm:$0x1]  ;;  %474 = vst [vmem:[#allocation2 + $0x2c] sm:$0x1] %v473_v41  ;;  %v481_v44 = vld [vmem:[#allocation2 + $0x44] sm:$0x1] }
  0x26   : > { %v450_v43 = vsel %vm2966_vm5, 0, %v449_v42  ;;  %v482_v45 = vsel %vm2975_vm6, 0, %v481_v44  ;;  %v443_v46 = vld [vmem:[#allocation2 + $0x30] sm:$0x1]  ;;  %v475_v47 = vld [vmem:[#allocation2 + $0x34] sm:$0x1] }
  0x27   : > { %451 = vst [vmem:[#allocation2 + $0x40] sm:$0x1] %v450_v43  ;;  %483 = vst [vmem:[#allocation2 + $0x44] sm:$0x1] %v482_v45  ;;  %v444_v48 = vsel %vm2966_vm5, 0, %v443_v46  ;;  %v476_v49 = vsel %vm2975_vm6, 0, %v475_v47 }
  0x28   : > { %445 = vst [vmem:[#allocation2 + $0x30] sm:$0x1] %v444_v48  ;;  %477 = vst [vmem:[#allocation2 + $0x34] sm:$0x1] %v476_v49  ;;  %v2410_v50 = vld [vmem:[%s3587_s3 + $0x4] sm:$0xf] }
  0x29   : > { %2724 = vmatprep.subr.msk.bf16.mxu0 %vm801_vm8, %v2410_v50  ;;  %v803_v51 = vsel %vm801_vm8, %v2410_v50, 0  ;;  %2725 = vmatprep.subr.msk.bf16.mxu1 %vm801_vm8, %v2410_v50  ;;  %v3032_v52 = vld [vmem:[%s3587_s3 + $0x8] sm:$0xf]  ;;  %v3037_v53 = vld [vmem:[%s3587_s3] sm:$0xf]  ;;  %s2801_s18 = scalar_lea.vmem %s2800_s17, 1024 }
  0x2a   : > { %2623 = vmatpush3.bf16.msra.mxu0 %v803_v51  ;;  %2723 = vmatpush3.bf16.msra.mxu1 %v803_v51  ;;  %v3043_v54 = vld [vmem:[#allocation2] sm:$0xf]  ;;  %v651_v60 = vld [vmem:[#allocation2 + $0x4] sm:$0x1]  ;;  %vm659_vm9 = vsmask.f32 3328  ;;  %p2803_p1 = scmp.lt.s32.totalorder %s2801_s18, %s2795_s15 }
  0x2b   : > { %2727 = vmatprep.subr.msk.bf16.mxu0 %vm801_vm8, %v3032_v52  ;;  %2726 = vmatprep.subr.msk.bf16.mxu1 %vm801_vm8, %v3037_v53  ;;  %v663_v55 = vshrl.u32 %v3043_v54, 16  ;;  %v666_v56 = vshll.u32 %v3043_v54, 16  ;;  %v3050_v59 = vld [vmem:[%s3586_s2] ss:$0 sm:$0xff]  ;;  %v672_v63 = vshll.u32 %v651_v60, 16  ;;  %v999_v14 = vrot.slane %v651_v60, 5 }
  0x2c   : > { %v970_v4 = vld [vmem:[#allocation2] sm:$0xe]  ;;  %vm660_vm10 = vsmask.f32 7440  ;;  %v606_v27 = vld [vmem:[#allocation2 + $0x18] sm:$0xf]  ;;  %p2804_p2 = por %p2803_p1, %p2802_p0 }
  0x2d   : > { %v665_v57 = vrot.slane %v663_v55, 4  ;;  %v668_v58 = vrot.slane %v666_v56, 5  ;;  %v3056_v8 = vrot.slane %v672_v63, 5  ;;  %v2427_v13 = vrot.slane %v970_v4, 9  ;;  %vm3060_vm13 = vmor %vm659_vm9, %vm660_vm10  ;;  %v609_v28 = vld [vmem:[#allocation2 + $0x1c] sm:$0x1] }
  0x2e   : > { %v594_v39 = vld [vmem:[#allocation2 + $0x8] sm:$0xf]  ;;  %v597_v40 = vld [vmem:[#allocation2 + $0xc] sm:$0x1]  ;;  %p2805_p3 = pnand %p2804_p2, %p2798_p13 }
  0x2f   : > { %v669_v62 = vor.u32 %v668_v58, %v665_v57  ;;  %v3077_v34 = vsel %vm3070_vm14, %v2427_v13, %v999_v14  ;;  %v3092_v13 = vsel %vm801_vm8, %v3032_v52, 0 }
  0x31   : > { %v3054_v7 = vrot.slane %v669_v62, 4  ;;  %v615_v62 = vld [vmem:[#allocation2 + $0x24] sm:$0x1] }
  0x33   : > { %v675_v21 = vsel %vm3060_vm13, %v3054_v7, %v3056_v8 }
  0xdc   : > { %v2616_v61 = vpop.f32.mrf.mxu0 }
  0xdd   : > { %v385_v0 = vadd.f32 %v2616_v61, %v3050_v59  ;;  %v612_v61 = vld [vmem:[#allocation2 + $0x20] sm:$0xf] }
  0xde   : > { %v376_v1 = vpop.f32.mrf.mxu0 }
  0xdf   : > { %v409_v2 = vmax.f32 %v385_v0, 0.0  ;;  %v377_v3 = vadd.f32 %v3050_v59, %v376_v1 }
  0xe0   : > { %v2617_v5 = vpop.f32.mrf.mxu0 }
  0xe1   : > { %v2528_v9 = vpack.c.bf16 %v409_v2, %v409_v2  ;;  %v407_v10 = vmax.f32 %v377_v3, 0.0  ;;  %v388_v11 = vadd.f32 %v2617_v5, %v3050_v59  ;;  %v600_v5 = vld [vmem:[#allocation2 + $0x10] sm:$0xf] }
  0xe2   : > { %v379_v12 = vpop.f32.mrf.mxu0 }
  0xe3   : > { %v528_v15 = vshrl.u32 %v2528_v9, 16  ;;  %v2526_v16 = vpack.c.bf16 %v407_v10, %v407_v10  ;;  %v410_v17 = vmax.f32 %v388_v11, 0.0  ;;  %v380_v19 = vadd.f32 %v3050_v59, %v379_v12 }
  0xe4   : > { %v2620_v20 = vpop.f32.mrf.mxu0  ;;  %v531_v23 = vshll.u32 %v2528_v9, 16  ;;  %v603_v9 = vld [vmem:[#allocation2 + $0x14] sm:$0x1] }
  0xe5   : > { %v530_v22 = vrot.slane %v528_v15, 7  ;;  %v512_v24 = vshrl.u32 %v2526_v16, 16  ;;  %v2529_v25 = vpack.c.bf16 %v410_v17, %v410_v17  ;;  %v515_v29 = vshll.u32 %v2526_v16, 16 }
  0xe6   : > { %v408_v31 = vmax.f32 %v380_v19, 0.0  ;;  %v401_v32 = vadd.f32 %v2620_v20, %v3050_v59  ;;  %v392_v33 = vpop.f32.mrf.mxu0 }
  0xe7   : > { %v533_v35 = vor.u32 %v531_v23, %v530_v22  ;;  %v534_v36 = vrot.slane %v530_v22, 4  ;;  %v514_v37 = vrot.slane %v512_v24, 7  ;;  %v536_v38 = vshrl.u32 %v2529_v25, 16  ;;  %v630_v22 = vld [vmem:[#allocation2 + $0x38] sm:$0xf] }
  0xe8   : > { %v539_v41 = vshll.u32 %v2529_v25, 16  ;;  %v2527_v42 = vpack.c.bf16 %v408_v31, %v408_v31  ;;  %v413_v43 = vmax.f32 %v401_v32, 0.0  ;;  %v393_v44 = vadd.f32 %v3050_v59, %v392_v33  ;;  %v2621_v45 = vpop.f32.mrf.mxu0  ;;  %v633_v25 = vld [vmem:[#allocation2 + $0x3c] sm:$0x1] }
  0xe9   : > { %v607_v46 = vsel %vm2997_vm7, %v533_v35, %v606_v27  ;;  %v610_v47 = vsel %vm2966_vm5, %v534_v36, %v609_v28  ;;  %v517_v48 = vor.u32 %v515_v29, %v514_v37  ;;  %v518_v49 = vrot.slane %v514_v37, 4  ;;  %v618_v28 = vld [vmem:[#allocation2 + $0x28] sm:$0xf]  ;;  %v621_v37 = vld [vmem:[#allocation2 + $0x2c] sm:$0x1] }
  0xea   : > { %608 = vst [vmem:[#allocation2 + $0x18] sm:$0xf] %v607_v46  ;;  %611 = vst [vmem:[#allocation2 + $0x1c] sm:$0x1] %v610_v47  ;;  %v538_v50 = vrot.slane %v536_v38, 7  ;;  %v520_v51 = vshrl.u32 %v2527_v42, 16  ;;  %v2532_v56 = vpack.c.bf16 %v413_v43, %v413_v43  ;;  %v395_v57 = vpop.f32.mrf.mxu0  ;;  %v404_v0 = vadd.f32 %v2621_v45, %v3050_v59 }
  0xeb   : > { %v523_v55 = vshll.u32 %v2527_v42, 16  ;;  %v595_v58 = vsel %vm2997_vm7, %v517_v48, %v594_v39  ;;  %v598_v60 = vsel %vm2966_vm5, %v518_v49, %v597_v40  ;;  %v411_v63 = vmax.f32 %v393_v44, 0.0  ;;  %v636_v49 = vld [vmem:[#allocation2 + $0x40] sm:$0xf] }
  0xec   : > { %596 = vst [vmem:[#allocation2 + $0x8] sm:$0xf] %v595_v58  ;;  %599 = vst [vmem:[#allocation2 + $0xc] sm:$0x1] %v598_v60  ;;  %v541_v1 = vor.u32 %v539_v41, %v538_v50  ;;  %v542_v2 = vrot.slane %v538_v50, 4  ;;  %v522_v3 = vrot.slane %v520_v51, 7  ;;  %v396_v12 = vadd.f32 %v3050_v59, %v395_v57 }
  0xed   : > { %v560_v4 = vshrl.u32 %v2532_v56, 16  ;;  %v2530_v10 = vpack.c.bf16 %v411_v63, %v411_v63  ;;  %v414_v11 = vmax.f32 %v404_v0, 0.0  ;;  %v563_v20 = vshll.u32 %v2532_v56, 16  ;;  %v639_v58 = vld [vmem:[#allocation2 + $0x44] sm:$0x1] }
  0xee   : > { %v613_v14 = vsel %vm2997_vm7, %v541_v1, %v612_v61  ;;  %v616_v15 = vsel %vm2966_vm5, %v542_v2, %v615_v62  ;;  %v525_v16 = vor.u32 %v523_v55, %v522_v3  ;;  %v526_v17 = vrot.slane %v522_v3, 4  ;;  %v624_v60 = vld [vmem:[#allocation2 + $0x30] sm:$0xf]  ;;  %v627_v2 = vld [vmem:[#allocation2 + $0x34] sm:$0x1] }
  0xef   : > { %614 = vst [vmem:[#allocation2 + $0x20] sm:$0xf] %v613_v14  ;;  %617 = vst [vmem:[#allocation2 + $0x24] sm:$0x1] %v616_v15  ;;  %v562_v19 = vrot.slane %v560_v4, 7  ;;  %v544_v23 = vshrl.u32 %v2530_v10, 16  ;;  %v2533_v24 = vpack.c.bf16 %v414_v11, %v414_v11 }
  0xf0   : > { %v601_v59 = vsel %vm2997_vm7, %v525_v16, %v600_v5  ;;  %v604_v52 = vsel %vm2966_vm5, %v526_v17, %v603_v9  ;;  %v547_v27 = vshll.u32 %v2530_v10, 16  ;;  %v412_v29 = vmax.f32 %v396_v12, 0.0  ;;  %v3130_v12 = vld [vmem:[%s3587_s3 + $0x10] sm:$0xf] }
  0xf1   : > { %602 = vst [vmem:[#allocation2 + $0x10] sm:$0xf] %v601_v59  ;;  %605 = vst [vmem:[#allocation2 + $0x14] sm:$0x1] %v604_v52  ;;  %v565_v31 = vor.u32 %v563_v20, %v562_v19  ;;  %v566_v32 = vrot.slane %v562_v19, 4  ;;  %v546_v33 = vrot.slane %v544_v23, 7 }
  0xf2   : > { %v568_v35 = vshrl.u32 %v2533_v24, 16  ;;  %v3102_v36 = vld [vmem:[#allocation2 + $0x18] sm:$0xf]  ;;  %v571_v38 = vshll.u32 %v2533_v24, 16  ;;  %v2531_v39 = vpack.c.bf16 %v412_v29, %v412_v29  ;;  %v3121_v5 = vld [vmem:[#allocation2 + $0x1c] sm:$0x1] }
  0xf3   : > { %v705_v40 = vshrl.u32 %v3102_v36, 16  ;;  %v708_v41 = vshll.u32 %v3102_v36, 16  ;;  %v631_v42 = vsel %vm2997_vm7, %v565_v31, %v630_v22  ;;  %v634_v43 = vsel %vm2966_vm5, %v566_v32, %v633_v25  ;;  %v3110_v46 = vld [vmem:[#allocation2 + $0x8] sm:$0xf]  ;;  %v3112_v47 = vld [vmem:[#allocation2 + $0xc] sm:$0x1] }
  0xf4   : > { %v549_v44 = vor.u32 %v547_v27, %v546_v33  ;;  %v550_v45 = vrot.slane %v546_v33, 4  ;;  %632 = vst [vmem:[#allocation2 + $0x38] sm:$0xf] %v631_v42  ;;  %635 = vst [vmem:[#allocation2 + $0x3c] sm:$0x1] %v634_v43  ;;  %v570_v48 = vrot.slane %v568_v35, 7 }
  0xf5   : > { %v552_v50 = vshrl.u32 %v2531_v39, 16  ;;  %v555_v51 = vshll.u32 %v2531_v39, 16  ;;  %v677_v55 = vshrl.u32 %v3110_v46, 16  ;;  %v680_v61 = vshll.u32 %v3110_v46, 16  ;;  %v971_v59 = vld [vmem:[#allocation2 + $0x8] sm:$0xe] }
  0xf6   : > { %v619_v56 = vsel %vm2997_vm7, %v549_v44, %v618_v28  ;;  %v622_v57 = vsel %vm2966_vm5, %v550_v45, %v621_v37  ;;  %v686_v62 = vshll.u32 %v3112_v47, 16  ;;  %v573_v63 = vor.u32 %v571_v38, %v570_v48  ;;  %v3147_v29 = vld [vmem:[#allocation2 + $0x20] sm:$0xf]  ;;  %v3150_v37 = vld [vmem:[#allocation2 + $0x24] sm:$0x1] }
  0xf7   : > { %620 = vst [vmem:[#allocation2 + $0x28] sm:$0xf] %v619_v56  ;;  %623 = vst [vmem:[#allocation2 + $0x2c] sm:$0x1] %v622_v57  ;;  %v574_v0 = vrot.slane %v570_v48, 4  ;;  %v554_v1 = vrot.slane %v552_v50, 7 }
  0xf8   : > { %v679_v3 = vrot.slane %v677_v55, 4  ;;  %v682_v4 = vrot.slane %v680_v61, 5  ;;  %v707_v9 = vrot.slane %v705_v40, 4  ;;  %v710_v10 = vrot.slane %v708_v41, 5  ;;  %v3136_v19 = vld [vmem:[#allocation2 + $0x10] sm:$0xf] }
  0xf9   : > { %v3125_v11 = vsel %vm801_vm8, %v3037_v53, 0  ;;  %v637_v14 = vsel %vm2997_vm7, %v573_v63, %v636_v49  ;;  %v640_v15 = vsel %vm2966_vm5, %v574_v0, %v639_v58  ;;  %v557_v16 = vor.u32 %v555_v51, %v554_v1  ;;  %v3138_v20 = vld [vmem:[#allocation2 + $0x14] sm:$0x1] }
  0xfa   : > { %v558_v17 = vrot.slane %v554_v1, 4  ;;  %638 = vst [vmem:[#allocation2 + $0x40] sm:$0xf] %v637_v14  ;;  %641 = vst [vmem:[#allocation2 + $0x44] sm:$0x1] %v640_v15  ;;  %v683_v53 = vor.u32 %v682_v4, %v679_v3  ;;  %v688_v22 = vrot.slane %v686_v62, 5  ;;  %v711_v27 = vor.u32 %v710_v10, %v707_v9 }
  0xfb   : > { %v691_v23 = vshrl.u32 %v3136_v19, 16  ;;  %v694_v24 = vshll.u32 %v3136_v19, 16  ;;  %v625_v52 = vsel %vm2997_vm7, %v557_v16, %v624_v60  ;;  %v714_v28 = vshll.u32 %v3121_v5, 16  ;;  %v3179_v60 = vld [vmem:[#allocation2 + $0x38] sm:$0xf] }
  0xfc   : > { %v628_v25 = vsel %vm2966_vm5, %v558_v17, %v627_v2  ;;  %626 = vst [vmem:[#allocation2 + $0x30] sm:$0xf] %v625_v52  ;;  %v684_v31 = vrot.slane %v683_v53, 4  ;;  %v700_v35 = vshll.u32 %v3138_v20, 16  ;;  %v712_v38 = vrot.slane %v711_v27, 4 }
  0xfd   : > { %629 = vst [vmem:[#allocation2 + $0x34] sm:$0x1] %v628_v25  ;;  %v693_v32 = vrot.slane %v691_v23, 4  ;;  %v696_v33 = vrot.slane %v694_v24, 5  ;;  %v2428_v30 = vrot.slane %v971_v59, 9  ;;  %v1003_v39 = vrot.slane %v3112_v47, 5 }
  0xfe   : > { %v3155_v6 = vsel %vm801_vm8, %v3130_v12, 0  ;;  %v689_v40 = vsel %vm3060_vm13, %v684_v31, %v688_v22  ;;  %v3159_v42 = vld [vmem:[#allocation2 + $0x28] sm:$0xf]  ;;  %v719_v43 = vshrl.u32 %v3147_v29, 16  ;;  %v722_v44 = vshll.u32 %v3147_v29, 16 }
  0xff   : > { %v697_v41 = vor.u32 %v696_v33, %v693_v32  ;;  %v2411_v45 = vcombine.low %v675_v21, %v689_v40  ;;  %v716_v47 = vrot.slane %v714_v28, 5  ;;  %v1004_v48 = vsel %vm3070_vm14, %v2428_v30, %v1003_v39  ;;  %v3170_v49 = vld [vmem:[#allocation2 + $0x2c] sm:$0x1]  ;;  %v3184_v1 = vld [vmem:[#allocation2 + $0x3c] sm:$0x1] }
 0x100   : > { %v728_v50 = vshll.u32 %v3150_v37, 16  ;;  %v702_v55 = vrot.slane %v700_v35, 5  ;;  %v721_v56 = vrot.slane %v719_v43, 4  ;;  %v724_v57 = vrot.slane %v722_v44, 5  ;;  %v973_v10 = vld [vmem:[#allocation2 + $0x18] sm:$0xe] }
 0x101   : > { %v698_v51 = vrot.slane %v697_v41, 4  ;;  %2624 = vmatprep.mubr.msk.bf16.mxu0 %vm788_vm15, %v2411_v45  ;;  %v717_v58 = vsel %vm3060_vm13, %v712_v38, %v716_v47  ;;  %v2436_v7 = vcombine.low %v3077_v34, %v1004_v48  ;;  %v733_v8 = vshrl.u32 %v3159_v42, 16  ;;  %v972_v52 = vld [vmem:[#allocation2 + $0x10] sm:$0xe]  ;;  %v974_v32 = vld [vmem:[#allocation2 + $0x20] sm:$0xe] }
 0x102   : > { %v736_v21 = vshll.u32 %v3159_v42, 16  ;;  %v725_v62 = vor.u32 %v724_v57, %v721_v56  ;;  %v730_v63 = vrot.slane %v728_v50, 5  ;;  %v742_v0 = vshll.u32 %v3170_v49, 16  ;;  %v975_v30 = vld [vmem:[#allocation2 + $0x28] sm:$0xe] }
 0x103   : > { %v703_v61 = vsel %vm3060_vm13, %v698_v51, %v702_v55  ;;  %v735_v3 = vrot.slane %v733_v8, 4  ;;  %v1015_v34 = vrot.slane %v3150_v37, 5  ;;  %v3187_v9 = vld [vmem:[#allocation2 + $0x30] sm:$0xf]  ;;  %v761_v53 = vshrl.u32 %v3179_v60, 16 }
 0x104   : > { %v2412_v2 = vcombine.low %v703_v61, %v717_v58  ;;  %v738_v4 = vrot.slane %v736_v21, 5  ;;  %v726_v14 = vrot.slane %v725_v62, 4  ;;  %v3189_v15 = vld [vmem:[#allocation2 + $0x34] sm:$0x1]  ;;  %v747_v16 = vshrl.u32 %v3187_v9, 16 }
 0x105   : > { %v750_v17 = vshll.u32 %v3187_v9, 16  ;;  %v1019_v23 = vrot.slane %v3170_v49, 5  ;;  %v756_v24 = vshll.u32 %v3189_v15, 16  ;;  %v764_v59 = vshll.u32 %v3179_v60, 16  ;;  %v976_v48 = vld [vmem:[#allocation2 + $0x30] sm:$0xe] }
 0x106   : > { %2625 = vmatmul.mubr.msk.bf16.vlgmr.msra.gmra.mxu0 %vm788_vm15, %v2412_v2  ;;  %v739_v22 = vor.u32 %v738_v4, %v735_v3  ;;  %v744_v25 = vrot.slane %v742_v0, 5  ;;  %v749_v27 = vrot.slane %v747_v16, 4  ;;  %v763_v31 = vrot.slane %v761_v53, 4  ;;  %v1249_v8 = vld [vmem:[#allocation2 + $0x8] sm:$0xf] }
 0x107   : > { %2644 = vmatprep.mubr.msk.bf16.mxu0 %vm788_vm15, %v2436_v7  ;;  %2643 = vmatpush3.bf16.msra.mxu0 %v3092_v13  ;;  %v752_v28 = vrot.slane %v750_v17, 5  ;;  %v731_v33 = vsel %vm3060_vm13, %v726_v14, %v730_v63  ;;  %v766_v37 = vrot.slane %v764_v59, 5  ;;  %v770_v38 = vshll.u32 %v3184_v1, 16  ;;  %v3226_v4 = vld [vmem:[#allocation2 + $0xc] sm:$0x1] }
 0x108   : > { %v740_v35 = vrot.slane %v739_v22, 4  ;;  %2729 = vmatprep.subr.msk.bf16.mxu0 %vm801_vm8, %v3130_v12  ;;  %v2429_v40 = vrot.slane %v972_v52, 9  ;;  %v1007_v41 = vrot.slane %v3138_v20, 5  ;;  %v2430_v13 = vrot.slane %v973_v10, 9  ;;  %v2444_v12 = vld [vmem:[%s3587_s3 + $0xc] sm:$0xf] }
 0x109   : > { %v753_v39 = vor.u32 %v752_v28, %v749_v27  ;;  %v758_v44 = vrot.slane %v756_v24, 5  ;;  %v767_v45 = vor.u32 %v766_v37, %v763_v31  ;;  %v1011_v47 = vrot.slane %v3121_v5, 5  ;;  %v977_v20 = vld [vmem:[#allocation2 + $0x38] sm:$0xe]  ;;  %v1251_v10 = vld [vmem:[#allocation2 + $0x10] sm:$0xf] }
 0x10a   : > { %v745_v43 = vsel %vm3060_vm13, %v740_v35, %v744_v25  ;;  %v1008_v51 = vsel %vm3070_vm14, %v2429_v40, %v1007_v41  ;;  %v2431_v55 = vrot.slane %v974_v32, 9  ;;  %v772_v57 = vrot.slane %v770_v38, 5  ;;  %v3231_v14 = vld [vmem:[%s3587_s3 + $0x18] sm:$0xf]  ;;  %v3236_v22 = vld [vmem:[#allocation2 + $0x14] sm:$0x1] }
 0x10b   : > { %v2413_v49 = vcombine.low %v731_v33, %v745_v43  ;;  %v754_v50 = vrot.slane %v753_v39, 4  ;;  %v768_v56 = vrot.slane %v767_v45, 4  ;;  %v1012_v58 = vsel %vm3070_vm14, %v2430_v13, %v1011_v47  ;;  %v3243_v25 = vld [vmem:[#allocation2 + $0x1c] sm:$0x1]  ;;  %v1255_v27 = vld [vmem:[#allocation2 + $0x20] sm:$0xf] }
 0x10c   : > { %v2432_v7 = vrot.slane %v975_v30, 9  ;;  %v2437_v21 = vcombine.low %v1008_v51, %v1012_v58  ;;  %v1016_v61 = vsel %vm3070_vm14, %v2431_v55, %v1015_v34  ;;  %v2433_v62 = vrot.slane %v976_v48, 9  ;;  %v3258_v38 = vld [vmem:[#allocation2 + $0x24] sm:$0x1] }
 0x10d   : > { %2628 = vmatprep.mubr.msk.bf16.mxu1 %vm788_vm15, %v2413_v49  ;;  %v759_v5 = vsel %vm3060_vm13, %v754_v50, %v758_v44  ;;  %v773_v63 = vsel %vm3060_vm13, %v768_v56, %v772_v57  ;;  %v1023_v2 = vrot.slane %v3189_v15, 5  ;;  %v2434_v3 = vrot.slane %v977_v20, 9  ;;  %v1253_v15 = vld [vmem:[#allocation2 + $0x18] sm:$0xf]  ;;  %v1259_v49 = vld [vmem:[#allocation2 + $0x30] sm:$0xf] }
 0x10e   : > { %v1020_v0 = vsel %vm3070_vm14, %v2432_v7, %v1019_v23  ;;  %v2414_v16 = vcombine.low %v759_v5, %v773_v63  ;;  %2645 = vmatmul.mubr.msk.bf16.vlgmr.msra.gmra.mxu0 %vm788_vm15, %v2437_v21  ;;  %v1027_v17 = vrot.slane %v3184_v1, 5  ;;  %v1174_v53 = vsel %vm801_vm8, %v2444_v12, 0  ;;  %v2470_v50 = vld [vmem:[%s3587_s3 + $0x14] sm:$0xf]  ;;  %v3268_v56 = vld [vmem:[#allocation2 + $0x2c] sm:$0x1] }
 0x10f   : > { %v2438_v34 = vcombine.low %v1016_v61, %v1020_v0  ;;  %v2419_v23 = vcombine.low %v3043_v54, %v3110_v46  ;;  %v1024_v24 = vsel %vm3070_vm14, %v2433_v62, %v1023_v2  ;;  %v1266_v59 = vshrl.u32 %v1249_v8, 16  ;;  %2663 = vmatpush3.bf16.msra.mxu0 %v3155_v6  ;;  %v1261_v57 = vld [vmem:[#allocation2 + $0x38] sm:$0xf] }
 0x110   : > { %v1269_v52 = vshll.u32 %v1249_v8, 16  ;;  %2629 = vmatmul.mubr.msk.bf16.vlgmr.msra.gmra.mxu1 %vm788_vm15, %v2414_v16  ;;  %v2420_v1 = vcombine.low %v3136_v19, %v3102_v36  ;;  %v1275_v28 = vshll.u32 %v3226_v4, 16  ;;  %v1280_v54 = vshrl.u32 %v1251_v10, 16  ;;  %2731 = vmatprep.subr.msk.bf16.mxu0 %vm801_vm8, %v3231_v14 }
 0x111   : > { %2648 = vmatprep.mubr.msk.bf16.mxu0 %vm788_vm15, %v2438_v34  ;;  %v1283_v46 = vshll.u32 %v1251_v10, 16  ;;  %2633 = vmatpush3.bf16.msra.mxu1 %v3125_v11  ;;  %v1028_v6 = vsel %vm3070_vm14, %v2434_v3, %v1027_v17  ;;  %v1268_v31 = vrot.slane %v1266_v59, 4  ;;  %v1289_v33 = vshll.u32 %v3236_v22, 16  ;;  %v1257_v11 = vld [vmem:[#allocation2 + $0x28] sm:$0xf] }
 0x112   : > { %2634 = vmatprep.mubr.msk.bf16.mxu1 %vm788_vm15, %v2419_v23  ;;  %v1271_v32 = vrot.slane %v1269_v52, 5  ;;  %2728 = vmatprep.subr.msk.bf16.mxu1 %vm801_vm8, %v2444_v12  ;;  %v2439_v35 = vcombine.low %v1024_v24, %v1028_v6  ;;  %v2421_v36 = vcombine.low %v3147_v29, %v3159_v42  ;;  %v1282_v19 = vrot.slane %v1280_v54, 4  ;;  %v3276_v3 = vld [vmem:[#allocation2 + $0x34] sm:$0x1]  ;;  %v3279_v24 = vld [vmem:[#allocation2 + $0x3c] sm:$0x1] }
 0x113   : > { %v1285_v37 = vrot.slane %v1283_v46, 5  ;;  %v1294_v39 = vshrl.u32 %v1253_v15, 16  ;;  %v1297_v40 = vshll.u32 %v1253_v15, 16  ;;  %v1303_v41 = vshll.u32 %v3243_v25, 16 }
 0x114   : > { %v1272_v30 = vor.u32 %v1271_v32, %v1268_v31  ;;  %v1277_v13 = vrot.slane %v1275_v28, 5  ;;  %v1308_v44 = vshrl.u32 %v1255_v27, 16  ;;  %v1311_v45 = vshll.u32 %v1255_v27, 16  ;;  %v1263_v27 = vld [vmem:[#allocation2 + $0x40] sm:$0xf] }
 0x115   : > { %v1286_v43 = vor.u32 %v1285_v37, %v1282_v19  ;;  %v1291_v48 = vrot.slane %v1289_v33, 5  ;;  %v1296_v29 = vrot.slane %v1294_v39, 4  ;;  %v1299_v42 = vrot.slane %v1297_v40, 5  ;;  %v1770_v19 = vld [vmem:[#allocation2 + $0x48] sm:$0xf] }
 0x116   : > { %v1273_v47 = vrot.slane %v1272_v30, 4  ;;  %2649 = vmatmul.mubr.msk.bf16.gmra.mxu0 %vm788_vm15, %v2439_v35  ;;  %v1310_v55 = vrot.slane %v1308_v44, 4  ;;  %v1313_v12 = vrot.slane %v1311_v45, 5  ;;  %v1317_v20 = vshll.u32 %v3258_v38, 16  ;;  %v3295_v30 = vld [vmem:[#allocation2 + $0x44] sm:$0x1] }
 0x117   : > { %v1287_v51 = vrot.slane %v1286_v43, 4  ;;  %v1300_v58 = vor.u32 %v1299_v42, %v1296_v29  ;;  %v1305_v7 = vrot.slane %v1303_v41, 5  ;;  %v1322_v8 = vshrl.u32 %v1257_v11, 16 }
 0x118   : > { %v1325_v5 = vshll.u32 %v1257_v11, 16  ;;  %2635 = vmatmul.mubr.msk.bf16.vlgmr.msra.gmra.mxu1 %vm788_vm15, %v2420_v1  ;;  %v1278_v21 = vsel %vm3060_vm13, %v1273_v47, %v1277_v13  ;;  %v1314_v62 = vor.u32 %v1313_v12, %v1310_v55  ;;  %v1336_v63 = vshrl.u32 %v1259_v49, 16  ;;  %v1480_v12 = vld [vmem:[#allocation2 + $0x10] sm:$0xe] }
 0x119   : > { %v1292_v61 = vsel %vm3060_vm13, %v1287_v51, %v1291_v48  ;;  %2653 = vmatpush3.bf16.msra.mxu1 %v1174_v53  ;;  %2638 = vmatprep.mubr.msk.bf16.mxu1 %vm788_vm15, %v2421_v36  ;;  %v1301_v2 = vrot.slane %v1300_v58, 4  ;;  %v1324_v10 = vrot.slane %v1322_v8, 4  ;;  %v1319_v17 = vrot.slane %v1317_v20, 5  ;;  %v2505_v36 = vld [vmem:[%s3587_s3 + $0x20] sm:$0xf] }
 0x11a   : > { %v2454_v0 = vcombine.low %v1278_v21, %v1292_v61  ;;  %v1327_v16 = vrot.slane %v1325_v5, 5  ;;  %v1315_v34 = vrot.slane %v1314_v62, 4  ;;  %v1338_v15 = vrot.slane %v1336_v63, 4  ;;  %2730 = vmatprep.subr.msk.bf16.mxu1 %vm801_vm8, %v2470_v50  ;;  %v3309_v51 = vld [vmem:[#allocation2 + $0x48] sm:$0xe] }
 0x11b   : > { %v1339_v23 = vshll.u32 %v1259_v49, 16  ;;  %v1306_v53 = vsel %vm3060_vm13, %v1301_v2, %v1305_v7  ;;  %v1331_v52 = vshll.u32 %v3268_v56, 16  ;;  %v1350_v1 = vshrl.u32 %v1261_v57, 16  ;;  %v3307_v49 = vld [vmem:[#allocation2 + $0x4c] sm:$0x1] }
 0x11c   : > { %2664 = vmatprep.mubr.msk.bf16.mxu0 %vm788_vm15, %v2454_v0  ;;  %v1328_v59 = vor.u32 %v1327_v16, %v1324_v10  ;;  %v1320_v28 = vsel %vm3060_vm13, %v1315_v34, %v1319_v17  ;;  %v1345_v46 = vshll.u32 %v3276_v3, 16  ;;  %v1353_v6 = vshll.u32 %v1261_v57, 16  ;;  %v1479_v61 = vld [vmem:[#allocation2 + $0x8] sm:$0xe]  ;;  %v1481_v17 = vld [vmem:[#allocation2 + $0x18] sm:$0xe] }
 0x11d   : > { %v1341_v54 = vrot.slane %v1339_v23, 5  ;;  %v2422_v31 = vcombine.low %v3187_v9, %v3179_v60  ;;  %v2455_v32 = vcombine.low %v1306_v53, %v1320_v28  ;;  %v1352_v33 = vrot.slane %v1350_v1, 4  ;;  %v2488_v60 = vld [vmem:[%s3587_s3 + $0x1c] sm:$0xf]  ;;  %v2787_v9 = vld [vmem:[#allocation2 + $0x8] ss:$8 sps:$4 sm:$0xff]  }
 0x11e   : > { %v1681_v35 = vsel %vm801_vm8, %v3231_v14, 0  ;;  %v1329_v37 = vrot.slane %v1328_v59, 4  ;;  %v1355_v39 = vrot.slane %v1353_v6, 5  ;;  %v1364_v40 = vshrl.u32 %v1263_v27, 16  ;;  %v2789_v23 = vld [vmem:[#allocation2 + $0x28] ss:$8 sps:$4 sm:$0xff]  }
 0x11f   : > { %v1342_v11 = vor.u32 %v1341_v54, %v1338_v15  ;;  %2665 = vmatmul.mubr.msk.bf16.vlgmr.msra.gmra.mxu0 %vm788_vm15, %v2455_v32  ;;  %v1333_v41 = vrot.slane %v1331_v52, 5  ;;  %v1359_v14 = vshll.u32 %v3279_v24, 16  ;;  %v1367_v13 = vshll.u32 %v1263_v27, 16  ;;  %v2788_v15 = vld [vmem:[#allocation2 + $0x18] ss:$8 sps:$4 sm:$0xff]  }
 0x120   : > { %v1562_v43 = vsel %vm801_vm8, %v2470_v50, 0  ;;  %2639 = vmatmul.mubr.msk.bf16.gmra.mxu1 %vm788_vm15, %v2422_v31  ;;  %v1347_v45 = vrot.slane %v1345_v46, 5  ;;  %v1356_v47 = vor.u32 %v1355_v39, %v1352_v33  ;;  %v1366_v48 = vrot.slane %v1364_v40, 4  ;;  %2683 = vmatpush3.bf16.msra.mxu0 %v1681_v35  ;;  %v1482_v54 = vld [vmem:[#allocation2 + $0x20] sm:$0xe] }
 0x121   : > { %v1343_v44 = vrot.slane %v1342_v11, 4  ;;  %2654 = vmatprep.mubr.msk.bf16.mxu1 %vm788_vm15, %v2787_v9  ;;  %v1369_v29 = vrot.slane %v1367_v13, 5  ;;  %v1373_v42 = vshll.u32 %v3295_v30, 16  ;;  %2733 = vmatprep.subr.msk.bf16.mxu0 %vm801_vm8, %v2505_v36  ;;  %v1334_v50 = vsel %vm3060_vm13, %v1329_v37, %v1333_v41  ;;  %v1484_v46 = vld [vmem:[#allocation2 + $0x30] sm:$0xe] }
 0x122   : > { %v1871_v20 = vshrl.u32 %v1770_v19, 16  ;;  %v1874_v57 = vshll.u32 %v1770_v19, 16  ;;  %v1357_v7 = vrot.slane %v1356_v47, 4  ;;  %v3316_v5 = vsel %vm801_vm8, %v2488_v60, 0  ;;  %v2790_v6 = vld [vmem:[#allocation2 + $0x10] ss:$8 sps:$4 sm:$0xff]  }
 0x123   : > { %v1348_v55 = vsel %vm3060_vm13, %v1343_v44, %v1347_v45  ;;  %v1370_v8 = vor.u32 %v1369_v29, %v1366_v48  ;;  %v1361_v21 = vrot.slane %v1359_v14, 5  ;;  %v3319_v62 = vsel %vm801_vm8, %v2505_v36, 0  ;;  %v1483_v33 = vld [vmem:[#allocation2 + $0x28] sm:$0xe]  ;;  %v3339_v36 = vld [vmem:[#allocation2 + $0x14] sm:$0x1] }
 0x124   : > { %v2456_v58 = vcombine.low %v1334_v50, %v1348_v55  ;;  %v2504_v63 = vrot.slane %v3309_v51, 9  ;;  %v2040_v0 = vrot.slane %v3307_v49, 5  ;;  %v1375_v10 = vrot.slane %v1373_v42, 5  ;;  %v1986_v19 = vld [vmem:[#allocation2 + $0x10] sm:$0xe] }
 0x125   : > { %v1371_v2 = vrot.slane %v1370_v8, 4  ;;  %v2463_v16 = vrot.slane %v1480_v12, 9  ;;  %v1509_v34 = vrot.slane %v3236_v22, 5  ;;  %v3325_v53 = vrot.slane %v1871_v20, 4  ;;  %v3345_v40 = vld [vmem:[#allocation2 + $0x1c] sm:$0x1] }
 0x126   : > { %2668 = vmatprep.mubr.msk.bf16.mxu0 %vm788_vm15, %v2456_v58  ;;  %v3327_v59 = vrot.slane %v1874_v57, 5  ;;  %v1362_v52 = vsel %vm3060_vm13, %v1357_v7, %v1361_v21  ;;  %v2462_v1 = vrot.slane %v1479_v61, 9  ;;  %v1505_v28 = vrot.slane %v3226_v4, 5  ;;  %v1756_v4 = vld [vmem:[#allocation2 + $0x10] sm:$0xf] }
 0x127   : > { %v1376_v27 = vsel %vm3060_vm13, %v1371_v2, %v1375_v10  ;;  %v2464_v31 = vrot.slane %v1481_v17, 9  ;;  %v1513_v32 = vrot.slane %v3243_v25, 5  ;;  %v1510_v35 = vsel %vm3070_vm14, %v2463_v16, %v1509_v34  ;;  %v1486_v9 = vld [vmem:[#allocation2 + $0x40] sm:$0xe]  ;;  %v1758_v44 = vld [vmem:[#allocation2 + $0x18] sm:$0xf] }
 0x128   : > { %2655 = vmatmul.mubr.msk.bf16.vlgmr.msra.gmra.mxu1 %vm788_vm15, %v2788_v15  ;;  %v2457_v22 = vcombine.low %v1362_v52, %v1376_v27  ;;  %v2465_v37 = vrot.slane %v1482_v54, 9  ;;  %v1517_v11 = vrot.slane %v3258_v38, 5  ;;  %v2467_v39 = vrot.slane %v1484_v46, 9  ;;  %v1485_v47 = vld [vmem:[#allocation2 + $0x38] sm:$0xe] }
 0x129   : > { %2673 = vmatpush3.bf16.msra.mxu1 %v1562_v43  ;;  %2658 = vmatprep.mubr.msk.bf16.mxu1 %vm788_vm15, %v2789_v23  ;;  %v1525_v25 = vrot.slane %v3276_v3, 5  ;;  %v1506_v41 = vsel %vm3070_vm14, %v2462_v1, %v1505_v28  ;;  %v2466_v14 = vrot.slane %v1483_v33, 9  ;;  %v1521_v13 = vrot.slane %v3268_v56, 5  ;;  %v1987_v43 = vld [vmem:[#allocation2 + $0x18] sm:$0xe] }
 0x12a   : > { %2669 = vmatmul.mubr.msk.bf16.gmra.mxu0 %vm788_vm15, %v2457_v22  ;;  %2732 = vmatprep.subr.msk.bf16.mxu1 %vm801_vm8, %v2488_v60  ;;  %v2791_v60 = vld [vmem:[#allocation2 + $0x38] ss:$8 sps:$4 sm:$0xff]   ;;  %v2497_v45 = vrot.slane %v1986_v19, 9  ;;  %v2012_v38 = vrot.slane %v3339_v36, 5  ;;  %v1773_v48 = vshrl.u32 %v1756_v4, 16  ;;  %v1776_v3 = vshll.u32 %v1756_v4, 16 }
 0x12b   : > { %2684 = vmatprep.mubr.msk.bf16.mxu0 %vm788_vm15, %v2790_v6  ;;  %v2471_v29 = vcombine.low %v1506_v41, %v1510_v35  ;;  %v3354_v42 = vsel %vm3070_vm14, %v2464_v31, %v1513_v32  ;;  %v2469_v50 = vrot.slane %v1486_v9, 9  ;;  %v1533_v55 = vrot.slane %v3295_v30, 5  ;;  %v3357_v12 = vld [vmem:[#allocation2 + $0x24] sm:$0x1]  ;;  %v1988_v56 = vld [vmem:[#allocation2 + $0x20] sm:$0xe] }
 0x12c   : > { %v2792_v20 = vld [vmem:[#allocation2 + $0x20] ss:$8 sps:$4 sm:$0xff]   ;;  %v1518_v57 = vsel %vm3070_vm14, %v2465_v37, %v1517_v11  ;;  %v3363_v58 = vsel %vm3070_vm14, %v2467_v39, %v1525_v25  ;;  %v3365_v7 = vld [vmem:[#allocation2 + $0x2c] sm:$0x1]  ;;  %v1787_v8 = vshrl.u32 %v1758_v44, 16  ;;  %v1790_v21 = vshll.u32 %v1758_v44, 16 }
 0x12d   : > { %v2498_v61 = vrot.slane %v1987_v43, 9  ;;  %v2016_v2 = vrot.slane %v3345_v40, 5  ;;  %v2468_v10 = vrot.slane %v1485_v47, 9  ;;  %v1529_v30 = vrot.slane %v3279_v24, 5  ;;  %v1989_v16 = vld [vmem:[#allocation2 + $0x28] sm:$0xe] }
 0x12e   : > { %v2499_v34 = vrot.slane %v1988_v56, 9  ;;  %v2020_v17 = vrot.slane %v3357_v12, 5  ;;  %v1775_v15 = vrot.slane %v1773_v48, 4  ;;  %v1778_v23 = vrot.slane %v1776_v3, 5  ;;  %v1762_v52 = vld [vmem:[#allocation2 + $0x28] sm:$0xf] }
 0x12f   : > { %v2793_v27 = vld [vmem:[#allocation2 + $0x30] ss:$8 sps:$4 sm:$0xff]   ;;  %v2472_v1 = vcombine.low %v3354_v42, %v1518_v57  ;;  %v1522_v28 = vsel %vm3070_vm14, %v2466_v14, %v1521_v13  ;;  %v2013_v24 = vsel %vm3070_vm14, %v2497_v45, %v2012_v38  ;;  %v3379_v54 = vsel %vm3070_vm14, %v2469_v50, %v1533_v55  ;;  %v1760_v32 = vld [vmem:[#allocation2 + $0x20] sm:$0xf]  ;;  %v3398_v41 = vld [vmem:[#allocation2 + $0x34] sm:$0x1] }
 0x130   : > { %2659 = vmatmul.mubr.msk.bf16.gmra.mxu1 %vm788_vm15, %v2791_v60  ;;  %v2500_v46 = vrot.slane %v1989_v16, 9  ;;  %v2024_v22 = vrot.slane %v3365_v7, 5  ;;  %v1789_v6 = vrot.slane %v1787_v8, 4  ;;  %v1792_v31 = vrot.slane %v1790_v21, 5  ;;  %v1990_v4 = vld [vmem:[#allocation2 + $0x30] sm:$0xe] }
 0x131   : > { %2674 = vmatprep.mubr.msk.bf16.mxu1 %vm788_vm15, %v2471_v29  ;;  %v2473_v33 = vcombine.low %v1522_v28, %v3363_v58  ;;  %v2017_v35 = vsel %vm3070_vm14, %v2498_v61, %v2016_v2  ;;  %v3390_v19 = vsel %vm3070_vm14, %v2468_v10, %v1529_v30  ;;  %v1815_v37 = vshrl.u32 %v1762_v52, 16  ;;  %v3400_v14 = vld [vmem:[#allocation2 + $0x3c] sm:$0x1]  ;;  %v1991_v43 = vld [vmem:[#allocation2 + $0x38] sm:$0xe] }
 0x132   : > { %2685 = vmatmul.mubr.msk.bf16.vlgmr.msra.gmra.mxu0 %vm788_vm15, %v2792_v20  ;;  %v2506_v11 = vcombine.low %v2013_v24, %v2017_v35  ;;  %v2474_v39 = vcombine.low %v3390_v19, %v3379_v54  ;;  %v3396_v25 = vsel %vm3070_vm14, %v2499_v34, %v2020_v17  ;;  %v1779_v9 = vor.u32 %v1778_v23, %v1775_v15  ;;  %v1766_v29 = vld [vmem:[#allocation2 + $0x38] sm:$0xf]  ;;  %v2794_v42 = vld [vmem:[#allocation2 + $0x40] ss:$8 sps:$4 sm:$0xff]  }
 0x133   : > { %2688 = vmatprep.mubr.msk.bf16.mxu0 %vm788_vm15, %v2793_v27  ;;  %2703 = vmatpush3.bf16.msra.mxu0 %v3319_v62  ;;  %v1764_v62 = vld [vmem:[#allocation2 + $0x30] sm:$0xf]  ;;  %v1782_v13 = vshll.u32 %v3339_v36, 16  ;;  %v1801_v44 = vshrl.u32 %v1760_v32, 16  ;;  %v1804_v60 = vshll.u32 %v1760_v32, 16  ;;  %v1818_v45 = vshll.u32 %v1762_v52, 16 }
 0x134   : > { %v2025_v38 = vsel %vm3070_vm14, %v2500_v46, %v2024_v22  ;;  %v1793_v47 = vor.u32 %v1792_v31, %v1789_v6  ;;  %v1796_v48 = vshll.u32 %v3345_v40, 16  ;;  %v2501_v3 = vrot.slane %v1990_v4, 9  ;;  %v1768_v21 = vld [vmem:[#allocation2 + $0x40] sm:$0xf] }
 0x135   : > { %v2028_v50 = vrot.slane %v3398_v41, 5  ;;  %v1817_v55 = vrot.slane %v1815_v37, 4  ;;  %v1820_v56 = vrot.slane %v1818_v45, 5  ;;  %v1829_v20 = vshrl.u32 %v1764_v62, 16  ;;  %v1992_v35 = vld [vmem:[#allocation2 + $0x40] sm:$0xe] }
 0x136   : > { %v1780_v36 = vrot.slane %v1779_v9, 4  ;;  %v2502_v57 = vrot.slane %v1991_v43, 9  ;;  %v2032_v58 = vrot.slane %v3400_v14, 5  ;;  %v1832_v8 = vshll.u32 %v1764_v62, 16 }
 0x137   : > { %v1803_v40 = vrot.slane %v1801_v44, 4  ;;  %v1806_v61 = vrot.slane %v1804_v60, 5  ;;  %v1831_v2 = vrot.slane %v1829_v20, 4  ;;  %v1843_v10 = vshrl.u32 %v1766_v29, 16 }
 0x138   : > { %2675 = vmatmul.mubr.msk.bf16.vlgmr.msra.gmra.mxu1 %vm788_vm15, %v2472_v1  ;;  %v1784_v30 = vrot.slane %v1782_v13, 5  ;;  %v1794_v16 = vrot.slane %v1793_v47, 4  ;;  %v1834_v34 = vrot.slane %v1832_v8, 5  ;;  %v1846_v17 = vshll.u32 %v1766_v29, 16 }
 0x139   : > { %2693 = vmatpush3.bf16.msra.mxu1 %v3316_v5  ;;  %2678 = vmatprep.mubr.msk.bf16.mxu1 %vm788_vm15, %v2473_v33  ;;  %v1798_v15 = vrot.slane %v1796_v48, 5  ;;  %v1821_v23 = vor.u32 %v1820_v56, %v1817_v55  ;;  %v1845_v52 = vrot.slane %v1843_v10, 4  ;;  %v1857_v27 = vshrl.u32 %v1768_v21, 16  ;;  %v1769_v33 = vld [vmem:[#allocation2 + $0x44] sm:$0x1] }
 0x13a   : > { %2689 = vmatmul.mubr.msk.bf16.gmra.mxu0 %vm788_vm15, %v2794_v42  ;;  %v1785_v5 = vsel %vm3060_vm13, %v1780_v36, %v1784_v30  ;;  %v1835_v1 = vor.u32 %v1834_v34, %v1831_v2  ;;  %v1848_v28 = vrot.slane %v1846_v17, 5  ;;  %v1860_v24 = vshll.u32 %v1768_v21, 16 }
 0x13b   : > { %2704 = vmatprep.mubr.msk.bf16.mxu0 %vm788_vm15, %v2506_v11  ;;  %v2029_v54 = vsel %vm3070_vm14, %v2501_v3, %v2028_v50  ;;  %v2033_v46 = vsel %vm3070_vm14, %v2502_v57, %v2032_v58  ;;  %v1807_v22 = vor.u32 %v1806_v61, %v1803_v40  ;;  %v1824_v6 = vshll.u32 %v3365_v7, 16 }
 0x13c   : > { %v1799_v31 = vsel %vm3060_vm13, %v1794_v16, %v1798_v15  ;;  %v1810_v32 = vshll.u32 %v3357_v12, 16  ;;  %v1838_v19 = vshll.u32 %v3398_v41, 16  ;;  %v1849_v4 = vor.u32 %v1848_v28, %v1845_v52 }
 0x13d   : > { %v2489_v37 = vcombine.low %v1785_v5, %v1799_v31  ;;  %v1822_v11 = vrot.slane %v1821_v23, 4  ;;  %v1859_v9 = vrot.slane %v1857_v27, 4  ;;  %v1862_v62 = vrot.slane %v1860_v24, 5 }
 0x13e   : > { %v2507_v13 = vcombine.low %v3396_v25, %v2025_v38  ;;  %v2508_v43 = vcombine.low %v2029_v54, %v2033_v46  ;;  %v1836_v7 = vrot.slane %v1835_v1, 4  ;;  %v1852_v44 = vshll.u32 %v3400_v14, 16 }
 0x13f   : > { %v1808_v12 = vrot.slane %v1807_v22, 4  ;;  %v1826_v60 = vrot.slane %v1824_v6, 5  ;;  %v2503_v45 = vrot.slane %v1992_v35, 9  ;;  %v2036_v47 = vrot.slane %v1769_v33, 5 }
 0x140   : > { %2679 = vmatmul.mubr.msk.bf16.gmra.mxu1 %vm788_vm15, %v2474_v39  ;;  %v1840_v41 = vrot.slane %v1838_v19, 5  ;;  %v1850_v48 = vrot.slane %v1849_v4, 4  ;;  %v1877_v3 = vor.u32 %v3327_v59, %v3325_v53  ;;  %v1812_v39 = vrot.slane %v1810_v32, 5 }
 0x141   : > { %2694 = vmatprep.mubr.msk.bf16.mxu1 %vm788_vm15, %v2489_v37  ;;  %v1827_v25 = vsel %vm3060_vm13, %v1822_v11, %v1826_v60  ;;  %v1863_v14 = vor.u32 %v1862_v62, %v1859_v9  ;;  %v1880_v38 = vshll.u32 %v3307_v49, 16  ;;  %v1854_v42 = vrot.slane %v1852_v44, 5 }
 0x142   : > { %2705 = vmatmul.mubr.msk.bf16.vlgmr.msra.gmra.mxu0 %vm788_vm15, %v2507_v13  ;;  %v1841_v29 = vsel %vm3060_vm13, %v1836_v7, %v1840_v41  ;;  %v1813_v50 = vsel %vm3060_vm13, %v1808_v12, %v1812_v39  ;;  %v2037_v55 = vsel %vm3070_vm14, %v2503_v45, %v2036_v47  ;;  %v2041_v53 = vsel %vm3070_vm14, %v2504_v63, %v2040_v0  ;;  %v2171_v0 = vld [vmem:[%s3589_s5] sm:$0xf] }
 0x143   : > { %2708 = vmatprep.mubr.msk.bf16.mxu0 %vm788_vm15, %v2508_v43  ;;  %v1866_v59 = vshll.u32 %v1769_v33, 16  ;;  %v2490_v56 = vcombine.low %v1813_v50, %v1827_v25  ;;  %v1855_v20 = vsel %vm3060_vm13, %v1850_v48, %v1854_v42  ;;  %v1864_v57 = vrot.slane %v1863_v14, 4  ;;  %2734 = vmatprep.subr.msk.bf16.mxu1 %vm801_vm8, %v2171_v0 }
 0x144   : > { %v2491_v36 = vcombine.low %v1841_v29, %v1855_v20  ;;  %v1878_v58 = vrot.slane %v1877_v3, 4  ;;  %v1882_v8 = vrot.slane %v1880_v38, 5  ;;  %v2509_v21 = vcombine.low %v2037_v55, %v2041_v53 }
 0x145   : > { %v1868_v49 = vrot.slane %v1866_v59, 5  ;;  %v2208_v40 = vsel %vm801_vm8, %v2171_v0, 0 }
 0x146   : > { %v1883_v51 = vsel %vm3060_vm13, %v1878_v58, %v1882_v8 }
 0x147   : > { %v1869_v26 = vsel %vm3060_vm13, %v1864_v57, %v1868_v49 }
 0x148   : > { %2695 = vmatmul.mubr.msk.bf16.vlgmr.msra.gmra.mxu1 %vm788_vm15, %v2490_v56  ;;  %v2492_v63 = vcombine.low %v1869_v26, %v1883_v51 }
 0x149   : > { %2698 = vmatprep.mubr.msk.bf16.mxu1 %vm788_vm15, %v2491_v36  ;;  %2713 = vmatpush3.bf16.msra.mxu1 %v2208_v40 }
 0x14a   : > { %2709 = vmatmul.mubr.msk.bf16.gmra.mxu0 %vm788_vm15, %v2509_v21 }
 0x150   : > { %2699 = vmatmul.mubr.msk.bf16.gmra.mxu1 %vm788_vm15, %v2492_v63 }
 0x1c6   : > { %v2626_v61 = vpop.f32.mrf.mxu0 }
 0x1c8   : > { %v839_v2 = vpop.f32.mrf.mxu0 }
 0x1ca   : > { %v2627_v10 = vpop.f32.mrf.mxu0 }
 0x1cc   : > { %v842_v30 = vpop.f32.mrf.mxu0 }
 0x1ce   : > { %v2646_v16 = vpop.f32.mrf.mxu0 }
 0x1d0   : > { %v2630_v34 = vpop.f32.mrf.mxu1  ;;  %v1092_v18 = vpop.f32.mrf.mxu0 }
 0x1d2   : > { %v855_v17 = vpop.f32.mrf.mxu1  ;;  %v2647_v15 = vpop.f32.mrf.mxu0 }
 0x1d4   : > { %v2631_v23 = vpop.f32.mrf.mxu1  ;;  %v1095_v52 = vpop.f32.mrf.mxu0 }
 0x1d6   : > { %v3462_v27 = vpop.f32.mrf.mxu1  ;;  %v2650_v5 = vpop.f32.mrf.mxu0 }
 0x1d8   : > { %v2636_v1 = vpop.f32.mrf.mxu1  ;;  %v1108_v28 = vpop.f32.mrf.mxu0 }
 0x1d9   : > { %v948_v14 = vadd.f32 %v2636_v1, %v2626_v61 }
 0x1da   : > { %v939_v24 = vpop.f32.mrf.mxu1  ;;  %v3464_v54 = vpop.f32.mrf.mxu0 }
 0x1db   : > { %v940_v42 = vadd.f32 %v939_v24, %v839_v2  ;;  %v1125_v59 = vadd.f32 %v2646_v16, %v948_v14 }
 0x1dc   : > { %v2637_v46 = vpop.f32.mrf.mxu1  ;;  %v3466_v22 = vpop.f32.mrf.mxu0 }
 0x1dd   : > { %v951_v53 = vadd.f32 %v2637_v46, %v2627_v10  ;;  %v1123_v57 = vadd.f32 %v1092_v18, %v940_v42 }
 0x1de   : > { %v942_v6 = vpop.f32.mrf.mxu1 }
 0x1df   : > { %v2666_v31 = vpop.f32.mrf.mxu0  ;;  %v943_v36 = vadd.f32 %v942_v6, %v842_v30  ;;  %v1126_v26 = vadd.f32 %v2647_v15, %v951_v53 }
 0x1e0   : > { %v2640_v32 = vpop.f32.mrf.mxu1 }
 0x1e1   : > { %v1440_v33 = vpop.f32.mrf.mxu0  ;;  %v964_v51 = vadd.f32 %v2640_v32, %v2630_v34  ;;  %v1124_v2 = vadd.f32 %v1095_v52, %v943_v36 }
 0x1e2   : > { %v955_v35 = vpop.f32.mrf.mxu1 }
 0x1e3   : > { %v2667_v19 = vpop.f32.mrf.mxu0  ;;  %v956_v63 = vadd.f32 %v955_v35, %v855_v17  ;;  %v1129_v18 = vadd.f32 %v2650_v5, %v964_v51 }
 0x1e4   : > { %v2641_v4 = vpop.f32.mrf.mxu1 }
 0x1e5   : > { %v1443_v11 = vpop.f32.mrf.mxu0  ;;  %v967_v30 = vadd.f32 %v2641_v4, %v2631_v23  ;;  %v1127_v6 = vadd.f32 %v1108_v28, %v956_v63 }
 0x1e6   : > { %v958_v37 = vpop.f32.mrf.mxu1 }
 0x1e7   : > { %v959_v15 = vadd.f32 %v958_v37, %v3462_v27  ;;  %v1130_v53 = vadd.f32 %v3464_v54, %v967_v30 }
 0x1e8   : > { %v2656_v9 = vpop.f32.mrf.mxu1 }
 0x1e9   : > { %v1243_v58 = vadd.f32 %v2656_v9, %v1125_v59  ;;  %v1128_v5 = vadd.f32 %v3466_v22, %v959_v15 }
 0x1ea   : > { %v3468_v62 = vpop.f32.mrf.mxu0  ;;  %v1210_v13 = vpop.f32.mrf.mxu1 }
 0x1eb   : > { %v1241_v49 = vadd.f32 %v1210_v13, %v1123_v57  ;;  %v1473_v10 = vadd.f32 %v2666_v31, %v1243_v58 }
 0x1ec   : > { %v3470_v43 = vpop.f32.mrf.mxu0  ;;  %v2657_v7 = vpop.f32.mrf.mxu1 }
 0x1ed   : > { %v1244_v61 = vadd.f32 %v2657_v7, %v1126_v26  ;;  %v1471_v46 = vadd.f32 %v1440_v33, %v1241_v49 }
 0x1ee   : > { %v3472_v44 = vpop.f32.mrf.mxu0  ;;  %v1213_v12 = vpop.f32.mrf.mxu1 }
 0x1ef   : > { %v1242_v24 = vadd.f32 %v1213_v12, %v1124_v2  ;;  %v1474_v17 = vadd.f32 %v2667_v19, %v1244_v61 }
 0x1f0   : > { %v3474_v60 = vpop.f32.mrf.mxu0  ;;  %v2660_v45 = vpop.f32.mrf.mxu1 }
 0x1f1   : > { %v1247_v32 = vadd.f32 %v2660_v45, %v1129_v18  ;;  %v1472_v31 = vadd.f32 %v1443_v11, %v1242_v24 }
 0x1f2   : > { %v2686_v47 = vpop.f32.mrf.mxu0  ;;  %v1226_v41 = vpop.f32.mrf.mxu1 }
 0x1f3   : > { %v1245_v35 = vadd.f32 %v1226_v41, %v1127_v6  ;;  %v1477_v27 = vadd.f32 %v3468_v62, %v1247_v32 }
 0x1f4   : > { %v1717_v48 = vpop.f32.mrf.mxu0  ;;  %v2661_v3 = vpop.f32.mrf.mxu1 }
 0x1f5   : > { %v1475_v19 = vadd.f32 %v3470_v43, %v1245_v35  ;;  %v2514_v43 = vld [vmem:[%s3588_s4] ss:$0 sm:$0xff] }
 0x1f6   : > { %v2687_v39 = vpop.f32.mrf.mxu0  ;;  %v1229_v25 = vpop.f32.mrf.mxu1 }
 0x1f7   : > { %v1246_v41 = vadd.f32 %v1229_v25, %v1128_v5 }
 0x1f8   : > { %v3476_v38 = vpop.f32.mrf.mxu0  ;;  %v2676_v29 = vpop.f32.mrf.mxu1 }
 0x1f9   : > { %v1631_v9 = vadd.f32 %v2676_v29, %v1473_v10  ;;  %v1248_v29 = vadd.f32 %v2661_v3, %v1130_v53  ;;  %v1476_v62 = vadd.f32 %v3474_v60, %v1246_v41 }
 0x1fa   : > { %v3478_v50 = vpop.f32.mrf.mxu0  ;;  %v1598_v55 = vpop.f32.mrf.mxu1 }
 0x1fb   : > { %v1629_v34 = vadd.f32 %v1598_v55, %v1471_v46  ;;  %v1750_v33 = vadd.f32 %v2686_v47, %v1631_v9 }
 0x1fc   : > { %v3480_v56 = vpop.f32.mrf.mxu0  ;;  %v2677_v20 = vpop.f32.mrf.mxu1 }
 0x1fd   : > { %v1632_v52 = vadd.f32 %v2677_v20, %v1474_v17  ;;  %v1748_v4 = vadd.f32 %v1717_v48, %v1629_v34  ;;  %v1478_v48 = vadd.f32 %v3472_v44, %v1248_v29  ;;  %v2551_v29 = vld [vmem:[%s2960_s21 + $0x8] sm:$0xff]  }
 0x1fe   : > { %v3482_v8 = vpop.f32.mrf.mxu0  ;;  %v1601_v21 = vpop.f32.mrf.mxu1 }
 0x1ff   : > { %v1630_v28 = vadd.f32 %v1601_v21, %v1472_v31  ;;  %v1751_v59 = vadd.f32 %v2687_v39, %v1632_v52 }
 0x200   : > { %v3484_v0 = vpop.f32.mrf.mxu0  ;;  %v2680_v40 = vpop.f32.mrf.mxu1 }
 0x201   : > { %v1635_v11 = vadd.f32 %v2680_v40, %v1477_v27  ;;  %v1749_v22 = vadd.f32 %v3476_v38, %v1630_v28  ;;  %v2515_v27 = vld [vmem:[%s3590_s6] ss:$0 sm:$0xff] }
 0x202   : > { %v2706_v16 = vpop.f32.mrf.mxu0  ;;  %v1614_v1 = vpop.f32.mrf.mxu1 }
 0x203   : > { %v1633_v20 = vadd.f32 %v1614_v1, %v1475_v19  ;;  %v1754_v26 = vadd.f32 %v3478_v50, %v1635_v11  ;;  %v2536_v19 = vld [vmem:[%s2960_s21] sm:$0xff]  }
 0x204   : > { %v2105_v14 = vpop.f32.mrf.mxu0  ;;  %v2681_v42 = vpop.f32.mrf.mxu1 }
 0x205   : > { %v1636_v21 = vadd.f32 %v2681_v42, %v1478_v48  ;;  %v1752_v63 = vadd.f32 %v3480_v56, %v1633_v20 }
 0x206   : > { %v2707_v13 = vpop.f32.mrf.mxu0  ;;  %v1617_v7 = vpop.f32.mrf.mxu1 }
 0x207   : > { %v1634_v38 = vadd.f32 %v1617_v7, %v1476_v62  ;;  %v1755_v30 = vadd.f32 %v3482_v8, %v1636_v21 }
 0x208   : > { %v2108_v12 = vpop.f32.mrf.mxu0  ;;  %v2696_v23 = vpop.f32.mrf.mxu1 }
 0x209   : > { %v1980_v37 = vadd.f32 %v2696_v23, %v1750_v33 }
 0x20a   : > { %v1947_v45 = vpop.f32.mrf.mxu1  ;;  %v2710_v54 = vpop.f32.mrf.mxu0 }
 0x20b   : > { %v1978_v55 = vadd.f32 %v1947_v45, %v1748_v4  ;;  %v2138_v3 = vadd.f32 %v2706_v16, %v1980_v37  ;;  %v2541_v37 = vunpack.c.l.bf16 %v2551_v29 }
 0x20c   : > { %v2697_v36 = vpop.f32.mrf.mxu1  ;;  %v2121_v49 = vpop.f32.mrf.mxu0 }
 0x20d   : > { %v2136_v47 = vadd.f32 %v2105_v14, %v1978_v55  ;;  %v1981_v57 = vadd.f32 %v2697_v36, %v1751_v59  ;;  %v2153_v2 = vadd.f32 %v2514_v43, %v2138_v3  ;;  %v1753_v14 = vadd.f32 %v3484_v0, %v1634_v38  ;;  %v2553_v36 = vld [vmem:[%s2960_s21 + $0x18] sm:$0xff]  }
 0x20e   : > { %v1950_v58 = vpop.f32.mrf.mxu1  ;;  %v2711_v46 = vpop.f32.mrf.mxu0  ;;  %v2537_v55 = vunpack.c.l.bf16 %v2536_v19  ;;  %v2538_v3 = vunpack.c.h.bf16 %v2536_v19 }
 0x20f   : > { %v2139_v25 = vadd.f32 %v2707_v13, %v1981_v57  ;;  %v1979_v39 = vadd.f32 %v1950_v58, %v1749_v22  ;;  %v2151_v40 = vadd.f32 %v2514_v43, %v2136_v47  ;;  %v2161_v56 = vmax.f32 %v2153_v2, 0.0  ;;  %v2552_v58 = vld [vmem:[%s2960_s21 + $0x10] sm:$0xff]   ;;  %s2534_s21 = sshll.u32 %s2922_s28, 9  ;;  %s3544_s28 = scalar_lea.sflag [#allocation4], %s269_s22 }
 0x210   : > { %v2700_v51 = vpop.f32.mrf.mxu1  ;;  %v2124_v13 = vpop.f32.mrf.mxu0  ;;  %v2550_v2 = vunpack.c.h.bf16 %v2553_v36  ;;  %s3534_s14 = scalar_lea.hbm %s3591_s7, %s2534_s21 }
 0x211   : > { %v2154_v44 = vadd.f32 %v2514_v43, %v2139_v25  ;;  %v2137_v61 = vadd.f32 %v2108_v12, %v1979_v39  ;;  %v1984_v10 = vadd.f32 %v2700_v51, %v1754_v26  ;;  %v2159_v6 = vmax.f32 %v2151_v40, 0.0 }
 0x212   : > { %v1963_v60 = vpop.f32.mrf.mxu1  ;;  %v2545_v51 = vunpack.c.l.bf16 %v2552_v58 }
 0x213   : > { %v2152_v16 = vadd.f32 %v2514_v43, %v2137_v61  ;;  %v1982_v1 = vadd.f32 %v1963_v60, %v1752_v63  ;;  %v2162_v24 = vmax.f32 %v2154_v44, 0.0  ;;  %v2142_v42 = vadd.f32 %v2710_v54, %v1984_v10 }
 0x214   : > { %v2701_v18 = vpop.f32.mrf.mxu1  ;;  %v2542_v54 = vunpack.c.h.bf16 %v2551_v29 }
 0x215   : > { %v2160_v9 = vmax.f32 %v2152_v16, 0.0  ;;  %v2140_v50 = vadd.f32 %v2121_v49, %v1982_v1  ;;  %v1985_v15 = vadd.f32 %v2701_v18, %v1755_v30  ;;  %v2168_v35 = vpack.c.bf16 %v2162_v24, %v2161_v56 }
 0x216   : > { %v1966_v34 = vpop.f32.mrf.mxu1  ;;  %v2157_v8 = vadd.f32 %v2514_v43, %v2142_v42 }
 0x217   : > { %v2167_v17 = vpack.c.bf16 %v2160_v9, %v2159_v6  ;;  %v1983_v32 = vadd.f32 %v1966_v34, %v1753_v14  ;;  %v2143_v7 = vadd.f32 %v2711_v46, %v1985_v15  ;;  %v2155_v52 = vadd.f32 %v2514_v43, %v2140_v50 }
 0x218   : > { %v2165_v5 = vmax.f32 %v2157_v8, 0.0  ;;  %v2546_v46 = vunpack.c.h.bf16 %v2552_v58 }
 0x219   : > { %v2141_v31 = vadd.f32 %v2124_v13, %v1983_v32  ;;  %2714 = vmatprep.mubr.msk.bf16.mxu1 %vm788_vm15, %v2167_v17  ;;  %v2158_v53 = vadd.f32 %v2514_v43, %v2143_v7  ;;  %v2163_v33 = vmax.f32 %v2155_v52, 0.0 }
 0x21a   : > { %2715 = vmatmul.mubr.msk.bf16.vlgmr.msra.gmra.mxu1 %vm788_vm15, %v2168_v35 }
 0x21b   : > { %v2156_v0 = vadd.f32 %v2514_v43, %v2141_v31  ;;  %v2166_v12 = vmax.f32 %v2158_v53, 0.0  ;;  %v2549_v43 = vunpack.c.l.bf16 %v2553_v36 }
 0x21d   : > { %v2164_v23 = vmax.f32 %v2156_v0, 0.0  ;;  %v2170_v4 = vpack.c.bf16 %v2166_v12, %v2165_v5 }
 0x21f   : > { %v2169_v28 = vpack.c.bf16 %v2164_v23, %v2163_v33 }
 0x221   : > { %2718 = vmatprep.mubr.msk.bf16.mxu1 %vm788_vm15, %v2169_v28 }
 0x222   : > { %2719 = vmatmul.mubr.msk.bf16.gmra.mxu1 %vm788_vm15, %v2170_v4 }
 0x2da   : > { %v2716_v45 = vpop.f32.mrf.mxu1 }
 0x2db   : > { %v2253_v41 = vadd.f32 %v2716_v45, %v2515_v27 }
 0x2dc   : > { %v2244_v59 = vpop.f32.mrf.mxu1 }
 0x2dd   : > { %v2277_v11 = vadd.f32 %v2541_v37, %v2253_v41  ;;  %v2245_v20 = vadd.f32 %v2515_v27, %v2244_v59 }
 0x2de   : > { %v2717_v47 = vpop.f32.mrf.mxu1 }
 0x2df   : > { %v2285_v57 = vmax.f32 %v2277_v11, 0.0  ;;  %v2275_v22 = vadd.f32 %v2537_v55, %v2245_v20  ;;  %v2256_v48 = vadd.f32 %v2717_v47, %v2515_v27 }
 0x2e0   : > { %v2247_v62 = vpop.f32.mrf.mxu1 }
 0x2e1   : > { %v2293_v25 = vpack.c.bf16 %v2285_v57, %v2285_v57  ;;  %v2283_v39 = vmax.f32 %v2275_v22, 0.0  ;;  %v2278_v21 = vadd.f32 %v2542_v54, %v2256_v48  ;;  %v2248_v49 = vadd.f32 %v2515_v27, %v2247_v62 }
 0x2e2   : > { %v2720_v26 = vpop.f32.mrf.mxu1 }
 0x2e3   : > { %2302 = vst.msk [vmem:[%s3515_s29 + $0x8] sm:$0xf] %vm2299_vm0, %v2293_v25  ;;  %v2291_v63 = vpack.c.bf16 %v2283_v39, %v2283_v39  ;;  %v2286_v38 = vmax.f32 %v2278_v21, 0.0  ;;  %v2276_v40 = vadd.f32 %v2538_v3, %v2248_v49  ;;  %v2269_v44 = vadd.f32 %v2720_v26, %v2515_v27 }
 0x2e4   : > { %v2260_v61 = vpop.f32.mrf.mxu1 }
 0x2e5   : > { %2300 = vst.msk [vmem:[%s3515_s29] sm:$0xf] %vm2299_vm0, %v2291_v63  ;;  %v2294_v10 = vpack.c.bf16 %v2286_v38, %v2286_v38  ;;  %v2284_v60 = vmax.f32 %v2276_v40, 0.0  ;;  %v2281_v16 = vadd.f32 %v2549_v43, %v2269_v44  ;;  %v2261_v1 = vadd.f32 %v2515_v27, %v2260_v61 }
 0x2e6   : > { %v2721_v24 = vpop.f32.mrf.mxu1 }
 0x2e7   : > { %2303 = vst.msk [vmem:[%s3515_s29 + $0xc] sm:$0xf] %vm2299_vm0, %v2294_v10  ;;  %v2292_v30 = vpack.c.bf16 %v2284_v60, %v2284_v60  ;;  %v2289_v18 = vmax.f32 %v2281_v16, 0.0  ;;  %v2279_v6 = vadd.f32 %v2545_v51, %v2261_v1  ;;  %v2272_v9 = vadd.f32 %v2721_v24, %v2515_v27 }
 0x2e8   : > { %v2263_v50 = vpop.f32.mrf.mxu1 }
 0x2e9   : > { %2301 = vst.msk [vmem:[%s3515_s29 + $0x4] sm:$0xf] %vm2299_vm0, %v2292_v30  ;;  %v2297_v14 = vpack.c.bf16 %v2289_v18, %v2289_v18  ;;  %v2287_v56 = vmax.f32 %v2279_v6, 0.0  ;;  %v2282_v42 = vadd.f32 %v2550_v2, %v2272_v9  ;;  %v2264_v15 = vadd.f32 %v2515_v27, %v2263_v50 }
 0x2eb   : > { %2306 = vst.msk [vmem:[%s3515_s29 + $0x18] sm:$0xf] %vm2299_vm0, %v2297_v14  ;;  %v2295_v34 = vpack.c.bf16 %v2287_v56, %v2287_v56  ;;  %v2290_v17 = vmax.f32 %v2282_v42, 0.0  ;;  %v2280_v32 = vadd.f32 %v2546_v46, %v2264_v15 }
 0x2ed   : > { %2304 = vst.msk [vmem:[%s3515_s29 + $0x10] sm:$0xf] %vm2299_vm0, %v2295_v34  ;;  %v2298_v35 = vpack.c.bf16 %v2290_v17, %v2290_v17  ;;  %v2288_v13 = vmax.f32 %v2280_v32, 0.0 }
 0x2ef   : > { %2307 = vst.msk [vmem:[%s3515_s29 + $0x1c] sm:$0xf] %vm2299_vm0, %v2298_v35  ;;  %v2296_v7 = vpack.c.bf16 %v2288_v13, %v2288_v13 }
 0x2f1   : > { %2305 = vst.msk [vmem:[%s3515_s29 + $0x14] sm:$0xf] %vm2299_vm0, %v2296_v7 }
 0x2f2   : > { %2808 = shalt.err (!%p2805_p3)
}
 0x2f3   : > { %s2809_s19 = scalar_lea.hbm %s3534_s14, 512  ;;  %s2813_s23 = scalar_lea.hbm %s3591_s7, 1024 }
 0x2f4   : > { %p2810_p4 = scmp.ne.s32.totalorder %s3534_s14, %s2809_s19  ;;  %p2814_p9 = scmp.lt.s32.totalorder %s3534_s14, %s3591_s7 }
 0x2f5   : > { %p2815_p10 = scmp.lt.s32.totalorder %s2813_s23, %s2809_s19 }
 0x2f6   : > { %p2811_p7 = pnand %p2810_p4, %p2939_p5 }
 0x2f7   : > { %p2816_p11 = por %p2815_p10, %p2814_p9 }
 0x2f8   : > { %p2812_p8 = pneg %p2811_p7 }
 0x2fa   : > { %p2817_p12 = pnand %p2816_p11, %p2812_p8 }
 0x2fc   : > { %2820 = shalt.err (!%p2817_p12)
}
 0x2fd   : > { %s2859_s9 = smov 64   ;;  %s2860_s13 = smov 4  }
 0x2fe   : > { %2735 = dma.vmem_to_hbm [thread:$0]  (%p2939_p5), %s3536_s8, 512, %s3534_s14, %s3544_s28, %s2859_s9, %s2859_s9, %s2860_s13  }
 0x2ff PF: > { %p2741_p13 = scmp.ge.s32.totalorder %s2855_s27, 2  ;;  %s2337_s15 = sand.u32 1, %s2843_s24  }
 0x300   : > { %s2338_s16 = scalar_lea.sflag [#allocation4], %s2337_s15 }
 0x301   : > { %p2738_p0 = pnand %p2741_p13, %p2943_p6 }
 0x303   : > { %p2739_p1 = pneg %p2738_p0 }
 0x305   : > { %2838 = dma.done.wait (%p2739_p1), %s2338_s16, 512  }
 0x306   : > { %2840 = vsyncadd (%p2739_p1), %s2338_s16, 4294966784  ;;  %p17_p2 = scmp.ge.s32.totalorder %s2926_s30, 4   ;;  %s3604_s24 = smov %s2847_s25 }
 0x307   : > { %s3605_s25 = smov %s2851_s26  ;;  %s3606_s26 = smov %s2937_s10 }
 0x308   : > { %s3607_s27 = smov %s2926_s30  ;;  %19 = sbr.rel (!%p17_p2) target bundleno = 3 (0x3), region = 94 }
 0x30d   :  { %2343 = vsyncpa [#allocation4], 1 }
 0x30e   :  { %2345 = vsyncpa [#allocation4 + $0x1], 1 }

// kernel: tpu_custom_call.1
= control target key start
LH: loop header
LB: loop body
LE: loop exit
PB: predicated region body
PF: predicated region fallthrough
CT: control target
= control target key end

     0   :  { %12 = vsyncpa [#allocation4], 0  ;;  %s3584_s0 = inlined_call_operand.vmem [shape: bf16[2,8,8,32], index: 0, kind: input, shape index: {}]   ;;  %s3585_s1 = inlined_call_operand.vmem [shape: bf16[32,8], index: 1, kind: input, shape index: {}]   ;;  %s3586_s2 = inlined_call_operand.vmem [shape: f32[1,8], index: 2, kind: input, shape index: {}]   ;;  %s3587_s3 = inlined_call_operand.vmem [shape: bf16[9,8,8], index: 3, kind: input, shape index: {}]   ;;  %s3588_s4 = inlined_call_operand.vmem [shape: f32[1,8], index: 4, kind: input, shape index: {}]   ;;  %s3589_s5 = inlined_call_operand.vmem [shape: bf16[8,32], index: 5, kind: input, shape index: {}]   ;;  %s3590_s6 = inlined_call_operand.vmem [shape: f32[1,32], index: 6, kind: input, shape index: {}]   ;;  %s3591_s7 = inlined_call_operand.hbm [shape: bf16[2,8,8,32], index: 7, kind: output, shape index: {}]  }
   0x1   :  { %14 = vsyncpa [#allocation4 + $0x1], 0  ;;  %s2901_s24 = smov 0   ;;  %s2903_s25 = smov 0  }
   0x2   :  { %s2905_s26 = smov 0   ;;  %s2907_s27 = smov 0  }
   0x3 LB: > { %s2922_s28 = sadd.s32 4294967295, %s2855_s27   ;;  %s2384_s29 = sadd.s32 4294967294, %s2855_s27   ;;  %s2855_s27 = sphi %s2907_s27, %s3607_s27   ;;  %s2851_s26 = sphi %s2905_s26, %s3606_s26   ;;  %s2847_s25 = sphi %s2903_s25, %s3605_s25   ;;  %s2843_s24 = sphi %s2901_s24, %s3604_s24  }
   0x4   : > { %s2926_s30 = sadd.s32 1, %s2855_s27   ;;  %s179_s8 = sadd.s32 1, %s2851_s26 }
   0x5   : > { %s176_s9 = ssub.s32 %s2855_s27, %s2926_s30  ;;  %p189_p0 = scmp.ne.s32.totalorder %s2851_s26, %s2847_s25 }
   0x6   : > { %p177_p1 = scmp.eq.s32.totalorder %s176_s9, 0  ;;  %p190_p2 = scmp.eq.s32.totalorder %s2922_s28, 1 }
   0x7   : > { %p195_p3 = scmp.ne.s32.totalorder %s2847_s25, %s2843_s24  ;;  %p196_p4 = scmp.eq.s32.totalorder %s2384_s29, 1 }
   0x8   : > { %s2937_s10 = scalar_select %p177_p1, %s2851_s26, %s179_s8  }
   0x9   : > { %p2939_p5 = por %p190_p2, %p189_p0  ;;  %p2943_p6 = por %p196_p4, %p195_p3 }
   0xa   : > { %p2387_p7 = scmp.ge.s32.totalorder %s2855_s27, 1  ;;  %p240_p8 = scmp.lt.s32.totalorder %s2855_s27, 3 }
   0xc   : > { %p241_p9 = pnand %p2387_p7, %p240_p8 }
   0xd   : > { %p272_p10 = scmp.lt.s32.totalorder (!%p241_p9), %s2922_s28, 1  ;;  %s269_s22 = sand.u32 (!%p241_p9), 1, %s2847_s25  }
   0xe   : > { %244 = sbr.rel (%p241_p9) target bundleno = 767 (0x2ff), region = 48  ;;  %s2388_s23 = sshll.u32 (!%p241_p9), %s269_s22, 5 }
   0xf   : > { %s3515_s29 = scalar_lea.vmem (!%p241_p9), [#allocation3], %s2388_s23  ;;  %s2858_s16 = smov (!%p241_p9), [#allocation3]  }
  0x10   : > { %s2322_s8 = sshll.u32 (!%p241_p9), %s3515_s29, 4  ;;  %s3536_s8 = int_to_ptr.vmem [resolvable:$true] %s2322_s8 }
  0x11   : > { %s2795_s15 = scalar_lea.vmem (!%p241_p9), %s3536_s8, 512 }
  0x12   : > { %p2796_p11 = scmp.ne.s32.totalorder (!%p241_p9), %s3536_s8, %s2795_s15 }
  0x13   : > { %v2777_v0 = vld [vmem:[%s3585_s1 + $0x8] sm:$0xff]   ;;  %v2778_v1 = vld [vmem:[%s3585_s1] sm:$0xff]   ;;  %s273_s17 = scalar_select %p272_p10, %s2922_s28, 1  ;;  %vm329_vm0 = vcmask 261120   ;;  %vm417_vm1 = vcmask 57344   ;;  %vm415_vm4 = vcmask 60416  }
  0x14   : > { %2610 = vmatprep.subr.bf16.mxu0 %v2777_v0  ;;  %vm423_vm2 = vsmask.f32 256  ;;  %vm455_vm3 = vsmask.f32 7938  ;;  %v434_v7 = vld [vmem:[#allocation2 + $0x18] sm:$0x1]  ;;  %p2797_p12 = pnand %p2796_p11, %p2939_p5 }
  0x15   : > { %2611 = vmatpush3.bf16.msra.mxu0 %v2777_v0  ;;  %s2525_s18 = sshll.u32 %s273_s17, 5  ;;  %vm2966_vm5 = vmand %vm417_vm1, %vm423_vm2  ;;  %v466_v8 = vld [vmem:[#allocation2 + $0x1c] sm:$0x1]  ;;  %v2857_v9 = vmov 0   ;;  %v428_v13 = vld [vmem:[#allocation2 + $0x8] sm:$0x1] }
  0x16   : > { %2612 = vmatprep.subr.bf16.mxu0 %v2778_v1  ;;  %s2960_s21 = scalar_lea.vmem %s3584_s0, %s2525_s18  ;;  %416 = vst.msk [vmem:[#allocation2] sm:$0xf] %vm415_vm4, %v2857_v9  ;;  %420 = vst.msk [vmem:[#allocation2 + $0x48] sm:$0xf] %vm415_vm4, %v2857_v9  ;;  %v435_v10 = vsel %vm2966_vm5, 0, %v434_v7  ;;  %v429_v15 = vsel %vm2966_vm5, 0, %v428_v13  ;;  %p2798_p13 = pneg %p2797_p12 }
  0x17   : > { %v2779_v2 = vld [vmem:[%s2960_s21] sm:$0xff]   ;;  %v2780_v3 = vld [vmem:[%s2960_s21 + $0x8] sm:$0xff]   ;;  %v2781_v4 = vld [vmem:[%s2960_s21 + $0x10] sm:$0xff]   ;;  %418 = vst.msk [vmem:[#allocation2 + $0x4] sm:$0x1] %vm417_vm1, %v2857_v9  ;;  %vm801_vm8 = vcmask 1043456  }
  0x18   : > { %2614 = vmatprep.mubr.msk.bf16.mxu0 %vm329_vm0, %v2779_v2  ;;  %v2782_v5 = vld [vmem:[%s2960_s21 + $0x18] sm:$0xff]   ;;  %421 = vst.msk [vmem:[#allocation2 + $0x4c] sm:$0x1] %vm417_vm1, %v2857_v9  ;;  %vm2975_vm6 = vmand %vm417_vm1, %vm455_vm3  ;;  %v460_v14 = vld [vmem:[#allocation2 + $0xc] sm:$0x1]  ;;  %vm994_vm11 = vcmask 1042432  }
  0x19   : > { %2613 = vmatpush3.bf16.msra.mxu0 %v2778_v1  ;;  %436 = vst [vmem:[#allocation2 + $0x18] sm:$0x1] %v435_v10  ;;  %v467_v12 = vsel %vm2975_vm6, 0, %v466_v8  ;;  %v461_v16 = vsel %vm2975_vm6, 0, %v460_v14  ;;  %430 = vst [vmem:[#allocation2 + $0x8] sm:$0x1] %v429_v15 }
  0x1a   : > { %468 = vst [vmem:[#allocation2 + $0x1c] sm:$0x1] %v467_v12  ;;  %462 = vst [vmem:[#allocation2 + $0xc] sm:$0x1] %v461_v16  ;;  %v437_v17 = vld [vmem:[#allocation2 + $0x20] sm:$0x1] }
  0x1b   : > { %v469_v18 = vld [vmem:[#allocation2 + $0x24] sm:$0x1]  ;;  %v438_v19 = vsel %vm2966_vm5, 0, %v437_v17  ;;  %v431_v21 = vld [vmem:[#allocation2 + $0x10] sm:$0x1]  ;;  %vm2997_vm7 = vmand %vm415_vm4, %vm455_vm3  ;;  %vm995_vm12 = vcmask 1046532  }
  0x1c   : > { %2615 = vmatmul.mubr.msk.bf16.vlgmr.msra.gmra.mxu0 %vm329_vm0, %v2780_v3  ;;  %v470_v20 = vsel %vm2975_vm6, 0, %v469_v18  ;;  %439 = vst [vmem:[#allocation2 + $0x20] sm:$0x1] %v438_v19  ;;  %v463_v22 = vld [vmem:[#allocation2 + $0x14] sm:$0x1]  ;;  %v432_v31 = vsel %vm2966_vm5, 0, %v431_v21  ;;  %vm3070_vm14 = vmor %vm994_vm11, %vm995_vm12 }
  0x1d   : > { %2618 = vmatprep.mubr.msk.bf16.mxu0 %vm329_vm0, %v2781_v4  ;;  %471 = vst [vmem:[#allocation2 + $0x24] sm:$0x1] %v470_v20  ;;  %v425_v23 = vld [vmem:[#allocation2] sm:$0x1]  ;;  %v452_v24 = vld [vmem:[#allocation2 + $0x48] sm:$0x1] }
  0x1e   : > { %v457_v25 = vld [vmem:[#allocation2 + $0x4] sm:$0x1]  ;;  %v426_v26 = vsel %vm2966_vm5, 0, %v425_v23  ;;  %v453_v27 = vsel %vm2966_vm5, 0, %v452_v24  ;;  %433 = vst [vmem:[#allocation2 + $0x10] sm:$0x1] %v432_v31 }
  0x1f   : > { %v458_v28 = vsel %vm2975_vm6, 0, %v457_v25  ;;  %v484_v29 = vld [vmem:[#allocation2 + $0x4c] sm:$0x1]  ;;  %427 = vst [vmem:[#allocation2] sm:$0x1] %v426_v26  ;;  %v464_v33 = vsel %vm2975_vm6, 0, %v463_v22 }
  0x20   : > { %454 = vst [vmem:[#allocation2 + $0x48] sm:$0x1] %v453_v27  ;;  %459 = vst [vmem:[#allocation2 + $0x4] sm:$0x1] %v458_v28  ;;  %v485_v32 = vsel %vm2975_vm6, 0, %v484_v29  ;;  %vm788_vm15 = vcmask 64512  }
  0x21   : > { %486 = vst [vmem:[#allocation2 + $0x4c] sm:$0x1] %v485_v32  ;;  %465 = vst [vmem:[#allocation2 + $0x14] sm:$0x1] %v464_v33  ;;  %v446_v34 = vld [vmem:[#allocation2 + $0x38] sm:$0x1] }
  0x22   : > { %v447_v35 = vsel %vm2966_vm5, 0, %v446_v34  ;;  %v478_v36 = vld [vmem:[#allocation2 + $0x3c] sm:$0x1]  ;;  %v440_v37 = vld [vmem:[#allocation2 + $0x28] sm:$0x1]  ;;  %s2799_s17 = sshll.u32 %s2858_s16, 4  ;;  %s2800_s17 = int_to_ptr.vmem [resolvable:$false] %s2799_s17 }
  0x23   : > { %448 = vst [vmem:[#allocation2 + $0x38] sm:$0x1] %v447_v35  ;;  %v479_v38 = vsel %vm2975_vm6, 0, %v478_v36  ;;  %v441_v39 = vsel %vm2966_vm5, 0, %v440_v37  ;;  %v472_v40 = vld [vmem:[#allocation2 + $0x2c] sm:$0x1]  ;;  %p2802_p0 = scmp.lt.s32.totalorder %s3536_s8, %s2800_s17 }
  0x24   : > { %2619 = vmatmul.mubr.msk.bf16.gmra.mxu0 %vm329_vm0, %v2782_v5  ;;  %480 = vst [vmem:[#allocation2 + $0x3c] sm:$0x1] %v479_v38  ;;  %442 = vst [vmem:[#allocation2 + $0x28] sm:$0x1] %v441_v39  ;;  %v473_v41 = vsel %vm2975_vm6, 0, %v472_v40  ;;  %vm2299_vm0 = vcmask 257024  }
  0x25   : > { %v449_v42 = vld [vmem:[#allocation2 + $0x40] sm:$0x1]  ;;  %474 = vst [vmem:[#allocation2 + $0x2c] sm:$0x1] %v473_v41  ;;  %v481_v44 = vld [vmem:[#allocation2 + $0x44] sm:$0x1] }
  0x26   : > { %v450_v43 = vsel %vm2966_vm5, 0, %v449_v42  ;;  %v482_v45 = vsel %vm2975_vm6, 0, %v481_v44  ;;  %v443_v46 = vld [vmem:[#allocation2 + $0x30] sm:$0x1]  ;;  %v475_v47 = vld [vmem:[#allocation2 + $0x34] sm:$0x1] }
  0x27   : > { %451 = vst [vmem:[#allocation2 + $0x40] sm:$0x1] %v450_v43  ;;  %483 = vst [vmem:[#allocation2 + $0x44] sm:$0x1] %v482_v45  ;;  %v444_v48 = vsel %vm2966_vm5, 0, %v443_v46  ;;  %v476_v49 = vsel %vm2975_vm6, 0, %v475_v47 }
  0x28   : > { %445 = vst [vmem:[#allocation2 + $0x30] sm:$0x1] %v444_v48  ;;  %477 = vst [vmem:[#allocation2 + $0x34] sm:$0x1] %v476_v49  ;;  %v2410_v50 = vld [vmem:[%s3587_s3 + $0x4] sm:$0xf] }
  0x29   : > { %2724 = vmatprep.subr.msk.bf16.mxu0 %vm801_vm8, %v2410_v50  ;;  %v803_v51 = vsel %vm801_vm8, %v2410_v50, 0  ;;  %2725 = vmatprep.subr.msk.bf16.mxu1 %vm801_vm8, %v2410_v50  ;;  %v3032_v52 = vld [vmem:[%s3587_s3 + $0x8] sm:$0xf]  ;;  %v3037_v53 = vld [vmem:[%s3587_s3] sm:$0xf]  ;;  %s2801_s18 = scalar_lea.vmem %s2800_s17, 1024 }
  0x2a   : > { %2623 = vmatpush3.bf16.msra.mxu0 %v803_v51  ;;  %2723 = vmatpush3.bf16.msra.mxu1 %v803_v51  ;;  %v3043_v54 = vld [vmem:[#allocation2] sm:$0xf]  ;;  %v651_v60 = vld [vmem:[#allocation2 + $0x4] sm:$0x1]  ;;  %vm659_vm9 = vsmask.f32 3328  ;;  %p2803_p1 = scmp.lt.s32.totalorder %s2801_s18, %s2795_s15 }
  0x2b   : > { %2727 = vmatprep.subr.msk.bf16.mxu0 %vm801_vm8, %v3032_v52  ;;  %2726 = vmatprep.subr.msk.bf16.mxu1 %vm801_vm8, %v3037_v53  ;;  %v663_v55 = vshrl.u32 %v3043_v54, 16  ;;  %v666_v56 = vshll.u32 %v3043_v54, 16  ;;  %v3050_v59 = vld [vmem:[%s3586_s2] ss:$0 sm:$0xff]  ;;  %v672_v63 = vshll.u32 %v651_v60, 16  ;;  %v999_v14 = vrot.slane %v651_v60, 5 }
  0x2c   : > { %v970_v4 = vld [vmem:[#allocation2] sm:$0xe]  ;;  %vm660_vm10 = vsmask.f32 7440  ;;  %v606_v27 = vld [vmem:[#allocation2 + $0x18] sm:$0xf]  ;;  %p2804_p2 = por %p2803_p1, %p2802_p0 }
  0x2d   : > { %v665_v57 = vrot.slane %v663_v55, 4  ;;  %v668_v58 = vrot.slane %v666_v56, 5  ;;  %v3056_v8 = vrot.slane %v672_v63, 5  ;;  %v2427_v13 = vrot.slane %v970_v4, 9  ;;  %vm3060_vm13 = vmor %vm659_vm9, %vm660_vm10  ;;  %v609_v28 = vld [vmem:[#allocation2 + $0x1c] sm:$0x1] }
  0x2e   : > { %v594_v39 = vld [vmem:[#allocation2 + $0x8] sm:$0xf]  ;;  %v597_v40 = vld [vmem:[#allocation2 + $0xc] sm:$0x1]  ;;  %p2805_p3 = pnand %p2804_p2, %p2798_p13 }
  0x2f   : > { %v669_v62 = vor.u32 %v668_v58, %v665_v57  ;;  %v3077_v34 = vsel %vm3070_vm14, %v2427_v13, %v999_v14  ;;  %v3092_v13 = vsel %vm801_vm8, %v3032_v52, 0 }
  0x31   : > { %v3054_v7 = vrot.slane %v669_v62, 4  ;;  %v615_v62 = vld [vmem:[#allocation2 + $0x24] sm:$0x1] }
  0x33   : > { %v675_v21 = vsel %vm3060_vm13, %v3054_v7, %v3056_v8 }
  0xdc   : > { %v2616_v61 = vpop.f32.mrf.mxu0 }
  0xdd   : > { %v385_v0 = vadd.f32 %v2616_v61, %v3050_v59  ;;  %v612_v61 = vld [vmem:[#allocation2 + $0x20] sm:$0xf] }
  0xde   : > { %v376_v1 = vpop.f32.mrf.mxu0 }
  0xdf   : > { %v409_v2 = vmax.f32 %v385_v0, 0.0  ;;  %v377_v3 = vadd.f32 %v3050_v59, %v376_v1 }
  0xe0   : > { %v2617_v5 = vpop.f32.mrf.mxu0 }
  0xe1   : > { %v2528_v9 = vpack.c.bf16 %v409_v2, %v409_v2  ;;  %v407_v10 = vmax.f32 %v377_v3, 0.0  ;;  %v388_v11 = vadd.f32 %v2617_v5, %v3050_v59  ;;  %v600_v5 = vld [vmem:[#allocation2 + $0x10] sm:$0xf] }
  0xe2   : > { %v379_v12 = vpop.f32.mrf.mxu0 }
  0xe3   : > { %v528_v15 = vshrl.u32 %v2528_v9, 16  ;;  %v2526_v16 = vpack.c.bf16 %v407_v10, %v407_v10  ;;  %v410_v17 = vmax.f32 %v388_v11, 0.0  ;;  %v380_v19 = vadd.f32 %v3050_v59, %v379_v12 }
  0xe4   : > { %v2620_v20 = vpop.f32.mrf.mxu0  ;;  %v531_v23 = vshll.u32 %v2528_v9, 16  ;;  %v603_v9 = vld [vmem:[#allocation2 + $0x14] sm:$0x1] }
  0xe5   : > { %v530_v22 = vrot.slane %v528_v15, 7  ;;  %v512_v24 = vshrl.u32 %v2526_v16, 16  ;;  %v2529_v25 = vpack.c.bf16 %v410_v17, %v410_v17  ;;  %v515_v29 = vshll.u32 %v2526_v16, 16 }
  0xe6   : > { %v408_v31 = vmax.f32 %v380_v19, 0.0  ;;  %v401_v32 = vadd.f32 %v2620_v20, %v3050_v59  ;;  %v392_v33 = vpop.f32.mrf.mxu0 }
  0xe7   : > { %v533_v35 = vor.u32 %v531_v23, %v530_v22  ;;  %v534_v36 = vrot.slane %v530_v22, 4  ;;  %v514_v37 = vrot.slane %v512_v24, 7  ;;  %v536_v38 = vshrl.u32 %v2529_v25, 16  ;;  %v630_v22 = vld [vmem:[#allocation2 + $0x38] sm:$0xf] }
  0xe8   : > { %v539_v41 = vshll.u32 %v2529_v25, 16  ;;  %v2527_v42 = vpack.c.bf16 %v408_v31, %v408_v31  ;;  %v413_v43 = vmax.f32 %v401_v32, 0.0  ;;  %v393_v44 = vadd.f32 %v3050_v59, %v392_v33  ;;  %v2621_v45 = vpop.f32.mrf.mxu0  ;;  %v633_v25 = vld [vmem:[#allocation2 + $0x3c] sm:$0x1] }
  0xe9   : > { %v607_v46 = vsel %vm2997_vm7, %v533_v35, %v606_v27  ;;  %v610_v47 = vsel %vm2966_vm5, %v534_v36, %v609_v28  ;;  %v517_v48 = vor.u32 %v515_v29, %v514_v37  ;;  %v518_v49 = vrot.slane %v514_v37, 4  ;;  %v618_v28 = vld [vmem:[#allocation2 + $0x28] sm:$0xf]  ;;  %v621_v37 = vld [vmem:[#allocation2 + $0x2c] sm:$0x1] }
  0xea   : > { %608 = vst [vmem:[#allocation2 + $0x18] sm:$0xf] %v607_v46  ;;  %611 = vst [vmem:[#allocation2 + $0x1c] sm:$0x1] %v610_v47  ;;  %v538_v50 = vrot.slane %v536_v38, 7  ;;  %v520_v51 = vshrl.u32 %v2527_v42, 16  ;;  %v2532_v56 = vpack.c.bf16 %v413_v43, %v413_v43  ;;  %v395_v57 = vpop.f32.mrf.mxu0  ;;  %v404_v0 = vadd.f32 %v2621_v45, %v3050_v59 }
  0xeb   : > { %v523_v55 = vshll.u32 %v2527_v42, 16  ;;  %v595_v58 = vsel %vm2997_vm7, %v517_v48, %v594_v39  ;;  %v598_v60 = vsel %vm2966_vm5, %v518_v49, %v597_v40  ;;  %v411_v63 = vmax.f32 %v393_v44, 0.0  ;;  %v636_v49 = vld [vmem:[#allocation2 + $0x40] sm:$0xf] }
  0xec   : > { %596 = vst [vmem:[#allocation2 + $0x8] sm:$0xf] %v595_v58  ;;  %599 = vst [vmem:[#allocation2 + $0xc] sm:$0x1] %v598_v60  ;;  %v541_v1 = vor.u32 %v539_v41, %v538_v50  ;;  %v542_v2 = vrot.slane %v538_v50, 4  ;;  %v522_v3 = vrot.slane %v520_v51, 7  ;;  %v396_v12 = vadd.f32 %v3050_v59, %v395_v57 }
  0xed   : > { %v560_v4 = vshrl.u32 %v2532_v56, 16  ;;  %v2530_v10 = vpack.c.bf16 %v411_v63, %v411_v63  ;;  %v414_v11 = vmax.f32 %v404_v0, 0.0  ;;  %v563_v20 = vshll.u32 %v2532_v56, 16  ;;  %v639_v58 = vld [vmem:[#allocation2 + $0x44] sm:$0x1] }
  0xee   : > { %v613_v14 = vsel %vm2997_vm7, %v541_v1, %v612_v61  ;;  %v616_v15 = vsel %vm2966_vm5, %v542_v2, %v615_v62  ;;  %v525_v16 = vor.u32 %v523_v55, %v522_v3  ;;  %v526_v17 = vrot.slane %v522_v3, 4  ;;  %v624_v60 = vld [vmem:[#allocation2 + $0x30] sm:$0xf]  ;;  %v627_v2 = vld [vmem:[#allocation2 + $0x34] sm:$0x1] }
  0xef   : > { %614 = vst [vmem:[#allocation2 + $0x20] sm:$0xf] %v613_v14  ;;  %617 = vst [vmem:[#allocation2 + $0x24] sm:$0x1] %v616_v15  ;;  %v562_v19 = vrot.slane %v560_v4, 7  ;;  %v544_v23 = vshrl.u32 %v2530_v10, 16  ;;  %v2533_v24 = vpack.c.bf16 %v414_v11, %v414_v11 }
  0xf0   : > { %v601_v59 = vsel %vm2997_vm7, %v525_v16, %v600_v5  ;;  %v604_v52 = vsel %vm2966_vm5, %v526_v17, %v603_v9  ;;  %v547_v27 = vshll.u32 %v2530_v10, 16  ;;  %v412_v29 = vmax.f32 %v396_v12, 0.0  ;;  %v3130_v12 = vld [vmem:[%s3587_s3 + $0x10] sm:$0xf] }
  0xf1   : > { %602 = vst [vmem:[#allocation2 + $0x10] sm:$0xf] %v601_v59  ;;  %605 = vst [vmem:[#allocation2 + $0x14] sm:$0x1] %v604_v52  ;;  %v565_v31 = vor.u32 %v563_v20, %v562_v19  ;;  %v566_v32 = vrot.slane %v562_v19, 4  ;;  %v546_v33 = vrot.slane %v544_v23, 7 }
  0xf2   : > { %v568_v35 = vshrl.u32 %v2533_v24, 16  ;;  %v3102_v36 = vld [vmem:[#allocation2 + $0x18] sm:$0xf]  ;;  %v571_v38 = vshll.u32 %v2533_v24, 16  ;;  %v2531_v39 = vpack.c.bf16 %v412_v29, %v412_v29  ;;  %v3121_v5 = vld [vmem:[#allocation2 + $0x1c] sm:$0x1] }
  0xf3   : > { %v705_v40 = vshrl.u32 %v3102_v36, 16  ;;  %v708_v41 = vshll.u32 %v3102_v36, 16  ;;  %v631_v42 = vsel %vm2997_vm7, %v565_v31, %v630_v22  ;;  %v634_v43 = vsel %vm2966_vm5, %v566_v32, %v633_v25  ;;  %v3110_v46 = vld [vmem:[#allocation2 + $0x8] sm:$0xf]  ;;  %v3112_v47 = vld [vmem:[#allocation2 + $0xc] sm:$0x1] }
  0xf4   : > { %v549_v44 = vor.u32 %v547_v27, %v546_v33  ;;  %v550_v45 = vrot.slane %v546_v33, 4  ;;  %632 = vst [vmem:[#allocation2 + $0x38] sm:$0xf] %v631_v42  ;;  %635 = vst [vmem:[#allocation2 + $0x3c] sm:$0x1] %v634_v43  ;;  %v570_v48 = vrot.slane %v568_v35, 7 }
  0xf5   : > { %v552_v50 = vshrl.u32 %v2531_v39, 16  ;;  %v555_v51 = vshll.u32 %v2531_v39, 16  ;;  %v677_v55 = vshrl.u32 %v3110_v46, 16  ;;  %v680_v61 = vshll.u32 %v3110_v46, 16  ;;  %v971_v59 = vld [vmem:[#allocation2 + $0x8] sm:$0xe] }
  0xf6   : > { %v619_v56 = vsel %vm2997_vm7, %v549_v44, %v618_v28  ;;  %v622_v57 = vsel %vm2966_vm5, %v550_v45, %v621_v37  ;;  %v686_v62 = vshll.u32 %v3112_v47, 16  ;;  %v573_v63 = vor.u32 %v571_v38, %v570_v48  ;;  %v3147_v29 = vld [vmem:[#allocation2 + $0x20] sm:$0xf]  ;;  %v3150_v37 = vld [vmem:[#allocation2 + $0x24] sm:$0x1] }
  0xf7   : > { %620 = vst [vmem:[#allocation2 + $0x28] sm:$0xf] %v619_v56  ;;  %623 = vst [vmem:[#allocation2 + $0x2c] sm:$0x1] %v622_v57  ;;  %v574_v0 = vrot.slane %v570_v48, 4  ;;  %v554_v1 = vrot.slane %v552_v50, 7 }
  0xf8   : > { %v679_v3 = vrot.slane %v677_v55, 4  ;;  %v682_v4 = vrot.slane %v680_v61, 5  ;;  %v707_v9 = vrot.slane %v705_v40, 4  ;;  %v710_v10 = vrot.slane %v708_v41, 5  ;;  %v3136_v19 = vld [vmem:[#allocation2 + $0x10] sm:$0xf] }
  0xf9   : > { %v3125_v11 = vsel %vm801_vm8, %v3037_v53, 0  ;;  %v637_v14 = vsel %vm2997_vm7, %v573_v63, %v636_v49  ;;  %v640_v15 = vsel %vm2966_vm5, %v574_v0, %v639_v58  ;;  %v557_v16 = vor.u32 %v555_v51, %v554_v1  ;;  %v3138_v20 = vld [vmem:[#allocation2 + $0x14] sm:$0x1] }
  0xfa   : > { %v558_v17 = vrot.slane %v554_v1, 4  ;;  %638 = vst [vmem:[#allocation2 + $0x40] sm:$0xf] %v637_v14  ;;  %641 = vst [vmem:[#allocation2 + $0x44] sm:$0x1] %v640_v15  ;;  %v683_v53 = vor.u32 %v682_v4, %v679_v3  ;;  %v688_v22 = vrot.slane %v686_v62, 5  ;;  %v711_v27 = vor.u32 %v710_v10, %v707_v9 }
  0xfb   : > { %v691_v23 = vshrl.u32 %v3136_v19, 16  ;;  %v694_v24 = vshll.u32 %v3136_v19, 16  ;;  %v625_v52 = vsel %vm2997_vm7, %v557_v16, %v624_v60  ;;  %v714_v28 = vshll.u32 %v3121_v5, 16  ;;  %v3179_v60 = vld [vmem:[#allocation2 + $0x38] sm:$0xf] }
  0xfc   : > { %v628_v25 = vsel %vm2966_vm5, %v558_v17, %v627_v2  ;;  %626 = vst [vmem:[#allocation2 + $0x30] sm:$0xf] %v625_v52  ;;  %v684_v31 = vrot.slane %v683_v53, 4  ;;  %v700_v35 = vshll.u32 %v3138_v20, 16  ;;  %v712_v38 = vrot.slane %v711_v27, 4 }
  0xfd   : > { %629 = vst [vmem:[#allocation2 + $0x34] sm:$0x1] %v628_v25  ;;  %v693_v32 = vrot.slane %v691_v23, 4  ;;  %v696_v33 = vrot.slane %v694_v24, 5  ;;  %v2428_v30 = vrot.slane %v971_v59, 9  ;;  %v1003_v39 = vrot.slane %v3112_v47, 5 }
  0xfe   : > { %v3155_v6 = vsel %vm801_vm8, %v3130_v12, 0  ;;  %v689_v40 = vsel %vm3060_vm13, %v684_v31, %v688_v22  ;;  %v3159_v42 = vld [vmem:[#allocation2 + $0x28] sm:$0xf]  ;;  %v719_v43 = vshrl.u32 %v3147_v29, 16  ;;  %v722_v44 = vshll.u32 %v3147_v29, 16 }
  0xff   : > { %v697_v41 = vor.u32 %v696_v33, %v693_v32  ;;  %v2411_v45 = vcombine.low %v675_v21, %v689_v40  ;;  %v716_v47 = vrot.slane %v714_v28, 5  ;;  %v1004_v48 = vsel %vm3070_vm14, %v2428_v30, %v1003_v39  ;;  %v3170_v49 = vld [vmem:[#allocation2 + $0x2c] sm:$0x1]  ;;  %v3184_v1 = vld [vmem:[#allocation2 + $0x3c] sm:$0x1] }
 0x100   : > { %v728_v50 = vshll.u32 %v3150_v37, 16  ;;  %v702_v55 = vrot.slane %v700_v35, 5  ;;  %v721_v56 = vrot.slane %v719_v43, 4  ;;  %v724_v57 = vrot.slane %v722_v44, 5  ;;  %v973_v10 = vld [vmem:[#allocation2 + $0x18] sm:$0xe] }
 0x101   : > { %v698_v51 = vrot.slane %v697_v41, 4  ;;  %2624 = vmatprep.mubr.msk.bf16.mxu0 %vm788_vm15, %v2411_v45  ;;  %v717_v58 = vsel %vm3060_vm13, %v712_v38, %v716_v47  ;;  %v2436_v7 = vcombine.low %v3077_v34, %v1004_v48  ;;  %v733_v8 = vshrl.u32 %v3159_v42, 16  ;;  %v972_v52 = vld [vmem:[#allocation2 + $0x10] sm:$0xe]  ;;  %v974_v32 = vld [vmem:[#allocation2 + $0x20] sm:$0xe] }
 0x102   : > { %v736_v21 = vshll.u32 %v3159_v42, 16  ;;  %v725_v62 = vor.u32 %v724_v57, %v721_v56  ;;  %v730_v63 = vrot.slane %v728_v50, 5  ;;  %v742_v0 = vshll.u32 %v3170_v49, 16  ;;  %v975_v30 = vld [vmem:[#allocation2 + $0x28] sm:$0xe] }
 0x103   : > { %v703_v61 = vsel %vm3060_vm13, %v698_v51, %v702_v55  ;;  %v735_v3 = vrot.slane %v733_v8, 4  ;;  %v1015_v34 = vrot.slane %v3150_v37, 5  ;;  %v3187_v9 = vld [vmem:[#allocation2 + $0x30] sm:$0xf]  ;;  %v761_v53 = vshrl.u32 %v3179_v60, 16 }
 0x104   : > { %v2412_v2 = vcombine.low %v703_v61, %v717_v58  ;;  %v738_v4 = vrot.slane %v736_v21, 5  ;;  %v726_v14 = vrot.slane %v725_v62, 4  ;;  %v3189_v15 = vld [vmem:[#allocation2 + $0x34] sm:$0x1]  ;;  %v747_v16 = vshrl.u32 %v3187_v9, 16 }
 0x105   : > { %v750_v17 = vshll.u32 %v3187_v9, 16  ;;  %v1019_v23 = vrot.slane %v3170_v49, 5  ;;  %v756_v24 = vshll.u32 %v3189_v15, 16  ;;  %v764_v59 = vshll.u32 %v3179_v60, 16  ;;  %v976_v48 = vld [vmem:[#allocation2 + $0x30] sm:$0xe] }
 0x106   : > { %2625 = vmatmul.mubr.msk.bf16.vlgmr.msra.gmra.mxu0 %vm788_vm15, %v2412_v2  ;;  %v739_v22 = vor.u32 %v738_v4, %v735_v3  ;;  %v744_v25 = vrot.slane %v742_v0, 5  ;;  %v749_v27 = vrot.slane %v747_v16, 4  ;;  %v763_v31 = vrot.slane %v761_v53, 4  ;;  %v1249_v8 = vld [vmem:[#allocation2 + $0x8] sm:$0xf] }
 0x107   : > { %2644 = vmatprep.mubr.msk.bf16.mxu0 %vm788_vm15, %v2436_v7  ;;  %2643 = vmatpush3.bf16.msra.mxu0 %v3092_v13  ;;  %v752_v28 = vrot.slane %v750_v17, 5  ;;  %v731_v33 = vsel %vm3060_vm13, %v726_v14, %v730_v63  ;;  %v766_v37 = vrot.slane %v764_v59, 5  ;;  %v770_v38 = vshll.u32 %v3184_v1, 16  ;;  %v3226_v4 = vld [vmem:[#allocation2 + $0xc] sm:$0x1] }
 0x108   : > { %v740_v35 = vrot.slane %v739_v22, 4  ;;  %2729 = vmatprep.subr.msk.bf16.mxu0 %vm801_vm8, %v3130_v12  ;;  %v2429_v40 = vrot.slane %v972_v52, 9  ;;  %v1007_v41 = vrot.slane %v3138_v20, 5  ;;  %v2430_v13 = vrot.slane %v973_v10, 9  ;;  %v2444_v12 = vld [vmem:[%s3587_s3 + $0xc] sm:$0xf] }
 0x109   : > { %v753_v39 = vor.u32 %v752_v28, %v749_v27  ;;  %v758_v44 = vrot.slane %v756_v24, 5  ;;  %v767_v45 = vor.u32 %v766_v37, %v763_v31  ;;  %v1011_v47 = vrot.slane %v3121_v5, 5  ;;  %v977_v20 = vld [vmem:[#allocation2 + $0x38] sm:$0xe]  ;;  %v1251_v10 = vld [vmem:[#allocation2 + $0x10] sm:$0xf] }
 0x10a   : > { %v745_v43 = vsel %vm3060_vm13, %v740_v35, %v744_v25  ;;  %v1008_v51 = vsel %vm3070_vm14, %v2429_v40, %v1007_v41  ;;  %v2431_v55 = vrot.slane %v974_v32, 9  ;;  %v772_v57 = vrot.slane %v770_v38, 5  ;;  %v3231_v14 = vld [vmem:[%s3587_s3 + $0x18] sm:$0xf]  ;;  %v3236_v22 = vld [vmem:[#allocation2 + $0x14] sm:$0x1] }
 0x10b   : > { %v2413_v49 = vcombine.low %v731_v33, %v745_v43  ;;  %v754_v50 = vrot.slane %v753_v39, 4  ;;  %v768_v56 = vrot.slane %v767_v45, 4  ;;  %v1012_v58 = vsel %vm3070_vm14, %v2430_v13, %v1011_v47  ;;  %v3243_v25 = vld [vmem:[#allocation2 + $0x1c] sm:$0x1]  ;;  %v1255_v27 = vld [vmem:[#allocation2 + $0x20] sm:$0xf] }
 0x10c   : > { %v2432_v7 = vrot.slane %v975_v30, 9  ;;  %v2437_v21 = vcombine.low %v1008_v51, %v1012_v58  ;;  %v1016_v61 = vsel %vm3070_vm14, %v2431_v55, %v1015_v34  ;;  %v2433_v62 = vrot.slane %v976_v48, 9  ;;  %v3258_v38 = vld [vmem:[#allocation2 + $0x24] sm:$0x1] }
 0x10d   : > { %2628 = vmatprep.mubr.msk.bf16.mxu1 %vm788_vm15, %v2413_v49  ;;  %v759_v5 = vsel %vm3060_vm13, %v754_v50, %v758_v44  ;;  %v773_v63 = vsel %vm3060_vm13, %v768_v56, %v772_v57  ;;  %v1023_v2 = vrot.slane %v3189_v15, 5  ;;  %v2434_v3 = vrot.slane %v977_v20, 9  ;;  %v1253_v15 = vld [vmem:[#allocation2 + $0x18] sm:$0xf]  ;;  %v1259_v49 = vld [vmem:[#allocation2 + $0x30] sm:$0xf] }
 0x10e   : > { %v1020_v0 = vsel %vm3070_vm14, %v2432_v7, %v1019_v23  ;;  %v2414_v16 = vcombine.low %v759_v5, %v773_v63  ;;  %2645 = vmatmul.mubr.msk.bf16.vlgmr.msra.gmra.mxu0 %vm788_vm15, %v2437_v21  ;;  %v1027_v17 = vrot.slane %v3184_v1, 5  ;;  %v1174_v53 = vsel %vm801_vm8, %v2444_v12, 0  ;;  %v2470_v50 = vld [vmem:[%s3587_s3 + $0x14] sm:$0xf]  ;;  %v3268_v56 = vld [vmem:[#allocation2 + $0x2c] sm:$0x1] }
 0x10f   : > { %v2438_v34 = vcombine.low %v1016_v61, %v1020_v0  ;;  %v2419_v23 = vcombine.low %v3043_v54, %v3110_v46  ;;  %v1024_v24 = vsel %vm3070_vm14, %v2433_v62, %v1023_v2  ;;  %v1266_v59 = vshrl.u32 %v1249_v8, 16  ;;  %2663 = vmatpush3.bf16.msra.mxu0 %v3155_v6  ;;  %v1261_v57 = vld [vmem:[#allocation2 + $0x38] sm:$0xf] }
 0x110   : > { %v1269_v52 = vshll.u32 %v1249_v8, 16  ;;  %2629 = vmatmul.mubr.msk.bf16.vlgmr.msra.gmra.mxu1 %vm788_vm15, %v2414_v16  ;;  %v2420_v1 = vcombine.low %v3136_v19, %v3102_v36  ;;  %v1275_v28 = vshll.u32 %v3226_v4, 16  ;;  %v1280_v54 = vshrl.u32 %v1251_v10, 16  ;;  %2731 = vmatprep.subr.msk.bf16.mxu0 %vm801_vm8, %v3231_v14 }
 0x111   : > { %2648 = vmatprep.mubr.msk.bf16.mxu0 %vm788_vm15, %v2438_v34  ;;  %v1283_v46 = vshll.u32 %v1251_v10, 16  ;;  %2633 = vmatpush3.bf16.msra.mxu1 %v3125_v11  ;;  %v1028_v6 = vsel %vm3070_vm14, %v2434_v3, %v1027_v17  ;;  %v1268_v31 = vrot.slane %v1266_v59, 4  ;;  %v1289_v33 = vshll.u32 %v3236_v22, 16  ;;  %v1257_v11 = vld [vmem:[#allocation2 + $0x28] sm:$0xf] }
 0x112   : > { %2634 = vmatprep.mubr.msk.bf16.mxu1 %vm788_vm15, %v2419_v23  ;;  %v1271_v32 = vrot.slane %v1269_v52, 5  ;;  %2728 = vmatprep.subr.msk.bf16.mxu1 %vm801_vm8, %v2444_v12  ;;  %v2439_v35 = vcombine.low %v1024_v24, %v1028_v6  ;;  %v2421_v36 = vcombine.low %v3147_v29, %v3159_v42  ;;  %v1282_v19 = vrot.slane %v1280_v54, 4  ;;  %v3276_v3 = vld [vmem:[#allocation2 + $0x34] sm:$0x1]  ;;  %v3279_v24 = vld [vmem:[#allocation2 + $0x3c] sm:$0x1] }
 0x113   : > { %v1285_v37 = vrot.slane %v1283_v46, 5  ;;  %v1294_v39 = vshrl.u32 %v1253_v15, 16  ;;  %v1297_v40 = vshll.u32 %v1253_v15, 16  ;;  %v1303_v41 = vshll.u32 %v3243_v25, 16 }
 0x114   : > { %v1272_v30 = vor.u32 %v1271_v32, %v1268_v31  ;;  %v1277_v13 = vrot.slane %v1275_v28, 5  ;;  %v1308_v44 = vshrl.u32 %v1255_v27, 16  ;;  %v1311_v45 = vshll.u32 %v1255_v27, 16  ;;  %v1263_v27 = vld [vmem:[#allocation2 + $0x40] sm:$0xf] }
 0x115   : > { %v1286_v43 = vor.u32 %v1285_v37, %v1282_v19  ;;  %v1291_v48 = vrot.slane %v1289_v33, 5  ;;  %v1296_v29 = vrot.slane %v1294_v39, 4  ;;  %v1299_v42 = vrot.slane %v1297_v40, 5  ;;  %v1770_v19 = vld [vmem:[#allocation2 + $0x48] sm:$0xf] }
 0x116   : > { %v1273_v47 = vrot.slane %v1272_v30, 4  ;;  %2649 = vmatmul.mubr.msk.bf16.gmra.mxu0 %vm788_vm15, %v2439_v35  ;;  %v1310_v55 = vrot.slane %v1308_v44, 4  ;;  %v1313_v12 = vrot.slane %v1311_v45, 5  ;;  %v1317_v20 = vshll.u32 %v3258_v38, 16  ;;  %v3295_v30 = vld [vmem:[#allocation2 + $0x44] sm:$0x1] }
 0x117   : > { %v1287_v51 = vrot.slane %v1286_v43, 4  ;;  %v1300_v58 = vor.u32 %v1299_v42, %v1296_v29  ;;  %v1305_v7 = vrot.slane %v1303_v41, 5  ;;  %v1322_v8 = vshrl.u32 %v1257_v11, 16 }
 0x118   : > { %v1325_v5 = vshll.u32 %v1257_v11, 16  ;;  %2635 = vmatmul.mubr.msk.bf16.vlgmr.msra.gmra.mxu1 %vm788_vm15, %v2420_v1  ;;  %v1278_v21 = vsel %vm3060_vm13, %v1273_v47, %v1277_v13  ;;  %v1314_v62 = vor.u32 %v1313_v12, %v1310_v55  ;;  %v1336_v63 = vshrl.u32 %v1259_v49, 16  ;;  %v1480_v12 = vld [vmem:[#allocation2 + $0x10] sm:$0xe] }
 0x119   : > { %v1292_v61 = vsel %vm3060_vm13, %v1287_v51, %v1291_v48  ;;  %2653 = vmatpush3.bf16.msra.mxu1 %v1174_v53  ;;  %2638 = vmatprep.mubr.msk.bf16.mxu1 %vm788_vm15, %v2421_v36  ;;  %v1301_v2 = vrot.slane %v1300_v58, 4  ;;  %v1324_v10 = vrot.slane %v1322_v8, 4  ;;  %v1319_v17 = vrot.slane %v1317_v20, 5  ;;  %v2505_v36 = vld [vmem:[%s3587_s3 + $0x20] sm:$0xf] }
 0x11a   : > { %v2454_v0 = vcombine.low %v1278_v21, %v1292_v61  ;;  %v1327_v16 = vrot.slane %v1325_v5, 5  ;;  %v1315_v34 = vrot.slane %v1314_v62, 4  ;;  %v1338_v15 = vrot.slane %v1336_v63, 4  ;;  %2730 = vmatprep.subr.msk.bf16.mxu1 %vm801_vm8, %v2470_v50  ;;  %v3309_v51 = vld [vmem:[#allocation2 + $0x48] sm:$0xe] }
 0x11b   : > { %v1339_v23 = vshll.u32 %v1259_v49, 16  ;;  %v1306_v53 = vsel %vm3060_vm13, %v1301_v2, %v1305_v7  ;;  %v1331_v52 = vshll.u32 %v3268_v56, 16  ;;  %v1350_v1 = vshrl.u32 %v1261_v57, 16  ;;  %v3307_v49 = vld [vmem:[#allocation2 + $0x4c] sm:$0x1] }
 0x11c   : > { %2664 = vmatprep.mubr.msk.bf16.mxu0 %vm788_vm15, %v2454_v0  ;;  %v1328_v59 = vor.u32 %v1327_v16, %v1324_v10  ;;  %v1320_v28 = vsel %vm3060_vm13, %v1315_v34, %v1319_v17  ;;  %v1345_v46 = vshll.u32 %v3276_v3, 16  ;;  %v1353_v6 = vshll.u32 %v1261_v57, 16  ;;  %v1479_v61 = vld [vmem:[#allocation2 + $0x8] sm:$0xe]  ;;  %v1481_v17 = vld [vmem:[#allocation2 + $0x18] sm:$0xe] }
 0x11d   : > { %v1341_v54 = vrot.slane %v1339_v23, 5  ;;  %v2422_v31 = vcombine.low %v3187_v9, %v3179_v60  ;;  %v2455_v32 = vcombine.low %v1306_v53, %v1320_v28  ;;  %v1352_v33 = vrot.slane %v1350_v1, 4  ;;  %v2488_v60 = vld [vmem:[%s3587_s3 + $0x1c] sm:$0xf]  ;;  %v2787_v9 = vld [vmem:[#allocation2 + $0x8] ss:$8 sps:$4 sm:$0xff]  }
 0x11e   : > { %v1681_v35 = vsel %vm801_vm8, %v3231_v14, 0  ;;  %v1329_v37 = vrot.slane %v1328_v59, 4  ;;  %v1355_v39 = vrot.slane %v1353_v6, 5  ;;  %v1364_v40 = vshrl.u32 %v1263_v27, 16  ;;  %v2789_v23 = vld [vmem:[#allocation2 + $0x28] ss:$8 sps:$4 sm:$0xff]  }
 0x11f   : > { %v1342_v11 = vor.u32 %v1341_v54, %v1338_v15  ;;  %2665 = vmatmul.mubr.msk.bf16.vlgmr.msra.gmra.mxu0 %vm788_vm15, %v2455_v32  ;;  %v1333_v41 = vrot.slane %v1331_v52, 5  ;;  %v1359_v14 = vshll.u32 %v3279_v24, 16  ;;  %v1367_v13 = vshll.u32 %v1263_v27, 16  ;;  %v2788_v15 = vld [vmem:[#allocation2 + $0x18] ss:$8 sps:$4 sm:$0xff]  }
 0x120   : > { %v1562_v43 = vsel %vm801_vm8, %v2470_v50, 0  ;;  %2639 = vmatmul.mubr.msk.bf16.gmra.mxu1 %vm788_vm15, %v2422_v31  ;;  %v1347_v45 = vrot.slane %v1345_v46, 5  ;;  %v1356_v47 = vor.u32 %v1355_v39, %v1352_v33  ;;  %v1366_v48 = vrot.slane %v1364_v40, 4  ;;  %2683 = vmatpush3.bf16.msra.mxu0 %v1681_v35  ;;  %v1482_v54 = vld [vmem:[#allocation2 + $0x20] sm:$0xe] }
 0x121   : > { %v1343_v44 = vrot.slane %v1342_v11, 4  ;;  %2654 = vmatprep.mubr.msk.bf16.mxu1 %vm788_vm15, %v2787_v9  ;;  %v1369_v29 = vrot.slane %v1367_v13, 5  ;;  %v1373_v42 = vshll.u32 %v3295_v30, 16  ;;  %2733 = vmatprep.subr.msk.bf16.mxu0 %vm801_vm8, %v2505_v36  ;;  %v1334_v50 = vsel %vm3060_vm13, %v1329_v37, %v1333_v41  ;;  %v1484_v46 = vld [vmem:[#allocation2 + $0x30] sm:$0xe] }
 0x122   : > { %v1871_v20 = vshrl.u32 %v1770_v19, 16  ;;  %v1874_v57 = vshll.u32 %v1770_v19, 16  ;;  %v1357_v7 = vrot.slane %v1356_v47, 4  ;;  %v3316_v5 = vsel %vm801_vm8, %v2488_v60, 0  ;;  %v2790_v6 = vld [vmem:[#allocation2 + $0x10] ss:$8 sps:$4 sm:$0xff]  }
 0x123   : > { %v1348_v55 = vsel %vm3060_vm13, %v1343_v44, %v1347_v45  ;;  %v1370_v8 = vor.u32 %v1369_v29, %v1366_v48  ;;  %v1361_v21 = vrot.slane %v1359_v14, 5  ;;  %v3319_v62 = vsel %vm801_vm8, %v2505_v36, 0  ;;  %v1483_v33 = vld [vmem:[#allocation2 + $0x28] sm:$0xe]  ;;  %v3339_v36 = vld [vmem:[#allocation2 + $0x14] sm:$0x1] }
 0x124   : > { %v2456_v58 = vcombine.low %v1334_v50, %v1348_v55  ;;  %v2504_v63 = vrot.slane %v3309_v51, 9  ;;  %v2040_v0 = vrot.slane %v3307_v49, 5  ;;  %v1375_v10 = vrot.slane %v1373_v42, 5  ;;  %v1986_v19 = vld [vmem:[#allocation2 + $0x10] sm:$0xe] }
 0x125   : > { %v1371_v2 = vrot.slane %v1370_v8, 4  ;;  %v2463_v16 = vrot.slane %v1480_v12, 9  ;;  %v1509_v34 = vrot.slane %v3236_v22, 5  ;;  %v3325_v53 = vrot.slane %v1871_v20, 4  ;;  %v3345_v40 = vld [vmem:[#allocation2 + $0x1c] sm:$0x1] }
 0x126   : > { %2668 = vmatprep.mubr.msk.bf16.mxu0 %vm788_vm15, %v2456_v58  ;;  %v3327_v59 = vrot.slane %v1874_v57, 5  ;;  %v1362_v52 = vsel %vm3060_vm13, %v1357_v7, %v1361_v21  ;;  %v2462_v1 = vrot.slane %v1479_v61, 9  ;;  %v1505_v28 = vrot.slane %v3226_v4, 5  ;;  %v1756_v4 = vld [vmem:[#allocation2 + $0x10] sm:$0xf] }
 0x127   : > { %v1376_v27 = vsel %vm3060_vm13, %v1371_v2, %v1375_v10  ;;  %v2464_v31 = vrot.slane %v1481_v17, 9  ;;  %v1513_v32 = vrot.slane %v3243_v25, 5  ;;  %v1510_v35 = vsel %vm3070_vm14, %v2463_v16, %v1509_v34  ;;  %v1486_v9 = vld [vmem:[#allocation2 + $0x40] sm:$0xe]  ;;  %v1758_v44 = vld [vmem:[#allocation2 + $0x18] sm:$0xf] }
 0x128   : > { %2655 = vmatmul.mubr.msk.bf16.vlgmr.msra.gmra.mxu1 %vm788_vm15, %v2788_v15  ;;  %v2457_v22 = vcombine.low %v1362_v52, %v1376_v27  ;;  %v2465_v37 = vrot.slane %v1482_v54, 9  ;;  %v1517_v11 = vrot.slane %v3258_v38, 5  ;;  %v2467_v39 = vrot.slane %v1484_v46, 9  ;;  %v1485_v47 = vld [vmem:[#allocation2 + $0x38] sm:$0xe] }
 0x129   : > { %2673 = vmatpush3.bf16.msra.mxu1 %v1562_v43  ;;  %2658 = vmatprep.mubr.msk.bf16.mxu1 %vm788_vm15, %v2789_v23  ;;  %v1525_v25 = vrot.slane %v3276_v3, 5  ;;  %v1506_v41 = vsel %vm3070_vm14, %v2462_v1, %v1505_v28  ;;  %v2466_v14 = vrot.slane %v1483_v33, 9  ;;  %v1521_v13 = vrot.slane %v3268_v56, 5  ;;  %v1987_v43 = vld [vmem:[#allocation2 + $0x18] sm:$0xe] }
 0x12a   : > { %2669 = vmatmul.mubr.msk.bf16.gmra.mxu0 %vm788_vm15, %v2457_v22  ;;  %2732 = vmatprep.subr.msk.bf16.mxu1 %vm801_vm8, %v2488_v60  ;;  %v2791_v60 = vld [vmem:[#allocation2 + $0x38] ss:$8 sps:$4 sm:$0xff]   ;;  %v2497_v45 = vrot.slane %v1986_v19, 9  ;;  %v2012_v38 = vrot.slane %v3339_v36, 5  ;;  %v1773_v48 = vshrl.u32 %v1756_v4, 16  ;;  %v1776_v3 = vshll.u32 %v1756_v4, 16 }
 0x12b   : > { %2684 = vmatprep.mubr.msk.bf16.mxu0 %vm788_vm15, %v2790_v6  ;;  %v2471_v29 = vcombine.low %v1506_v41, %v1510_v35  ;;  %v3354_v42 = vsel %vm3070_vm14, %v2464_v31, %v1513_v32  ;;  %v2469_v50 = vrot.slane %v1486_v9, 9  ;;  %v1533_v55 = vrot.slane %v3295_v30, 5  ;;  %v3357_v12 = vld [vmem:[#allocation2 + $0x24] sm:$0x1]  ;;  %v1988_v56 = vld [vmem:[#allocation2 + $0x20] sm:$0xe] }
 0x12c   : > { %v2792_v20 = vld [vmem:[#allocation2 + $0x20] ss:$8 sps:$4 sm:$0xff]   ;;  %v1518_v57 = vsel %vm3070_vm14, %v2465_v37, %v1517_v11  ;;  %v3363_v58 = vsel %vm3070_vm14, %v2467_v39, %v1525_v25  ;;  %v3365_v7 = vld [vmem:[#allocation2 + $0x2c] sm:$0x1]  ;;  %v1787_v8 = vshrl.u32 %v1758_v44, 16  ;;  %v1790_v21 = vshll.u32 %v1758_v44, 16 }
 0x12d   : > { %v2498_v61 = vrot.slane %v1987_v43, 9  ;;  %v2016_v2 = vrot.slane %v3345_v40, 5  ;;  %v2468_v10 = vrot.slane %v1485_v47, 9  ;;  %v1529_v30 = vrot.slane %v3279_v24, 5  ;;  %v1989_v16 = vld [vmem:[#allocation2 + $0x28] sm:$0xe] }
 0x12e   : > { %v2499_v34 = vrot.slane %v1988_v56, 9  ;;  %v2020_v17 = vrot.slane %v3357_v12, 5  ;;  %v1775_v15 = vrot.slane %v1773_v48, 4  ;;  %v1778_v23 = vrot.slane %v1776_v3, 5  ;;  %v1762_v52 = vld [vmem:[#allocation2 + $0x28] sm:$0xf] }
 0x12f   : > { %v2793_v27 = vld [vmem:[#allocation2 + $0x30] ss:$8 sps:$4 sm:$0xff]   ;;  %v2472_v1 = vcombine.low %v3354_v42, %v1518_v57  ;;  %v1522_v28 = vsel %vm3070_vm14, %v2466_v14, %v1521_v13  ;;  %v2013_v24 = vsel %vm3070_vm14, %v2497_v45, %v2012_v38  ;;  %v3379_v54 = vsel %vm3070_vm14, %v2469_v50, %v1533_v55  ;;  %v1760_v32 = vld [vmem:[#allocation2 + $0x20] sm:$0xf]  ;;  %v3398_v41 = vld [vmem:[#allocation2 + $0x34] sm:$0x1] }
 0x130   : > { %2659 = vmatmul.mubr.msk.bf16.gmra.mxu1 %vm788_vm15, %v2791_v60  ;;  %v2500_v46 = vrot.slane %v1989_v16, 9  ;;  %v2024_v22 = vrot.slane %v3365_v7, 5  ;;  %v1789_v6 = vrot.slane %v1787_v8, 4  ;;  %v1792_v31 = vrot.slane %v1790_v21, 5  ;;  %v1990_v4 = vld [vmem:[#allocation2 + $0x30] sm:$0xe] }
 0x131   : > { %2674 = vmatprep.mubr.msk.bf16.mxu1 %vm788_vm15, %v2471_v29  ;;  %v2473_v33 = vcombine.low %v1522_v28, %v3363_v58  ;;  %v2017_v35 = vsel %vm3070_vm14, %v2498_v61, %v2016_v2  ;;  %v3390_v19 = vsel %vm3070_vm14, %v2468_v10, %v1529_v30  ;;  %v1815_v37 = vshrl.u32 %v1762_v52, 16  ;;  %v3400_v14 = vld [vmem:[#allocation2 + $0x3c] sm:$0x1]  ;;  %v1991_v43 = vld [vmem:[#allocation2 + $0x38] sm:$0xe] }
 0x132   : > { %2685 = vmatmul.mubr.msk.bf16.vlgmr.msra.gmra.mxu0 %vm788_vm15, %v2792_v20  ;;  %v2506_v11 = vcombine.low %v2013_v24, %v2017_v35  ;;  %v2474_v39 = vcombine.low %v3390_v19, %v3379_v54  ;;  %v3396_v25 = vsel %vm3070_vm14, %v2499_v34, %v2020_v17  ;;  %v1779_v9 = vor.u32 %v1778_v23, %v1775_v15  ;;  %v1766_v29 = vld [vmem:[#allocation2 + $0x38] sm:$0xf]  ;;  %v2794_v42 = vld [vmem:[#allocation2 + $0x40] ss:$8 sps:$4 sm:$0xff]  }
 0x133   : > { %2688 = vmatprep.mubr.msk.bf16.mxu0 %vm788_vm15, %v2793_v27  ;;  %2703 = vmatpush3.bf16.msra.mxu0 %v3319_v62  ;;  %v1764_v62 = vld [vmem:[#allocation2 + $0x30] sm:$0xf]  ;;  %v1782_v13 = vshll.u32 %v3339_v36, 16  ;;  %v1801_v44 = vshrl.u32 %v1760_v32, 16  ;;  %v1804_v60 = vshll.u32 %v1760_v32, 16  ;;  %v1818_v45 = vshll.u32 %v1762_v52, 16 }
 0x134   : > { %v2025_v38 = vsel %vm3070_vm14, %v2500_v46, %v2024_v22  ;;  %v1793_v47 = vor.u32 %v1792_v31, %v1789_v6  ;;  %v1796_v48 = vshll.u32 %v3345_v40, 16  ;;  %v2501_v3 = vrot.slane %v1990_v4, 9  ;;  %v1768_v21 = vld [vmem:[#allocation2 + $0x40] sm:$0xf] }
 0x135   : > { %v2028_v50 = vrot.slane %v3398_v41, 5  ;;  %v1817_v55 = vrot.slane %v1815_v37, 4  ;;  %v1820_v56 = vrot.slane %v1818_v45, 5  ;;  %v1829_v20 = vshrl.u32 %v1764_v62, 16  ;;  %v1992_v35 = vld [vmem:[#allocation2 + $0x40] sm:$0xe] }
 0x136   : > { %v1780_v36 = vrot.slane %v1779_v9, 4  ;;  %v2502_v57 = vrot.slane %v1991_v43, 9  ;;  %v2032_v58 = vrot.slane %v3400_v14, 5  ;;  %v1832_v8 = vshll.u32 %v1764_v62, 16 }
 0x137   : > { %v1803_v40 = vrot.slane %v1801_v44, 4  ;;  %v1806_v61 = vrot.slane %v1804_v60, 5  ;;  %v1831_v2 = vrot.slane %v1829_v20, 4  ;;  %v1843_v10 = vshrl.u32 %v1766_v29, 16 }
 0x138   : > { %2675 = vmatmul.mubr.msk.bf16.vlgmr.msra.gmra.mxu1 %vm788_vm15, %v2472_v1  ;;  %v1784_v30 = vrot.slane %v1782_v13, 5  ;;  %v1794_v16 = vrot.slane %v1793_v47, 4  ;;  %v1834_v34 = vrot.slane %v1832_v8, 5  ;;  %v1846_v17 = vshll.u32 %v1766_v29, 16 }
 0x139   : > { %2693 = vmatpush3.bf16.msra.mxu1 %v3316_v5  ;;  %2678 = vmatprep.mubr.msk.bf16.mxu1 %vm788_vm15, %v2473_v33  ;;  %v1798_v15 = vrot.slane %v1796_v48, 5  ;;  %v1821_v23 = vor.u32 %v1820_v56, %v1817_v55  ;;  %v1845_v52 = vrot.slane %v1843_v10, 4  ;;  %v1857_v27 = vshrl.u32 %v1768_v21, 16  ;;  %v1769_v33 = vld [vmem:[#allocation2 + $0x44] sm:$0x1] }
 0x13a   : > { %2689 = vmatmul.mubr.msk.bf16.gmra.mxu0 %vm788_vm15, %v2794_v42  ;;  %v1785_v5 = vsel %vm3060_vm13, %v1780_v36, %v1784_v30  ;;  %v1835_v1 = vor.u32 %v1834_v34, %v1831_v2  ;;  %v1848_v28 = vrot.slane %v1846_v17, 5  ;;  %v1860_v24 = vshll.u32 %v1768_v21, 16 }
 0x13b   : > { %2704 = vmatprep.mubr.msk.bf16.mxu0 %vm788_vm15, %v2506_v11  ;;  %v2029_v54 = vsel %vm3070_vm14, %v2501_v3, %v2028_v50  ;;  %v2033_v46 = vsel %vm3070_vm14, %v2502_v57, %v2032_v58  ;;  %v1807_v22 = vor.u32 %v1806_v61, %v1803_v40  ;;  %v1824_v6 = vshll.u32 %v3365_v7, 16 }
 0x13c   : > { %v1799_v31 = vsel %vm3060_vm13, %v1794_v16, %v1798_v15  ;;  %v1810_v32 = vshll.u32 %v3357_v12, 16  ;;  %v1838_v19 = vshll.u32 %v3398_v41, 16  ;;  %v1849_v4 = vor.u32 %v1848_v28, %v1845_v52 }
 0x13d   : > { %v2489_v37 = vcombine.low %v1785_v5, %v1799_v31  ;;  %v1822_v11 = vrot.slane %v1821_v23, 4  ;;  %v1859_v9 = vrot.slane %v1857_v27, 4  ;;  %v1862_v62 = vrot.slane %v1860_v24, 5 }
 0x13e   : > { %v2507_v13 = vcombine.low %v3396_v25, %v2025_v38  ;;  %v2508_v43 = vcombine.low %v2029_v54, %v2033_v46  ;;  %v1836_v7 = vrot.slane %v1835_v1, 4  ;;  %v1852_v44 = vshll.u32 %v3400_v14, 16 }
 0x13f   : > { %v1808_v12 = vrot.slane %v1807_v22, 4  ;;  %v1826_v60 = vrot.slane %v1824_v6, 5  ;;  %v2503_v45 = vrot.slane %v1992_v35, 9  ;;  %v2036_v47 = vrot.slane %v1769_v33, 5 }
 0x140   : > { %2679 = vmatmul.mubr.msk.bf16.gmra.mxu1 %vm788_vm15, %v2474_v39  ;;  %v1840_v41 = vrot.slane %v1838_v19, 5  ;;  %v1850_v48 = vrot.slane %v1849_v4, 4  ;;  %v1877_v3 = vor.u32 %v3327_v59, %v3325_v53  ;;  %v1812_v39 = vrot.slane %v1810_v32, 5 }
 0x141   : > { %2694 = vmatprep.mubr.msk.bf16.mxu1 %vm788_vm15, %v2489_v37  ;;  %v1827_v25 = vsel %vm3060_vm13, %v1822_v11, %v1826_v60  ;;  %v1863_v14 = vor.u32 %v1862_v62, %v1859_v9  ;;  %v1880_v38 = vshll.u32 %v3307_v49, 16  ;;  %v1854_v42 = vrot.slane %v1852_v44, 5 }
 0x142   : > { %2705 = vmatmul.mubr.msk.bf16.vlgmr.msra.gmra.mxu0 %vm788_vm15, %v2507_v13  ;;  %v1841_v29 = vsel %vm3060_vm13, %v1836_v7, %v1840_v41  ;;  %v1813_v50 = vsel %vm3060_vm13, %v1808_v12, %v1812_v39  ;;  %v2037_v55 = vsel %vm3070_vm14, %v2503_v45, %v2036_v47  ;;  %v2041_v53 = vsel %vm3070_vm14, %v2504_v63, %v2040_v0  ;;  %v2171_v0 = vld [vmem:[%s3589_s5] sm:$0xf] }
 0x143   : > { %2708 = vmatprep.mubr.msk.bf16.mxu0 %vm788_vm15, %v2508_v43  ;;  %v1866_v59 = vshll.u32 %v1769_v33, 16  ;;  %v2490_v56 = vcombine.low %v1813_v50, %v1827_v25  ;;  %v1855_v20 = vsel %vm3060_vm13, %v1850_v48, %v1854_v42  ;;  %v1864_v57 = vrot.slane %v1863_v14, 4  ;;  %2734 = vmatprep.subr.msk.bf16.mxu1 %vm801_vm8, %v2171_v0 }
 0x144   : > { %v2491_v36 = vcombine.low %v1841_v29, %v1855_v20  ;;  %v1878_v58 = vrot.slane %v1877_v3, 4  ;;  %v1882_v8 = vrot.slane %v1880_v38, 5  ;;  %v2509_v21 = vcombine.low %v2037_v55, %v2041_v53 }
 0x145   : > { %v1868_v49 = vrot.slane %v1866_v59, 5  ;;  %v2208_v40 = vsel %vm801_vm8, %v2171_v0, 0 }
 0x146   : > { %v1883_v51 = vsel %vm3060_vm13, %v1878_v58, %v1882_v8 }
 0x147   : > { %v1869_v26 = vsel %vm3060_vm13, %v1864_v57, %v1868_v49 }
 0x148   : > { %2695 = vmatmul.mubr.msk.bf16.vlgmr.msra.gmra.mxu1 %vm788_vm15, %v2490_v56  ;;  %v2492_v63 = vcombine.low %v1869_v26, %v1883_v51 }
 0x149   : > { %2698 = vmatprep.mubr.msk.bf16.mxu1 %vm788_vm15, %v2491_v36  ;;  %2713 = vmatpush3.bf16.msra.mxu1 %v2208_v40 }
 0x14a   : > { %2709 = vmatmul.mubr.msk.bf16.gmra.mxu0 %vm788_vm15, %v2509_v21 }
 0x150   : > { %2699 = vmatmul.mubr.msk.bf16.gmra.mxu1 %vm788_vm15, %v2492_v63 }
 0x1c6   : > { %v2626_v61 = vpop.f32.mrf.mxu0 }
 0x1c8   : > { %v839_v2 = vpop.f32.mrf.mxu0 }
 0x1ca   : > { %v2627_v10 = vpop.f32.mrf.mxu0 }
 0x1cc   : > { %v842_v30 = vpop.f32.mrf.mxu0 }
 0x1ce   : > { %v2646_v16 = vpop.f32.mrf.mxu0 }
 0x1d0   : > { %v2630_v34 = vpop.f32.mrf.mxu1  ;;  %v1092_v18 = vpop.f32.mrf.mxu0 }
 0x1d2   : > { %v855_v17 = vpop.f32.mrf.mxu1  ;;  %v2647_v15 = vpop.f32.mrf.mxu0 }
 0x1d4   : > { %v2631_v23 = vpop.f32.mrf.mxu1  ;;  %v1095_v52 = vpop.f32.mrf.mxu0 }
 0x1d6   : > { %v3462_v27 = vpop.f32.mrf.mxu1  ;;  %v2650_v5 = vpop.f32.mrf.mxu0 }
 0x1d8   : > { %v2636_v1 = vpop.f32.mrf.mxu1  ;;  %v1108_v28 = vpop.f32.mrf.mxu0 }
 0x1d9   : > { %v948_v14 = vadd.f32 %v2636_v1, %v2626_v61 }
 0x1da   : > { %v939_v24 = vpop.f32.mrf.mxu1  ;;  %v3464_v54 = vpop.f32.mrf.mxu0 }
 0x1db   : > { %v940_v42 = vadd.f32 %v939_v24, %v839_v2  ;;  %v1125_v59 = vadd.f32 %v2646_v16, %v948_v14 }
 0x1dc   : > { %v2637_v46 = vpop.f32.mrf.mxu1  ;;  %v3466_v22 = vpop.f32.mrf.mxu0 }
 0x1dd   : > { %v951_v53 = vadd.f32 %v2637_v46, %v2627_v10  ;;  %v1123_v57 = vadd.f32 %v1092_v18, %v940_v42 }
 0x1de   : > { %v942_v6 = vpop.f32.mrf.mxu1 }
 0x1df   : > { %v2666_v31 = vpop.f32.mrf.mxu0  ;;  %v943_v36 = vadd.f32 %v942_v6, %v842_v30  ;;  %v1126_v26 = vadd.f32 %v2647_v15, %v951_v53 }
 0x1e0   : > { %v2640_v32 = vpop.f32.mrf.mxu1 }
 0x1e1   : > { %v1440_v33 = vpop.f32.mrf.mxu0  ;;  %v964_v51 = vadd.f32 %v2640_v32, %v2630_v34  ;;  %v1124_v2 = vadd.f32 %v1095_v52, %v943_v36 }
 0x1e2   : > { %v955_v35 = vpop.f32.mrf.mxu1 }
 0x1e3   : > { %v2667_v19 = vpop.f32.mrf.mxu0  ;;  %v956_v63 = vadd.f32 %v955_v35, %v855_v17  ;;  %v1129_v18 = vadd.f32 %v2650_v5, %v964_v51 }
 0x1e4   : > { %v2641_v4 = vpop.f32.mrf.mxu1 }
 0x1e5   : > { %v1443_v11 = vpop.f32.mrf.mxu0  ;;  %v967_v30 = vadd.f32 %v2641_v4, %v2631_v23  ;;  %v1127_v6 = vadd.f32 %v1108_v28, %v956_v63 }
 0x1e6   : > { %v958_v37 = vpop.f32.mrf.mxu1 }
 0x1e7   : > { %v959_v15 = vadd.f32 %v958_v37, %v3462_v27  ;;  %v1130_v53 = vadd.f32 %v3464_v54, %v967_v30 }
 0x1e8   : > { %v2656_v9 = vpop.f32.mrf.mxu1 }
 0x1e9   : > { %v1243_v58 = vadd.f32 %v2656_v9, %v1125_v59  ;;  %v1128_v5 = vadd.f32 %v3466_v22, %v959_v15 }
 0x1ea   : > { %v3468_v62 = vpop.f32.mrf.mxu0  ;;  %v1210_v13 = vpop.f32.mrf.mxu1 }
 0x1eb   : > { %v1241_v49 = vadd.f32 %v1210_v13, %v1123_v57  ;;  %v1473_v10 = vadd.f32 %v2666_v31, %v1243_v58 }
 0x1ec   : > { %v3470_v43 = vpop.f32.mrf.mxu0  ;;  %v2657_v7 = vpop.f32.mrf.mxu1 }
 0x1ed   : > { %v1244_v61 = vadd.f32 %v2657_v7, %v1126_v26  ;;  %v1471_v46 = vadd.f32 %v1440_v33, %v1241_v49 }
 0x1ee   : > { %v3472_v44 = vpop.f32.mrf.mxu0  ;;  %v1213_v12 = vpop.f32.mrf.mxu1 }
 0x1ef   : > { %v1242_v24 = vadd.f32 %v1213_v12, %v1124_v2  ;;  %v1474_v17 = vadd.f32 %v2667_v19, %v1244_v61 }
 0x1f0   : > { %v3474_v60 = vpop.f32.mrf.mxu0  ;;  %v2660_v45 = vpop.f32.mrf.mxu1 }
 0x1f1   : > { %v1247_v32 = vadd.f32 %v2660_v45, %v1129_v18  ;;  %v1472_v31 = vadd.f32 %v1443_v11, %v1242_v24 }
 0x1f2   : > { %v2686_v47 = vpop.f32.mrf.mxu0  ;;  %v1226_v41 = vpop.f32.mrf.mxu1 }
 0x1f3   : > { %v1245_v35 = vadd.f32 %v1226_v41, %v1127_v6  ;;  %v1477_v27 = vadd.f32 %v3468_v62, %v1247_v32 }
 0x1f4   : > { %v1717_v48 = vpop.f32.mrf.mxu0  ;;  %v2661_v3 = vpop.f32.mrf.mxu1 }
 0x1f5   : > { %v1475_v19 = vadd.f32 %v3470_v43, %v1245_v35  ;;  %v2514_v43 = vld [vmem:[%s3588_s4] ss:$0 sm:$0xff] }
 0x1f6   : > { %v2687_v39 = vpop.f32.mrf.mxu0  ;;  %v1229_v25 = vpop.f32.mrf.mxu1 }
 0x1f7   : > { %v1246_v41 = vadd.f32 %v1229_v25, %v1128_v5 }
 0x1f8   : > { %v3476_v38 = vpop.f32.mrf.mxu0  ;;  %v2676_v29 = vpop.f32.mrf.mxu1 }
 0x1f9   : > { %v1631_v9 = vadd.f32 %v2676_v29, %v1473_v10  ;;  %v1248_v29 = vadd.f32 %v2661_v3, %v1130_v53  ;;  %v1476_v62 = vadd.f32 %v3474_v60, %v1246_v41 }
 0x1fa   : > { %v3478_v50 = vpop.f32.mrf.mxu0  ;;  %v1598_v55 = vpop.f32.mrf.mxu1 }
 0x1fb   : > { %v1629_v34 = vadd.f32 %v1598_v55, %v1471_v46  ;;  %v1750_v33 = vadd.f32 %v2686_v47, %v1631_v9 }
 0x1fc   : > { %v3480_v56 = vpop.f32.mrf.mxu0  ;;  %v2677_v20 = vpop.f32.mrf.mxu1 }
 0x1fd   : > { %v1632_v52 = vadd.f32 %v2677_v20, %v1474_v17  ;;  %v1748_v4 = vadd.f32 %v1717_v48, %v1629_v34  ;;  %v1478_v48 = vadd.f32 %v3472_v44, %v1248_v29  ;;  %v2551_v29 = vld [vmem:[%s2960_s21 + $0x8] sm:$0xff]  }
 0x1fe   : > { %v3482_v8 = vpop.f32.mrf.mxu0  ;;  %v1601_v21 = vpop.f32.mrf.mxu1 }
 0x1ff   : > { %v1630_v28 = vadd.f32 %v1601_v21, %v1472_v31  ;;  %v1751_v59 = vadd.f32 %v2687_v39, %v1632_v52 }
 0x200   : > { %v3484_v0 = vpop.f32.mrf.mxu0  ;;  %v2680_v40 = vpop.f32.mrf.mxu1 }
 0x201   : > { %v1635_v11 = vadd.f32 %v2680_v40, %v1477_v27  ;;  %v1749_v22 = vadd.f32 %v3476_v38, %v1630_v28  ;;  %v2515_v27 = vld [vmem:[%s3590_s6] ss:$0 sm:$0xff] }
 0x202   : > { %v2706_v16 = vpop.f32.mrf.mxu0  ;;  %v1614_v1 = vpop.f32.mrf.mxu1 }
 0x203   : > { %v1633_v20 = vadd.f32 %v1614_v1, %v1475_v19  ;;  %v1754_v26 = vadd.f32 %v3478_v50, %v1635_v11  ;;  %v2536_v19 = vld [vmem:[%s2960_s21] sm:$0xff]  }
 0x204   : > { %v2105_v14 = vpop.f32.mrf.mxu0  ;;  %v2681_v42 = vpop.f32.mrf.mxu1 }
 0x205   : > { %v1636_v21 = vadd.f32 %v2681_v42, %v1478_v48  ;;  %v1752_v63 = vadd.f32 %v3480_v56, %v1633_v20 }
 0x206   : > { %v2707_v13 = vpop.f32.mrf.mxu0  ;;  %v1617_v7 = vpop.f32.mrf.mxu1 }
 0x207   : > { %v1634_v38 = vadd.f32 %v1617_v7, %v1476_v62  ;;  %v1755_v30 = vadd.f32 %v3482_v8, %v1636_v21 }
 0x208   : > { %v2108_v12 = vpop.f32.mrf.mxu0  ;;  %v2696_v23 = vpop.f32.mrf.mxu1 }
 0x209   : > { %v1980_v37 = vadd.f32 %v2696_v23, %v1750_v33 }
 0x20a   : > { %v1947_v45 = vpop.f32.mrf.mxu1  ;;  %v2710_v54 = vpop.f32.mrf.mxu0 }
 0x20b   : > { %v1978_v55 = vadd.f32 %v1947_v45, %v1748_v4  ;;  %v2138_v3 = vadd.f32 %v2706_v16, %v1980_v37  ;;  %v2541_v37 = vunpack.c.l.bf16 %v2551_v29 }
 0x20c   : > { %v2697_v36 = vpop.f32.mrf.mxu1  ;;  %v2121_v49 = vpop.f32.mrf.mxu0 }
 0x20d   : > { %v2136_v47 = vadd.f32 %v2105_v14, %v1978_v55  ;;  %v1981_v57 = vadd.f32 %v2697_v36, %v1751_v59  ;;  %v2153_v2 = vadd.f32 %v2514_v43, %v2138_v3  ;;  %v1753_v14 = vadd.f32 %v3484_v0, %v1634_v38  ;;  %v2553_v36 = vld [vmem:[%s2960_s21 + $0x18] sm:$0xff]  }
 0x20e   : > { %v1950_v58 = vpop.f32.mrf.mxu1  ;;  %v2711_v46 = vpop.f32.mrf.mxu0  ;;  %v2537_v55 = vunpack.c.l.bf16 %v2536_v19  ;;  %v2538_v3 = vunpack.c.h.bf16 %v2536_v19 }
 0x20f   : > { %v2139_v25 = vadd.f32 %v2707_v13, %v1981_v57  ;;  %v1979_v39 = vadd.f32 %v1950_v58, %v1749_v22  ;;  %v2151_v40 = vadd.f32 %v2514_v43, %v2136_v47  ;;  %v2161_v56 = vmax.f32 %v2153_v2, 0.0  ;;  %v2552_v58 = vld [vmem:[%s2960_s21 + $0x10] sm:$0xff]   ;;  %s2534_s21 = sshll.u32 %s2922_s28, 9  ;;  %s3544_s28 = scalar_lea.sflag [#allocation4], %s269_s22 }
 0x210   : > { %v2700_v51 = vpop.f32.mrf.mxu1  ;;  %v2124_v13 = vpop.f32.mrf.mxu0  ;;  %v2550_v2 = vunpack.c.h.bf16 %v2553_v36  ;;  %s3534_s14 = scalar_lea.hbm %s3591_s7, %s2534_s21 }
 0x211   : > { %v2154_v44 = vadd.f32 %v2514_v43, %v2139_v25  ;;  %v2137_v61 = vadd.f32 %v2108_v12, %v1979_v39  ;;  %v1984_v10 = vadd.f32 %v2700_v51, %v1754_v26  ;;  %v2159_v6 = vmax.f32 %v2151_v40, 0.0 }
 0x212   : > { %v1963_v60 = vpop.f32.mrf.mxu1  ;;  %v2545_v51 = vunpack.c.l.bf16 %v2552_v58 }
 0x213   : > { %v2152_v16 = vadd.f32 %v2514_v43, %v2137_v61  ;;  %v1982_v1 = vadd.f32 %v1963_v60, %v1752_v63  ;;  %v2162_v24 = vmax.f32 %v2154_v44, 0.0  ;;  %v2142_v42 = vadd.f32 %v2710_v54, %v1984_v10 }
 0x214   : > { %v2701_v18 = vpop.f32.mrf.mxu1  ;;  %v2542_v54 = vunpack.c.h.bf16 %v2551_v29 }
 0x215   : > { %v2160_v9 = vmax.f32 %v2152_v16, 0.0  ;;  %v2140_v50 = vadd.f32 %v2121_v49, %v1982_v1  ;;  %v1985_v15 = vadd.f32 %v2701_v18, %v1755_v30  ;;  %v2168_v35 = vpack.c.bf16 %v2162_v24, %v2161_v56 }
 0x216   : > { %v1966_v34 = vpop.f32.mrf.mxu1  ;;  %v2157_v8 = vadd.f32 %v2514_v43, %v2142_v42 }
 0x217   : > { %v2167_v17 = vpack.c.bf16 %v2160_v9, %v2159_v6  ;;  %v1983_v32 = vadd.f32 %v1966_v34, %v1753_v14  ;;  %v2143_v7 = vadd.f32 %v2711_v46, %v1985_v15  ;;  %v2155_v52 = vadd.f32 %v2514_v43, %v2140_v50 }
 0x218   : > { %v2165_v5 = vmax.f32 %v2157_v8, 0.0  ;;  %v2546_v46 = vunpack.c.h.bf16 %v2552_v58 }
 0x219   : > { %v2141_v31 = vadd.f32 %v2124_v13, %v1983_v32  ;;  %2714 = vmatprep.mubr.msk.bf16.mxu1 %vm788_vm15, %v2167_v17  ;;  %v2158_v53 = vadd.f32 %v2514_v43, %v2143_v7  ;;  %v2163_v33 = vmax.f32 %v2155_v52, 0.0 }
 0x21a   : > { %2715 = vmatmul.mubr.msk.bf16.vlgmr.msra.gmra.mxu1 %vm788_vm15, %v2168_v35 }
 0x21b   : > { %v2156_v0 = vadd.f32 %v2514_v43, %v2141_v31  ;;  %v2166_v12 = vmax.f32 %v2158_v53, 0.0  ;;  %v2549_v43 = vunpack.c.l.bf16 %v2553_v36 }
 0x21d   : > { %v2164_v23 = vmax.f32 %v2156_v0, 0.0  ;;  %v2170_v4 = vpack.c.bf16 %v2166_v12, %v2165_v5 }
 0x21f   : > { %v2169_v28 = vpack.c.bf16 %v2164_v23, %v2163_v33 }
 0x221   : > { %2718 = vmatprep.mubr.msk.bf16.mxu1 %vm788_vm15, %v2169_v28 }
 0x222   : > { %2719 = vmatmul.mubr.msk.bf16.gmra.mxu1 %vm788_vm15, %v2170_v4 }
 0x2da   : > { %v2716_v45 = vpop.f32.mrf.mxu1 }
 0x2db   : > { %v2253_v41 = vadd.f32 %v2716_v45, %v2515_v27 }
 0x2dc   : > { %v2244_v59 = vpop.f32.mrf.mxu1 }
 0x2dd   : > { %v2277_v11 = vadd.f32 %v2541_v37, %v2253_v41  ;;  %v2245_v20 = vadd.f32 %v2515_v27, %v2244_v59 }
 0x2de   : > { %v2717_v47 = vpop.f32.mrf.mxu1 }
 0x2df   : > { %v2285_v57 = vmax.f32 %v2277_v11, 0.0  ;;  %v2275_v22 = vadd.f32 %v2537_v55, %v2245_v20  ;;  %v2256_v48 = vadd.f32 %v2717_v47, %v2515_v27 }
 0x2e0   : > { %v2247_v62 = vpop.f32.mrf.mxu1 }
 0x2e1   : > { %v2293_v25 = vpack.c.bf16 %v2285_v57, %v2285_v57  ;;  %v2283_v39 = vmax.f32 %v2275_v22, 0.0  ;;  %v2278_v21 = vadd.f32 %v2542_v54, %v2256_v48  ;;  %v2248_v49 = vadd.f32 %v2515_v27, %v2247_v62 }
 0x2e2   : > { %v2720_v26 = vpop.f32.mrf.mxu1 }
 0x2e3   : > { %2302 = vst.msk [vmem:[%s3515_s29 + $0x8] sm:$0xf] %vm2299_vm0, %v2293_v25  ;;  %v2291_v63 = vpack.c.bf16 %v2283_v39, %v2283_v39  ;;  %v2286_v38 = vmax.f32 %v2278_v21, 0.0  ;;  %v2276_v40 = vadd.f32 %v2538_v3, %v2248_v49  ;;  %v2269_v44 = vadd.f32 %v2720_v26, %v2515_v27 }
 0x2e4   : > { %v2260_v61 = vpop.f32.mrf.mxu1 }
 0x2e5   : > { %2300 = vst.msk [vmem:[%s3515_s29] sm:$0xf] %vm2299_vm0, %v2291_v63  ;;  %v2294_v10 = vpack.c.bf16 %v2286_v38, %v2286_v38  ;;  %v2284_v60 = vmax.f32 %v2276_v40, 0.0  ;;  %v2281_v16 = vadd.f32 %v2549_v43, %v2269_v44  ;;  %v2261_v1 = vadd.f32 %v2515_v27, %v2260_v61 }
 0x2e6   : > { %v2721_v24 = vpop.f32.mrf.mxu1 }
 0x2e7   : > { %2303 = vst.msk [vmem:[%s3515_s29 + $0xc] sm:$0xf] %vm2299_vm0, %v2294_v10  ;;  %v2292_v30 = vpack.c.bf16 %v2284_v60, %v2284_v60  ;;  %v2289_v18 = vmax.f32 %v2281_v16, 0.0  ;;  %v2279_v6 = vadd.f32 %v2545_v51, %v2261_v1  ;;  %v2272_v9 = vadd.f32 %v2721_v24, %v2515_v27 }
 0x2e8   : > { %v2263_v50 = vpop.f32.mrf.mxu1 }
 0x2e9   : > { %2301 = vst.msk [vmem:[%s3515_s29 + $0x4] sm:$0xf] %vm2299_vm0, %v2292_v30  ;;  %v2297_v14 = vpack.c.bf16 %v2289_v18, %v2289_v18  ;;  %v2287_v56 = vmax.f32 %v2279_v6, 0.0  ;;  %v2282_v42 = vadd.f32 %v2550_v2, %v2272_v9  ;;  %v2264_v15 = vadd.f32 %v2515_v27, %v2263_v50 }
 0x2eb   : > { %2306 = vst.msk [vmem:[%s3515_s29 + $0x18] sm:$0xf] %vm2299_vm0, %v2297_v14  ;;  %v2295_v34 = vpack.c.bf16 %v2287_v56, %v2287_v56  ;;  %v2290_v17 = vmax.f32 %v2282_v42, 0.0  ;;  %v2280_v32 = vadd.f32 %v2546_v46, %v2264_v15 }
 0x2ed   : > { %2304 = vst.msk [vmem:[%s3515_s29 + $0x10] sm:$0xf] %vm2299_vm0, %v2295_v34  ;;  %v2298_v35 = vpack.c.bf16 %v2290_v17, %v2290_v17  ;;  %v2288_v13 = vmax.f32 %v2280_v32, 0.0 }
 0x2ef   : > { %2307 = vst.msk [vmem:[%s3515_s29 + $0x1c] sm:$0xf] %vm2299_vm0, %v2298_v35  ;;  %v2296_v7 = vpack.c.bf16 %v2288_v13, %v2288_v13 }
 0x2f1   : > { %2305 = vst.msk [vmem:[%s3515_s29 + $0x14] sm:$0xf] %vm2299_vm0, %v2296_v7 }
 0x2f2   : > { %2808 = shalt.err (!%p2805_p3)
}
 0x2f3   : > { %s2809_s19 = scalar_lea.hbm %s3534_s14, 512  ;;  %s2813_s23 = scalar_lea.hbm %s3591_s7, 1024 }
 0x2f4   : > { %p2810_p4 = scmp.ne.s32.totalorder %s3534_s14, %s2809_s19  ;;  %p2814_p9 = scmp.lt.s32.totalorder %s3534_s14, %s3591_s7 }
 0x2f5   : > { %p2815_p10 = scmp.lt.s32.totalorder %s2813_s23, %s2809_s19 }
 0x2f6   : > { %p2811_p7 = pnand %p2810_p4, %p2939_p5 }
 0x2f7   : > { %p2816_p11 = por %p2815_p10, %p2814_p9 }
 0x2f8   : > { %p2812_p8 = pneg %p2811_p7 }
 0x2fa   : > { %p2817_p12 = pnand %p2816_p11, %p2812_p8 }
 0x2fc   : > { %2820 = shalt.err (!%p2817_p12)
}
 0x2fd   : > { %s2859_s9 = smov 64   ;;  %s2860_s13 = smov 4  }
 0x2fe   : > { %2735 = dma.vmem_to_hbm [thread:$0]  (%p2939_p5), %s3536_s8, 512, %s3534_s14, %s3544_s28, %s2859_s9, %s2859_s9, %s2860_s13  }
 0x2ff PF: > { %p2741_p13 = scmp.ge.s32.totalorder %s2855_s27, 2  ;;  %s2337_s15 = sand.u32 1, %s2843_s24  }
 0x300   : > { %s2338_s16 = scalar_lea.sflag [#allocation4], %s2337_s15 }
 0x301   : > { %p2738_p0 = pnand %p2741_p13, %p2943_p6 }
 0x303   : > { %p2739_p1 = pneg %p2738_p0 }
 0x305   : > { %2838 = dma.done.wait (%p2739_p1), %s2338_s16, 512  }
 0x306   : > { %2840 = vsyncadd (%p2739_p1), %s2338_s16, 4294966784  ;;  %p17_p2 = scmp.ge.s32.totalorder %s2926_s30, 4   ;;  %s3604_s24 = smov %s2847_s25 }
 0x307   : > { %s3605_s25 = smov %s2851_s26  ;;  %s3606_s26 = smov %s2937_s10 }
 0x308   : > { %s3607_s27 = smov %s2926_s30  ;;  %19 = sbr.rel (!%p17_p2) target bundleno = 3 (0x3), region = 94 }
 0x30d   :  { %2343 = vsyncpa [#allocation4], 1 }
 0x30e   :  { %2345 = vsyncpa [#allocation4 + $0x1], 1 }

</bundles_post_ra>
